<compile_context>
chip_gen: v5e
topology: v5e:2x2
jax: 0.10.0
libtpu: 0.0.40
codegen_flags: <defaults>
</compile_context>

<pallas_src>
import jax
import jax.numpy as jnp
from jax import lax
from jax.experimental import pallas as pl
from jax.experimental.pallas import tpu as pltpu


def encoder_block_kernel(x_ref, whl_ref, wvl_ref, bhv_ref, wcb_ref, bcl_ref,
                         w1_ref, w2_ref, wpb_ref, bpl_ref,
                         out0_ref, pool_ref):
    Nb, H, WCin = x_ref.shape                 # x packed as (Nb, H, W*Cin)
    K = whl_ref.shape[0]
    P = K // 2
    Cout, _ = w1_ref.shape
    WCout = wcb_ref.shape[1]
    W = WCout // Cout
    Cin = WCin // W
    Ho, Wo = H // 2, W // 2

    x = x_ref[...]                            # (Nb, H, W*Cin), f32, lane-dense
    whl = whl_ref[...]                        # (K, 1, W*Cin) lane-tiled weights
    wvl = wvl_ref[...]                        # (K, 1, W*Cin)

    # residual + both depthwise-conv biases
    acc = x + bhv_ref[...]                    # (1,1,W*Cin) broadcasts

    # --- horizontal depthwise conv: lane rolls + edge masks (XLU) ---
    lane = lax.broadcasted_iota(jnp.int32, (1, 1, WCin), 2)
    for k in range(K):
        d = k - P
        if d == 0:
            tap = x
        else:
            rolled = pltpu.roll(x, shift=(-d * Cin) % WCin, axis=2)
            if d > 0:
                valid = lane < (W - d) * Cin
            else:
                valid = lane >= (-d) * Cin
            tap = jnp.where(valid, rolled, 0.0)
        acc = acc + whl[k] * tap

    # --- vertical depthwise conv: shifted row copies with zero boundary ---
    for k in range(K):
        d = k - P
        if d == 0:
            tap = x
        elif d > 0:
            tap = jnp.concatenate(
                [x[:, d:, :], jnp.zeros((Nb, d, WCin), jnp.float32)], axis=1)
        else:
            tap = jnp.concatenate(
                [jnp.zeros((Nb, -d, WCin), jnp.float32), x[:, :H + d, :]], axis=1)
        acc = acc + wvl[k] * tap

    y = jnp.maximum(acc, 0.0)                 # relu(h_out + v_out + x)

    # --- 1x1 conv Cin->Cout on the MXU, block-diagonal (stays lane-packed) ---
    z2 = jnp.dot(y.reshape(Nb * H, WCin), wcb_ref[...],
                 preferred_element_type=jnp.float32) + bcl_ref[...]
    z3 = z2.reshape(Nb, H, WCout)             # (Nb, H, W*Cout)

    # --- CALayer: global mean -> tiny MLP on the VPU -> sigmoid scale ---
    s = jnp.sum(z3, axis=1)                                   # (Nb, W*Cout)
    pooled = jnp.sum(s.reshape(Nb, W, Cout), axis=1) * (1.0 / (H * W))
    hid = jnp.maximum(
        jnp.sum(pooled[:, :, None] * w1_ref[...][None, :, :], axis=1), 0.0)
    scale = jax.nn.sigmoid(
        jnp.sum(hid[:, :, None] * w2_ref[...][None, :, :], axis=1))  # (Nb, Cout)
    scale_l = jnp.broadcast_to(scale[:, None, :], (Nb, W, Cout)).reshape(Nb, WCout)
    a3 = z3 * scale_l[:, None, :]             # (Nb, H, W*Cout)

    out0_ref[...] = a3                        # lane-dense store (out0)

    # --- PointwiseConv (1x1 Cout->Cout, block-diagonal on MXU) + ReLU ---
    p2 = jnp.maximum(
        jnp.dot(a3.reshape(Nb * H, WCout), wpb_ref[...],
                preferred_element_type=jnp.float32) + bpl_ref[...], 0.0)
    p3 = p2.reshape(Nb, H, WCout)

    # --- MaxPool 2x2 stride 2: adjacent-row max, then lane-group max ---
    p4 = p3.reshape(Nb, Ho, 2, WCout)
    hm = jnp.maximum(p4[:, :, 0, :], p4[:, :, 1, :])          # (Nb, Ho, W*Cout)
    h4 = hm.reshape(Nb, Ho, Wo, 2 * Cout)
    wm = jnp.maximum(h4[..., :Cout], h4[..., Cout:])          # (Nb, Ho, Wo, Cout)
    pool_ref[...] = wm.reshape(Nb, Ho, Wo * Cout)             # lane-dense store


def _full_spec(shape):
    nd = len(shape)
    return pl.BlockSpec(shape, lambda *args, _nd=nd: (0,) * _nd)


def _auto_batch_block(N, H, W, Cin, Cout, vmem_budget_bytes=24 * 1024 * 1024):
    """Pick images-per-grid-step: amortize step overhead, respect VMEM & 2 TCs."""
    per_img = 4 * H * W * (6 * Cin + 10 * Cout)   # rough live-VMEM per image (f32)
    best = 1
    for nb in range(1, min(N, 64) + 1):
        if N % nb:
            continue
        if nb * per_img > vmem_budget_bytes:
            break
        if N >= 2 and N // nb < 2:                # keep >= 2 grid steps (v7x: 2 TCs)
            continue
        best = nb
    return best


def encoder_block_nhwc(x_nhwc, params, *, batch_block=None):
    """EncoderBlock forward on NHWC input; returns (out0, pooled) in NHWC.

    No HBM transposes happen here: packing NHWC -> (N, H, W*C) is a free
    row-major reshape. Use this entry point when stacking blocks.
    """
    wh, bh, wv, bv, wc, bc, w1, w2, wp, bp = params
    N, H, W, Cin = x_nhwc.shape
    Cout = wc.shape[1]
    K = wh.shape[0]
    assert H % 2 == 0 and W % 2 == 0, "MaxPool2d(2,2) needs even H, W"
    # Lane-dense (unmasked) loads/stores require the packed minor dims to be
    # multiples of 128; pad W or channels upstream otherwise.
    assert (W * Cin) % 128 == 0, "W*Cin must be a multiple of 128"
    assert (W * Cout) % 128 == 0, "W*Cout must be a multiple of 128"
    assert ((W // 2) * Cout) % 128 == 0, "(W/2)*Cout must be a multiple of 128"

    Nb = batch_block if batch_block is not None else _auto_batch_block(N, H, W, Cin, Cout)
    assert N % Nb == 0
    Ho, Wo = H // 2, W // 2

    f32 = jnp.float32
    x_p = x_nhwc.astype(f32).reshape(N, H, W * Cin)           # free reshape

    # Lane-tiled / block-diagonal weights (built once per call; tiny).
    eyeW = jnp.eye(W, dtype=f32)
    whl = jnp.tile(wh.astype(f32), (1, W)).reshape(K, 1, W * Cin)
    wvl = jnp.tile(wv.astype(f32), (1, W)).reshape(K, 1, W * Cin)
    bhv = jnp.tile((bh + bv).astype(f32), W).reshape(1, 1, W * Cin)
    wcb = jnp.einsum('wv,io->wivo', eyeW, wc.astype(f32)).reshape(W * Cin, W * Cout)
    bcl = jnp.tile(bc.astype(f32), W).reshape(1, W * Cout)
    wpb = jnp.einsum('wv,io->wivo', eyeW, wp.astype(f32)).reshape(W * Cout, W * Cout)
    bpl = jnp.tile(bp.astype(f32), W).reshape(1, W * Cout)
    w1f, w2f = w1.astype(f32), w2.astype(f32)

    inputs = (x_p, whl, wvl, bhv, wcb, bcl, w1f, w2f, wpb, bpl)

    in_specs = [pl.BlockSpec((Nb, H, W * Cin), lambda b: (b, 0, 0))]
    in_specs += [_full_spec(a.shape) for a in inputs[1:]]

    out_shape = (jax.ShapeDtypeStruct((N, H, W * Cout), f32),
                 jax.ShapeDtypeStruct((N, Ho, Wo * Cout), f32))
    out_specs = (pl.BlockSpec((Nb, H, W * Cout), lambda b: (b, 0, 0)),
                 pl.BlockSpec((Nb, Ho, Wo * Cout), lambda b: (b, 0, 0)))

    weight_bytes = sum(int(a.size) * 4 for a in inputs[1:])
    cost = pl.CostEstimate(
        flops=int(N * H * W * (4 * K * Cin + 2 * Cin * Cout + 2 * Cout * Cout)),
        transcendentals=int(N * Cout),
        bytes_accessed=int(4 * (x_p.size + N * H * W * Cout + N * Ho * Wo * Cout)
                           + weight_bytes))

    out0_p, pool_p = pl.pallas_call(
        encoder_block_kernel,
        grid=(N // Nb,),
        in_specs=in_specs,
        out_specs=out_specs,
        out_shape=out_shape,
        compiler_params=pltpu.CompilerParams(
            dimension_semantics=("parallel",),
            # Leaves headroom on v7x's 64 MiB physical VMEM; _auto_batch_block
            # caps the working set well below this.
            vmem_limit_bytes=48 * 1024 * 1024),
        cost_estimate=cost,
    )(*inputs)

    return (out0_p.reshape(N, H, W, Cout),            # free reshapes
            pool_p.reshape(N, Ho, Wo, Cout))


def encoder_block(x_nchw, params, *, batch_block=None):
    """NCHW wrapper matching the PyTorch module interface.

    The two transposes below are full HBM passes over the activations; when
    stacking several such blocks keep activations NHWC end-to-end and call
    encoder_block_nhwc directly.
    """
    x_nhwc = jnp.transpose(x_nchw, (0, 2, 3, 1))
    out0, pooled = encoder_block_nhwc(x_nhwc, params, batch_block=batch_block)
    return (jnp.transpose(out0, (0, 3, 1, 2)),
            jnp.transpose(pooled, (0, 3, 1, 2)))


def reference(x_nchw, params):
    """Pure-JAX reference mirroring the PyTorch forward (NCHW)."""
    wh, bh, wv, bv, wc, bc, w1, w2, wp, bp = params
    N, Cin, H, W = x_nchw.shape
    K = wh.shape[0]
    dn = ('NCHW', 'OIHW', 'NCHW')
    wh4 = jnp.transpose(wh)[:, None, None, :]   # (Cin,1,1,K)
    wv4 = jnp.transpose(wv)[:, None, :, None]   # (Cin,1,K,1)
    h = lax.conv_general_dilated(x_nchw, wh4, (1, 1), ((0, 0), (K // 2, K // 2)),
                                 dimension_numbers=dn, feature_group_count=Cin,
                                 precision=lax.Precision.HIGHEST)
    h = h + bh[None, :, None, None]
    v = lax.conv_general_dilated(x_nchw, wv4, (1, 1), ((K // 2, K // 2), (0, 0)),
                                 dimension_numbers=dn, feature_group_count=Cin,
                                 precision=lax.Precision.HIGHEST)
    v = v + bv[None, :, None, None]
    y = jax.nn.relu(h + v + x_nchw)
    z = jnp.einsum('nchw,co->nohw', y, wc,
                   precision=lax.Precision.HIGHEST) + bc[None, :, None, None]
    pooled = jnp.mean(z, axis=(2, 3))
    s = jax.nn.sigmoid(jax.nn.relu(pooled @ w1) @ w2)
    out0 = z * s[:, :, None, None]
    p = jax.nn.relu(jnp.einsum('nchw,co->nohw', out0, wp,
                               precision=lax.Precision.HIGHEST)
                    + bp[None, :, None, None])
    pool = lax.reduce_window(p, -jnp.inf, lax.max,
                             (1, 1, 2, 2), (1, 1, 2, 2), 'VALID')
    return out0, pool


if __name__ == "__main__":
    key = jax.random.PRNGKey(0)
    N, Cin, Cout, H, W = 2, 8, 32, 16, 16
    reduction = 16
    Cr = Cout // reduction
    ks = jax.random.split(key, 12)

    x = jax.random.normal(ks[0], (N, Cin, H, W), jnp.float32)
    wh = 0.2 * jax.random.normal(ks[1], (5, Cin), jnp.float32)    # horiz dw (tap, ch)
    bh = 0.1 * jax.random.normal(ks[2], (Cin,), jnp.float32)
    wv = 0.2 * jax.random.normal(ks[3], (5, Cin), jnp.float32)    # vert dw
    bv = 0.1 * jax.random.normal(ks[4], (Cin,), jnp.float32)
    wc = 0.2 * jax.random.normal(ks[5], (Cin, Cout), jnp.float32)   # 1x1 -> Cout
    bc = 0.1 * jax.random.normal(ks[6], (Cout,), jnp.float32)
    w1 = 0.2 * jax.random.normal(ks[7], (Cout, Cr), jnp.float32)    # CA mlp (no bias)
    w2 = 0.2 * jax.random.normal(ks[8], (Cr, Cout), jnp.float32)
    wp = 0.2 * jax.random.normal(ks[9], (Cout, Cout), jnp.float32)  # pwconv
    bp = 0.1 * jax.random.normal(ks[10], (Cout,), jnp.float32)
    params = (wh, bh, wv, bv, wc, bc, w1, w2, wp, bp)

    # 1) auto batch_block (=1 here: grid of 2 keeps both v7x TCs busy)
    out0, pooled = encoder_block(x, params)
    jax.block_until_ready((out0, pooled))

    ref0, refp = reference(x, params)
    assert out0.shape == (N, Cout, H, W)
    assert pooled.shape == (N, Cout, H // 2, W // 2)
    assert jnp.allclose(out0, ref0, atol=2e-3, rtol=2e-3)
    assert jnp.allclose(pooled, refp, atol=2e-3, rtol=2e-3)

    # 2) exercise the multi-image batch-block path (Nb > 1)
    x4 = jnp.concatenate([x, 0.5 * x], axis=0)                  # N=4
    out0_4, pooled_4 = encoder_block(x4, params, batch_block=2)
    jax.block_until_ready((out0_4, pooled_4))
    ref0_4, refp_4 = reference(x4, params)
    assert jnp.allclose(out0_4, ref0_4, atol=2e-3, rtol=2e-3)
    assert jnp.allclose(pooled_4, refp_4, atol=2e-3, rtol=2e-3)

    print("KERNEL_OK")
</pallas_src>

<mosaic_0001>
module attributes {stable_mosaic.version = 11 : i64} {
  func.func @encoder_block_kernel(%arg0: i32, %arg1: memref<1x16x128xf32, #tpu.memory_space<vmem>>, %arg2: memref<5x1x128xf32, #tpu.memory_space<vmem>>, %arg3: memref<5x1x128xf32, #tpu.memory_space<vmem>>, %arg4: memref<1x1x128xf32, #tpu.memory_space<vmem>>, %arg5: memref<128x512xf32, #tpu.memory_space<vmem>>, %arg6: memref<1x512xf32, #tpu.memory_space<vmem>>, %arg7: memref<32x2xf32, #tpu.memory_space<vmem>>, %arg8: memref<2x32xf32, #tpu.memory_space<vmem>>, %arg9: memref<512x512xf32, #tpu.memory_space<vmem>>, %arg10: memref<1x512xf32, #tpu.memory_space<vmem>>, %arg11: memref<1x16x512xf32, #tpu.memory_space<vmem>>, %arg12: memref<1x8x256xf32, #tpu.memory_space<vmem>>) attributes {dimension_semantics = [#tpu.dimension_semantics<parallel>], iteration_bounds = array<i64: 2>, scalar_prefetch = 0 : i64, scratch_operands = 0 : i64, tpu.core_type = #tpu.core_type<tc>, window_params = [{transform_indices = @transform_0, window_bounds = array<i64: 1, 16, 128>}, {pipeline_mode = #tpu.pipeline_mode<synchronous>, transform_indices = @transform_1, window_bounds = array<i64: 5, 1, 128>}, {pipeline_mode = #tpu.pipeline_mode<synchronous>, transform_indices = @transform_2, window_bounds = array<i64: 5, 1, 128>}, {pipeline_mode = #tpu.pipeline_mode<synchronous>, transform_indices = @transform_3, window_bounds = array<i64: 1, 1, 128>}, {pipeline_mode = #tpu.pipeline_mode<synchronous>, transform_indices = @transform_4, window_bounds = array<i64: 128, 512>}, {pipeline_mode = #tpu.pipeline_mode<synchronous>, transform_indices = @transform_5, window_bounds = array<i64: 1, 512>}, {pipeline_mode = #tpu.pipeline_mode<synchronous>, transform_indices = @transform_6, window_bounds = array<i64: 32, 2>}, {pipeline_mode = #tpu.pipeline_mode<synchronous>, transform_indices = @transform_7, window_bounds = array<i64: 2, 32>}, {pipeline_mode = #tpu.pipeline_mode<synchronous>, transform_indices = @transform_8, window_bounds = array<i64: 512, 512>}, {pipeline_mode = #tpu.pipeline_mode<synchronous>, transform_indices = @transform_9, window_bounds = array<i64: 1, 512>}, {transform_indices = @transform_10, window_bounds = array<i64: 1, 16, 512>}, {transform_indices = @transform_11, window_bounds = array<i64: 1, 8, 256>}]} {
    %c0 = arith.constant 0 : index
    %c0_0 = arith.constant 0 : index
    %c0_1 = arith.constant 0 : index
    %0 = vector.load %arg1[%c0, %c0_0, %c0_1] : memref<1x16x128xf32, #tpu.memory_space<vmem>>, vector<1x16x128xf32>
    %c0_2 = arith.constant 0 : index
    %c0_3 = arith.constant 0 : index
    %c0_4 = arith.constant 0 : index
    %1 = vector.load %arg2[%c0_2, %c0_3, %c0_4] : memref<5x1x128xf32, #tpu.memory_space<vmem>>, vector<5x1x128xf32>
    %c0_5 = arith.constant 0 : index
    %c0_6 = arith.constant 0 : index
    %c0_7 = arith.constant 0 : index
    %2 = vector.load %arg3[%c0_5, %c0_6, %c0_7] : memref<5x1x128xf32, #tpu.memory_space<vmem>>, vector<5x1x128xf32>
    %c0_8 = arith.constant 0 : index
    %c0_9 = arith.constant 0 : index
    %c0_10 = arith.constant 0 : index
    %3 = vector.load %arg4[%c0_8, %c0_9, %c0_10] : memref<1x1x128xf32, #tpu.memory_space<vmem>>, vector<1x1x128xf32>
    %4 = vector.broadcast %3 : vector<1x1x128xf32> to vector<1x16x128xf32>
    %5 = arith.addf %0, %4 : vector<1x16x128xf32>
    %6 = tpu.iota {dimensions = array<i32: 2>} : vector<1x1x128xi32>
    %c16_i32 = arith.constant 16 : i32
    %7 = tpu.dynamic_rotate %0 by %c16_i32 dim 2 : vector<1x16x128xf32>, i32 -> vector<1x16x128xf32>
    %c16_i32_11 = arith.constant 16 : i32
    %8 = vector.broadcast %c16_i32_11 : i32 to vector<1x1x128xi32>
    %9 = arith.cmpi sge, %6, %8 : vector<1x1x128xi32>
    %cst = arith.constant 0.000000e+00 : f32
    %10 = vector.shape_cast %9 : vector<1x1x128xi1> to vector<1x1x128xi1>
    %11 = vector.broadcast %10 : vector<1x1x128xi1> to vector<1x16x128xi1>
    %12 = vector.broadcast %cst : f32 to vector<1x16x128xf32>
    %13 = arith.select %11, %7, %12 : vector<1x16x128xi1>, vector<1x16x128xf32>
    %14 = vector.extract_strided_slice %1 {offsets = [0, 0, 0], sizes = [1, 1, 128], strides = [1, 1, 1]} : vector<5x1x128xf32> to vector<1x1x128xf32>
    %15 = vector.shape_cast %14 : vector<1x1x128xf32> to vector<1x128xf32>
    %16 = vector.shape_cast %15 : vector<1x128xf32> to vector<1x1x128xf32>
    %17 = vector.broadcast %16 : vector<1x1x128xf32> to vector<1x16x128xf32>
    %18 = arith.mulf %17, %13 : vector<1x16x128xf32>
    %19 = arith.addf %5, %18 : vector<1x16x128xf32>
    %c8_i32 = arith.constant 8 : i32
    %20 = tpu.dynamic_rotate %0 by %c8_i32 dim 2 : vector<1x16x128xf32>, i32 -> vector<1x16x128xf32>
    %c8_i32_12 = arith.constant 8 : i32
    %21 = vector.broadcast %c8_i32_12 : i32 to vector<1x1x128xi32>
    %22 = arith.cmpi sge, %6, %21 : vector<1x1x128xi32>
    %cst_13 = arith.constant 0.000000e+00 : f32
    %23 = vector.shape_cast %22 : vector<1x1x128xi1> to vector<1x1x128xi1>
    %24 = vector.broadcast %23 : vector<1x1x128xi1> to vector<1x16x128xi1>
    %25 = vector.broadcast %cst_13 : f32 to vector<1x16x128xf32>
    %26 = arith.select %24, %20, %25 : vector<1x16x128xi1>, vector<1x16x128xf32>
    %27 = vector.extract_strided_slice %1 {offsets = [1, 0, 0], sizes = [1, 1, 128], strides = [1, 1, 1]} : vector<5x1x128xf32> to vector<1x1x128xf32>
    %28 = vector.shape_cast %27 : vector<1x1x128xf32> to vector<1x128xf32>
    %29 = vector.shape_cast %28 : vector<1x128xf32> to vector<1x1x128xf32>
    %30 = vector.broadcast %29 : vector<1x1x128xf32> to vector<1x16x128xf32>
    %31 = arith.mulf %30, %26 : vector<1x16x128xf32>
    %32 = arith.addf %19, %31 : vector<1x16x128xf32>
    %33 = vector.extract_strided_slice %1 {offsets = [2, 0, 0], sizes = [1, 1, 128], strides = [1, 1, 1]} : vector<5x1x128xf32> to vector<1x1x128xf32>
    %34 = vector.shape_cast %33 : vector<1x1x128xf32> to vector<1x128xf32>
    %35 = vector.shape_cast %34 : vector<1x128xf32> to vector<1x1x128xf32>
    %36 = vector.broadcast %35 : vector<1x1x128xf32> to vector<1x16x128xf32>
    %37 = arith.mulf %36, %0 : vector<1x16x128xf32>
    %38 = arith.addf %32, %37 : vector<1x16x128xf32>
    %c120_i32 = arith.constant 120 : i32
    %39 = tpu.dynamic_rotate %0 by %c120_i32 dim 2 : vector<1x16x128xf32>, i32 -> vector<1x16x128xf32>
    %c120_i32_14 = arith.constant 120 : i32
    %40 = vector.broadcast %c120_i32_14 : i32 to vector<1x1x128xi32>
    %41 = arith.cmpi slt, %6, %40 : vector<1x1x128xi32>
    %cst_15 = arith.constant 0.000000e+00 : f32
    %42 = vector.shape_cast %41 : vector<1x1x128xi1> to vector<1x1x128xi1>
    %43 = vector.broadcast %42 : vector<1x1x128xi1> to vector<1x16x128xi1>
    %44 = vector.broadcast %cst_15 : f32 to vector<1x16x128xf32>
    %45 = arith.select %43, %39, %44 : vector<1x16x128xi1>, vector<1x16x128xf32>
    %46 = vector.extract_strided_slice %1 {offsets = [3, 0, 0], sizes = [1, 1, 128], strides = [1, 1, 1]} : vector<5x1x128xf32> to vector<1x1x128xf32>
    %47 = vector.shape_cast %46 : vector<1x1x128xf32> to vector<1x128xf32>
    %48 = vector.shape_cast %47 : vector<1x128xf32> to vector<1x1x128xf32>
    %49 = vector.broadcast %48 : vector<1x1x128xf32> to vector<1x16x128xf32>
    %50 = arith.mulf %49, %45 : vector<1x16x128xf32>
    %51 = arith.addf %38, %50 : vector<1x16x128xf32>
    %c112_i32 = arith.constant 112 : i32
    %52 = tpu.dynamic_rotate %0 by %c112_i32 dim 2 : vector<1x16x128xf32>, i32 -> vector<1x16x128xf32>
    %c112_i32_16 = arith.constant 112 : i32
    %53 = vector.broadcast %c112_i32_16 : i32 to vector<1x1x128xi32>
    %54 = arith.cmpi slt, %6, %53 : vector<1x1x128xi32>
    %cst_17 = arith.constant 0.000000e+00 : f32
    %55 = vector.shape_cast %54 : vector<1x1x128xi1> to vector<1x1x128xi1>
    %56 = vector.broadcast %55 : vector<1x1x128xi1> to vector<1x16x128xi1>
    %57 = vector.broadcast %cst_17 : f32 to vector<1x16x128xf32>
    %58 = arith.select %56, %52, %57 : vector<1x16x128xi1>, vector<1x16x128xf32>
    %59 = vector.extract_strided_slice %1 {offsets = [4, 0, 0], sizes = [1, 1, 128], strides = [1, 1, 1]} : vector<5x1x128xf32> to vector<1x1x128xf32>
    %60 = vector.shape_cast %59 : vector<1x1x128xf32> to vector<1x128xf32>
    %61 = vector.shape_cast %60 : vector<1x128xf32> to vector<1x1x128xf32>
    %62 = vector.broadcast %61 : vector<1x1x128xf32> to vector<1x16x128xf32>
    %63 = arith.mulf %62, %58 : vector<1x16x128xf32>
    %64 = arith.addf %51, %63 : vector<1x16x128xf32>
    %cst_18 = arith.constant 0.000000e+00 : f32
    %65 = vector.broadcast %cst_18 : f32 to vector<1x2x128xf32>
    %66 = vector.extract_strided_slice %0 {offsets = [0, 0, 0], sizes = [1, 14, 128], strides = [1, 1, 1]} : vector<1x16x128xf32> to vector<1x14x128xf32>
    %67 = tpu.concatenate %65, %66 in 1 : vector<1x2x128xf32>, vector<1x14x128xf32> -> vector<1x16x128xf32>
    %68 = vector.extract_strided_slice %2 {offsets = [0, 0, 0], sizes = [1, 1, 128], strides = [1, 1, 1]} : vector<5x1x128xf32> to vector<1x1x128xf32>
    %69 = vector.shape_cast %68 : vector<1x1x128xf32> to vector<1x128xf32>
    %70 = vector.shape_cast %69 : vector<1x128xf32> to vector<1x1x128xf32>
    %71 = vector.broadcast %70 : vector<1x1x128xf32> to vector<1x16x128xf32>
    %72 = arith.mulf %71, %67 : vector<1x16x128xf32>
    %73 = arith.addf %64, %72 : vector<1x16x128xf32>
    %cst_19 = arith.constant 0.000000e+00 : f32
    %74 = vector.broadcast %cst_19 : f32 to vector<1x1x128xf32>
    %75 = vector.extract_strided_slice %0 {offsets = [0, 0, 0], sizes = [1, 15, 128], strides = [1, 1, 1]} : vector<1x16x128xf32> to vector<1x15x128xf32>
    %76 = tpu.concatenate %74, %75 in 1 : vector<1x1x128xf32>, vector<1x15x128xf32> -> vector<1x16x128xf32>
    %77 = vector.extract_strided_slice %2 {offsets = [1, 0, 0], sizes = [1, 1, 128], strides = [1, 1, 1]} : vector<5x1x128xf32> to vector<1x1x128xf32>
    %78 = vector.shape_cast %77 : vector<1x1x128xf32> to vector<1x128xf32>
    %79 = vector.shape_cast %78 : vector<1x128xf32> to vector<1x1x128xf32>
    %80 = vector.broadcast %79 : vector<1x1x128xf32> to vector<1x16x128xf32>
    %81 = arith.mulf %80, %76 : vector<1x16x128xf32>
    %82 = arith.addf %73, %81 : vector<1x16x128xf32>
    %83 = vector.extract_strided_slice %2 {offsets = [2, 0, 0], sizes = [1, 1, 128], strides = [1, 1, 1]} : vector<5x1x128xf32> to vector<1x1x128xf32>
    %84 = vector.shape_cast %83 : vector<1x1x128xf32> to vector<1x128xf32>
    %85 = vector.shape_cast %84 : vector<1x128xf32> to vector<1x1x128xf32>
    %86 = vector.broadcast %85 : vector<1x1x128xf32> to vector<1x16x128xf32>
    %87 = arith.mulf %86, %0 : vector<1x16x128xf32>
    %88 = arith.addf %82, %87 : vector<1x16x128xf32>
    %89 = vector.extract_strided_slice %0 {offsets = [0, 1, 0], sizes = [1, 15, 128], strides = [1, 1, 1]} : vector<1x16x128xf32> to vector<1x15x128xf32>
    %cst_20 = arith.constant 0.000000e+00 : f32
    %90 = vector.broadcast %cst_20 : f32 to vector<1x1x128xf32>
    %91 = tpu.concatenate %89, %90 in 1 : vector<1x15x128xf32>, vector<1x1x128xf32> -> vector<1x16x128xf32>
    %92 = vector.extract_strided_slice %2 {offsets = [3, 0, 0], sizes = [1, 1, 128], strides = [1, 1, 1]} : vector<5x1x128xf32> to vector<1x1x128xf32>
    %93 = vector.shape_cast %92 : vector<1x1x128xf32> to vector<1x128xf32>
    %94 = vector.shape_cast %93 : vector<1x128xf32> to vector<1x1x128xf32>
    %95 = vector.broadcast %94 : vector<1x1x128xf32> to vector<1x16x128xf32>
    %96 = arith.mulf %95, %91 : vector<1x16x128xf32>
    %97 = arith.addf %88, %96 : vector<1x16x128xf32>
    %98 = vector.extract_strided_slice %0 {offsets = [0, 2, 0], sizes = [1, 14, 128], strides = [1, 1, 1]} : vector<1x16x128xf32> to vector<1x14x128xf32>
    %cst_21 = arith.constant 0.000000e+00 : f32
    %99 = vector.broadcast %cst_21 : f32 to vector<1x2x128xf32>
    %100 = tpu.concatenate %98, %99 in 1 : vector<1x14x128xf32>, vector<1x2x128xf32> -> vector<1x16x128xf32>
    %101 = vector.extract_strided_slice %2 {offsets = [4, 0, 0], sizes = [1, 1, 128], strides = [1, 1, 1]} : vector<5x1x128xf32> to vector<1x1x128xf32>
    %102 = vector.shape_cast %101 : vector<1x1x128xf32> to vector<1x128xf32>
    %103 = vector.shape_cast %102 : vector<1x128xf32> to vector<1x1x128xf32>
    %104 = vector.broadcast %103 : vector<1x1x128xf32> to vector<1x16x128xf32>
    %105 = arith.mulf %104, %100 : vector<1x16x128xf32>
    %106 = arith.addf %97, %105 : vector<1x16x128xf32>
    %cst_22 = arith.constant 0.000000e+00 : f32
    %107 = vector.broadcast %cst_22 : f32 to vector<1x16x128xf32>
    %108 = arith.maximumf %106, %107 : vector<1x16x128xf32>
    %109 = vector.shape_cast %108 : vector<1x16x128xf32> to vector<16x128xf32>
    %c0_23 = arith.constant 0 : index
    %c0_24 = arith.constant 0 : index
    %110 = vector.load %arg5[%c0_23, %c0_24] : memref<128x512xf32, #tpu.memory_space<vmem>>, vector<128x512xf32>
    %cst_25 = arith.constant dense<0.000000e+00> : vector<16x512xf32>
    %111 = tpu.matmul %109, %110, %cst_25 {dimension_numbers = #tpu.dot_dimension_numbers<[1], [0], [0], [1], [0, 0, 1, 1], [], []>} : vector<16x128xf32>, vector<128x512xf32>, vector<16x512xf32> -> vector<16x512xf32>
    %c0_26 = arith.constant 0 : index
    %c0_27 = arith.constant 0 : index
    %112 = vector.load %arg6[%c0_26, %c0_27] : memref<1x512xf32, #tpu.memory_space<vmem>>, vector<1x512xf32>
    %113 = vector.broadcast %112 : vector<1x512xf32> to vector<16x512xf32>
    %114 = arith.addf %111, %113 : vector<16x512xf32>
    %115 = vector.shape_cast %114 : vector<16x512xf32> to vector<1x16x512xf32>
    %cst_28 = arith.constant dense<0.000000e+00> : vector<1x512xf32>
    %116 = vector.multi_reduction <add>, %115, %cst_28 [1] : vector<1x16x512xf32> to vector<1x512xf32>
    %117 = vector.shape_cast %116 : vector<1x512xf32> to vector<1x16x32xf32>
    %cst_29 = arith.constant dense<0.000000e+00> : vector<1x32xf32>
    %118 = vector.multi_reduction <add>, %117, %cst_29 [1] : vector<1x16x32xf32> to vector<1x32xf32>
    %cst_30 = arith.constant 3.906250e-03 : f32
    %119 = vector.broadcast %cst_30 : f32 to vector<1x32xf32>
    %120 = arith.mulf %118, %119 : vector<1x32xf32>
    %121 = vector.shape_cast %120 : vector<1x32xf32> to vector<1x32x1xf32>
    %c0_31 = arith.constant 0 : index
    %c0_32 = arith.constant 0 : index
    %122 = vector.load %arg7[%c0_31, %c0_32] : memref<32x2xf32, #tpu.memory_space<vmem>>, vector<32x2xf32>
    %123 = vector.shape_cast %122 : vector<32x2xf32> to vector<1x32x2xf32>
    %124 = vector.broadcast %121 : vector<1x32x1xf32> to vector<1x32x2xf32>
    %125 = arith.mulf %124, %123 : vector<1x32x2xf32>
    %cst_33 = arith.constant dense<0.000000e+00> : vector<1x2xf32>
    %126 = vector.multi_reduction <add>, %125, %cst_33 [1] : vector<1x32x2xf32> to vector<1x2xf32>
    %cst_34 = arith.constant 0.000000e+00 : f32
    %127 = vector.broadcast %cst_34 : f32 to vector<1x2xf32>
    %128 = arith.maximumf %126, %127 : vector<1x2xf32>
    %129 = vector.shape_cast %128 : vector<1x2xf32> to vector<1x2x1xf32>
    %c0_35 = arith.constant 0 : index
    %c0_36 = arith.constant 0 : index
    %130 = vector.load %arg8[%c0_35, %c0_36] : memref<2x32xf32, #tpu.memory_space<vmem>>, vector<2x32xf32>
    %131 = vector.shape_cast %130 : vector<2x32xf32> to vector<1x2x32xf32>
    %132 = vector.broadcast %129 : vector<1x2x1xf32> to vector<1x2x32xf32>
    %133 = arith.mulf %132, %131 : vector<1x2x32xf32>
    %cst_37 = arith.constant dense<0.000000e+00> : vector<1x32xf32>
    %134 = vector.multi_reduction <add>, %133, %cst_37 [1] : vector<1x2x32xf32> to vector<1x32xf32>
    %135 = arith.negf %134 : vector<1x32xf32>
    %136 = math.exp %135 : vector<1x32xf32>
    %cst_38 = arith.constant 1.000000e+00 : f32
    %137 = vector.broadcast %cst_38 : f32 to vector<1x32xf32>
    %138 = arith.addf %137, %136 : vector<1x32xf32>
    %139 = arith.divf %137, %138 : vector<1x32xf32>
    %140 = vector.shape_cast %139 : vector<1x32xf32> to vector<1x1x32xf32>
    %141 = vector.shape_cast %140 : vector<1x1x32xf32> to vector<1x1x32xf32>
    %142 = vector.broadcast %141 : vector<1x1x32xf32> to vector<1x16x32xf32>
    %143 = vector.shape_cast %142 : vector<1x16x32xf32> to vector<1x512xf32>
    %144 = vector.shape_cast %143 : vector<1x512xf32> to vector<1x1x512xf32>
    %145 = vector.broadcast %144 : vector<1x1x512xf32> to vector<1x16x512xf32>
    %146 = arith.mulf %115, %145 : vector<1x16x512xf32>
    %c0_39 = arith.constant 0 : index
    %c0_40 = arith.constant 0 : index
    %c0_41 = arith.constant 0 : index
    %147 = vector.load %arg11[%c0_39, %c0_40, %c0_41] : memref<1x16x512xf32, #tpu.memory_space<vmem>>, vector<1x16x512xf32>
    tpu.vector_store %arg11[%c0_39, %c0_40, %c0_41], %146 {strides = array<i32>} : memref<1x16x512xf32, #tpu.memory_space<vmem>>, vector<1x16x512xf32>,
    %148 = vector.shape_cast %146 : vector<1x16x512xf32> to vector<16x512xf32>
    %c0_42 = arith.constant 0 : index
    %c0_43 = arith.constant 0 : index
    %149 = vector.load %arg9[%c0_42, %c0_43] : memref<512x512xf32, #tpu.memory_space<vmem>>, vector<512x512xf32>
    %cst_44 = arith.constant dense<0.000000e+00> : vector<16x512xf32>
    %150 = tpu.matmul %148, %149, %cst_44 {dimension_numbers = #tpu.dot_dimension_numbers<[1], [0], [0], [1], [0, 0, 1, 1], [], []>} : vector<16x512xf32>, vector<512x512xf32>, vector<16x512xf32> -> vector<16x512xf32>
    %c0_45 = arith.constant 0 : index
    %c0_46 = arith.constant 0 : index
    %151 = vector.load %arg10[%c0_45, %c0_46] : memref<1x512xf32, #tpu.memory_space<vmem>>, vector<1x512xf32>
    %152 = vector.broadcast %151 : vector<1x512xf32> to vector<16x512xf32>
    %153 = arith.addf %150, %152 : vector<16x512xf32>
    %cst_47 = arith.constant 0.000000e+00 : f32
    %154 = vector.broadcast %cst_47 : f32 to vector<16x512xf32>
    %155 = arith.maximumf %153, %154 : vector<16x512xf32>
    %156 = vector.shape_cast %155 : vector<16x512xf32> to vector<1x16x512xf32>
    %157 = vector.shape_cast %156 : vector<1x16x512xf32> to vector<1x8x2x512xf32>
    %158 = vector.extract_strided_slice %157 {offsets = [0, 0, 0, 0], sizes = [1, 8, 1, 512], strides = [1, 1, 1, 1]} : vector<1x8x2x512xf32> to vector<1x8x1x512xf32>
    %159 = vector.shape_cast %158 : vector<1x8x1x512xf32> to vector<1x8x512xf32>
    %160 = vector.extract_strided_slice %157 {offsets = [0, 0, 1, 0], sizes = [1, 8, 1, 512], strides = [1, 1, 1, 1]} : vector<1x8x2x512xf32> to vector<1x8x1x512xf32>
    %161 = vector.shape_cast %160 : vector<1x8x1x512xf32> to vector<1x8x512xf32>
    %162 = arith.maximumf %159, %161 : vector<1x8x512xf32>
    %163 = vector.shape_cast %162 : vector<1x8x512xf32> to vector<1x8x8x64xf32>
    %164 = vector.extract_strided_slice %163 {offsets = [0, 0, 0, 0], sizes = [1, 8, 8, 32], strides = [1, 1, 1, 1]} : vector<1x8x8x64xf32> to vector<1x8x8x32xf32>
    %165 = vector.extract_strided_slice %163 {offsets = [0, 0, 0, 32], sizes = [1, 8, 8, 32], strides = [1, 1, 1, 1]} : vector<1x8x8x64xf32> to vector<1x8x8x32xf32>
    %166 = arith.maximumf %164, %165 : vector<1x8x8x32xf32>
    %167 = vector.shape_cast %166 : vector<1x8x8x32xf32> to vector<1x8x256xf32>
    %c0_48 = arith.constant 0 : index
    %c0_49 = arith.constant 0 : index
    %c0_50 = arith.constant 0 : index
    %168 = vector.load %arg12[%c0_48, %c0_49, %c0_50] : memref<1x8x256xf32, #tpu.memory_space<vmem>>, vector<1x8x256xf32>
    tpu.vector_store %arg12[%c0_48, %c0_49, %c0_50], %167 {strides = array<i32>} : memref<1x8x256xf32, #tpu.memory_space<vmem>>, vector<1x8x256xf32>,
    return
  }
  func.func @transform_0(%arg0: i32) -> (i32, i32, i32) {
    %c0_i32 = arith.constant 0 : i32
    %c0_i32_0 = arith.constant 0 : i32
    %c0_i32_1 = arith.constant 0 : i32
    return %arg0, %c0_i32, %c0_i32_0 : i32, i32, i32
  }
  func.func @transform_1(%arg0: i32) -> (i32, i32, i32) {
    %c0_i32 = arith.constant 0 : i32
    %c0_i32_0 = arith.constant 0 : i32
    %c0_i32_1 = arith.constant 0 : i32
    %c0_i32_2 = arith.constant 0 : i32
    return %c0_i32, %c0_i32_0, %c0_i32_1 : i32, i32, i32
  }
  func.func @transform_2(%arg0: i32) -> (i32, i32, i32) {
    %c0_i32 = arith.constant 0 : i32
    %c0_i32_0 = arith.constant 0 : i32
    %c0_i32_1 = arith.constant 0 : i32
    %c0_i32_2 = arith.constant 0 : i32
    return %c0_i32, %c0_i32_0, %c0_i32_1 : i32, i32, i32
  }
  func.func @transform_3(%arg0: i32) -> (i32, i32, i32) {
    %c0_i32 = arith.constant 0 : i32
    %c0_i32_0 = arith.constant 0 : i32
    %c0_i32_1 = arith.constant 0 : i32
    %c0_i32_2 = arith.constant 0 : i32
    return %c0_i32, %c0_i32_0, %c0_i32_1 : i32, i32, i32
  }
  func.func @transform_4(%arg0: i32) -> (i32, i32) {
    %c0_i32 = arith.constant 0 : i32
    %c0_i32_0 = arith.constant 0 : i32
    %c0_i32_1 = arith.constant 0 : i32
    return %c0_i32, %c0_i32_0 : i32, i32
  }
  func.func @transform_5(%arg0: i32) -> (i32, i32) {
    %c0_i32 = arith.constant 0 : i32
    %c0_i32_0 = arith.constant 0 : i32
    %c0_i32_1 = arith.constant 0 : i32
    return %c0_i32, %c0_i32_0 : i32, i32
  }
  func.func @transform_6(%arg0: i32) -> (i32, i32) {
    %c0_i32 = arith.constant 0 : i32
    %c0_i32_0 = arith.constant 0 : i32
    %c0_i32_1 = arith.constant 0 : i32
    return %c0_i32, %c0_i32_0 : i32, i32
  }
  func.func @transform_7(%arg0: i32) -> (i32, i32) {
    %c0_i32 = arith.constant 0 : i32
    %c0_i32_0 = arith.constant 0 : i32
    %c0_i32_1 = arith.constant 0 : i32
    return %c0_i32, %c0_i32_0 : i32, i32
  }
  func.func @transform_8(%arg0: i32) -> (i32, i32) {
    %c0_i32 = arith.constant 0 : i32
    %c0_i32_0 = arith.constant 0 : i32
    %c0_i32_1 = arith.constant 0 : i32
    return %c0_i32, %c0_i32_0 : i32, i32
  }
  func.func @transform_9(%arg0: i32) -> (i32, i32) {
    %c0_i32 = arith.constant 0 : i32
    %c0_i32_0 = arith.constant 0 : i32
    %c0_i32_1 = arith.constant 0 : i32
    return %c0_i32, %c0_i32_0 : i32, i32
  }
  func.func @transform_10(%arg0: i32) -> (i32, i32, i32) {
    %c0_i32 = arith.constant 0 : i32
    %c0_i32_0 = arith.constant 0 : i32
    %c0_i32_1 = arith.constant 0 : i32
    return %arg0, %c0_i32, %c0_i32_0 : i32, i32, i32
  }
  func.func @transform_11(%arg0: i32) -> (i32, i32, i32) {
    %c0_i32 = arith.constant 0 : i32
    %c0_i32_0 = arith.constant 0 : i32
    %c0_i32_1 = arith.constant 0 : i32
    return %arg0, %c0_i32, %c0_i32_0 : i32, i32, i32
  }
}

</mosaic_0001>

<bundles_post_ra>
// kernel: tpu_custom_call.1
= control target key start
LH: loop header
LB: loop body
LE: loop exit
PB: predicated region body
PF: predicated region fallthrough
CT: control target
= control target key end

     0   :  { %s4522_s0 = inlined_call_operand.vmem [shape: f32[2,16,128], index: 0, kind: input, shape index: {}]   ;;  %s4523_s1 = inlined_call_operand.hbm [shape: f32[5,1,128], index: 1, kind: input, shape index: {}]   ;;  %s4524_s2 = inlined_call_operand.hbm [shape: f32[5,1,128], index: 2, kind: input, shape index: {}]   ;;  %s4525_s3 = inlined_call_operand.hbm [shape: f32[1,1,128], index: 3, kind: input, shape index: {}]   ;;  %s4526_s4 = inlined_call_operand.hbm [shape: f32[128,512], index: 4, kind: input, shape index: {}]   ;;  %s4527_s5 = inlined_call_operand.vmem [shape: f32[1,512], index: 5, kind: input, shape index: {}]   ;;  %s4528_s6 = inlined_call_operand.vmem [shape: f32[32,2], index: 6, kind: input, shape index: {}]   ;;  %s4529_s7 = inlined_call_operand.hbm [shape: f32[2,32], index: 7, kind: input, shape index: {}]   ;;  %s4530_s8 = inlined_call_operand.hbm [shape: f32[512,512], index: 8, kind: input, shape index: {}]   ;;  %s4531_s9 = inlined_call_operand.vmem [shape: f32[1,512], index: 9, kind: input, shape index: {}]   ;;  %s4532_s10 = inlined_call_operand.hbm [shape: f32[2,16,512], index: 10, kind: output, shape index: {0}]   ;;  %s4533_s11 = inlined_call_operand.hbm [shape: f32[2,8,256], index: 11, kind: output, shape index: {1}]  }
   0x1   :  { %4540 = sst [smem:[#allocation28_spill]] %s4523_s1 }
   0x2   :  { %4541 = sst [smem:[#allocation29_spill]] %s4524_s2 }
   0x3   :  { %4542 = sst [smem:[#allocation30_spill]] %s4526_s4 }
   0x4   :  { %17 = vsyncpa [#allocation3], 0 }
   0x5   :  { %18 = vsyncpa [#allocation6], 0 }
   0x6   :  { %19 = vsyncpa [#allocation9], 0 }
   0x7   :  { %20 = vsyncpa [#allocation12], 0 }
   0x8   :  { %21 = vsyncpa [#allocation4], 0 }
   0x9   :  { %23 = vsyncpa [#allocation4 + $0x1], 0 }
   0xa   :  { %24 = vsyncpa [#allocation15], 0 }
   0xb   :  { %26 = vsyncpa [#allocation15 + $0x1], 0  ;;  %s3489_s17 = smov 0   ;;  %s3491_s18 = smov 0  }
   0xc   :  { %s3493_s19 = smov 0   ;;  %s3495_s20 = smov 0  }
   0xd LB: > { %4543 = sst [smem:[#allocation22_spill]] %s3395_s17  ;;  %s3510_s21 = sadd.s32 4294967295, %s3407_s20   ;;  %s3407_s20 = sphi %s3495_s20, %s4559_s20   ;;  %s3403_s19 = sphi %s3493_s19, %s4561_s19   ;;  %s3399_s18 = sphi %s3491_s18, %s4563_s18   ;;  %s3395_s17 = sphi %s3489_s17, %s4562_s17  }
   0xe   : > { %4544 = sst [smem:[#allocation23_spill]] %s3403_s19  ;;  %s2937_s22 = sadd.s32 4294967294, %s3407_s20  }
   0xf   : > { %4545 = sst [smem:[#allocation24_spill]] %s3407_s20  ;;  %s3514_s23 = sadd.s32 1, %s3407_s20  }
  0x10   : > { %4546 = sst [smem:[#allocation25_spill]] %s3514_s23  ;;  %s254_s24 = sadd.s32 1, %s3403_s19 }
  0x11   : > { %s251_s25 = ssub.s32 %s3407_s20, %s3514_s23  ;;  %p264_p0 = scmp.ne.s32.totalorder %s3403_s19, %s3399_s18 }
  0x12   : > { %p252_p1 = scmp.eq.s32.totalorder %s251_s25, 0  ;;  %p265_p2 = scmp.eq.s32.totalorder %s3510_s21, 1 }
  0x13   : > { %p270_p3 = scmp.ne.s32.totalorder %s3399_s18, %s3395_s17  ;;  %p271_p4 = scmp.eq.s32.totalorder %s2937_s22, 1 }
  0x14   : > { %s3525_s26 = scalar_select %p252_p1, %s3403_s19, %s254_s24  }
  0x15   : > { %p3527_p5 = por %p265_p2, %p264_p0  ;;  %p3531_p6 = por %p271_p4, %p270_p3 }
  0x16   : > { %4547 = sst [smem:[#allocation26_spill]] %s3525_s26  ;;  %p2938_p7 = scmp.ge.s32.totalorder %s3407_s20, 1 }
  0x17   : > { %s4549_s28 = scalar_select %p3531_p6, 1, 0 }
  0x18   : > { %p304_p8 = scmp.lt.s32.totalorder %s3407_s20, 3  ;;  %p3031_p9 = scmp.eq.s32.totalorder %s3510_s21, 0 }
  0x19   : > { %4550 = sst [smem:[#allocation27_spill]] %s4549_s28  ;;  %s3409_s24 = smov [#allocation5]  }
  0x1a   : > { %p3538_p10 = pnand %p2938_p7, %p304_p8  ;;  %s4552_s2 = sld [smem:[#allocation29_spill]] }
  0x1b   : > { %s4553_s4 = sld [smem:[#allocation30_spill]]  ;;  %s331_s25 = sshll.u32 %s3409_s24, 4  ;;  %s332_s25 = int_to_ptr.vmem [resolvable:$true] %s331_s25 }
  0x1c   : > { %p3005_p11 = pneg %p3538_p10  ;;  %s3410_s30 = smov 16  }
  0x1d   : > { %s3411_s12 = smov 1   ;;  %s3413_s14 = smov 512  }
  0x1e   : > { %p3552_p12 = pnand %p3031_p9, %p3005_p11  ;;  %s3414_s15 = smov 32  }
  0x1f   : > { %s4555_s1 = sld [smem:[#allocation28_spill]]  ;;  %s3415_s24 = smov [#allocation2]  }
  0x20   : > { %s329_s13 = sshll.u32 %s4552_s2, 4  ;;  %s3412_s2 = smov [#allocation8]   ;;  %s330_s13 = int_to_ptr.hbm [resolvable:$true] %s329_s13 }
  0x21   : > { %s355_s16 = sshll.u32 %s4553_s4, 4  ;;  %s357_s26 = sshll.u32 %s3412_s2, 4  ;;  %s356_s16 = int_to_ptr.hbm [resolvable:$true] %s355_s16  ;;  %s358_s26 = int_to_ptr.vmem [resolvable:$true] %s357_s26 }
  0x22   : > { %3011 = dma.hbm_to_vmem [thread:$0]  (!%p3552_p12), %s330_s13, 80, %s332_s25, [#allocation6], %s3410_s30, %s3410_s30, %s3411_s12  }
  0x23   : > { %3017 = dma.hbm_to_vmem [thread:$0]  (!%p3552_p12), %s356_s16, 8192, %s358_s26, [#allocation9], %s3413_s14, %s3413_s14, %s3414_s15  }
  0x24   : > { %s317_s28 = sshll.u32 %s3415_s24, 4  ;;  %s344_s13 = sshll.u32 %s4525_s3, 4  ;;  %s318_s28 = int_to_ptr.vmem [resolvable:$true] %s317_s28  ;;  %s345_s13 = int_to_ptr.hbm [resolvable:$true] %s344_s13 }
  0x25   : > { %s315_s23 = sshll.u32 %s4555_s1, 4  ;;  %s3416_s2 = smov [#allocation7]   ;;  %s316_s23 = int_to_ptr.hbm [resolvable:$true] %s315_s23 }
  0x26   : > { %3008 = dma.hbm_to_vmem [thread:$0]  (!%p3552_p12), %s316_s23, 80, %s318_s28, [#allocation3], %s3410_s30, %s3410_s30, %s3411_s12  }
  0x27   : > { %s346_s25 = sshll.u32 %s3416_s2, 4  ;;  %s376_s4 = sshll.u32 %s4529_s7, 4  ;;  %s347_s25 = int_to_ptr.vmem [resolvable:$true] %s346_s25  ;;  %s377_s4 = int_to_ptr.hbm [resolvable:$true] %s376_s4 }
  0x28   : > { %3014 = dma.hbm_to_vmem [thread:$0]  (!%p3552_p12), %s345_s13, 16, %s347_s25, [#allocation6]  }
  0x29   : > { %s387_s1 = sshll.u32 %s4530_s8, 4  ;;  %s3417_s17 = smov [#allocation10]   ;;  %s388_s1 = int_to_ptr.hbm [resolvable:$true] %s387_s1 }
  0x2a   : > { %s378_s20 = sshll.u32 %s3417_s17, 4  ;;  %s3418_s23 = smov [#allocation11]   ;;  %s379_s20 = int_to_ptr.vmem [resolvable:$true] %s378_s20 }
  0x2b   : > { %3020 = dma.hbm_to_vmem [thread:$0]  (!%p3552_p12), %s377_s4, 32, %s379_s20, [#allocation9]  }
  0x2c   : > { %s389_s28 = sshll.u32 %s3418_s23, 4  ;;  %416 = sbr.rel (%p3538_p10) target bundleno = 1659 (0x67b), region = 60  ;;  %s390_s28 = int_to_ptr.vmem [resolvable:$true] %s389_s28 }
  0x2d   : > { %3023 = dma.hbm_to_vmem [thread:$0]  (!%p3552_p12), %s388_s1, 32768, %s390_s28, [#allocation12], %s3413_s14, %s3413_s14, %s3414_s15  }
  0x31   : > { %3370 = dma.done.wait (%p3031_p9), [#allocation3], 80  }
  0x32   : > { %3372 = vsyncadd (%p3031_p9), [#allocation3], 4294967216 }
  0x33   : > { %3374 = dma.done.wait (%p3031_p9), [#allocation6], 96  }
  0x34   : > { %3376 = vsyncadd (%p3031_p9), [#allocation6], 4294967200 }
  0x35   : > { %3378 = dma.done.wait (%p3031_p9), [#allocation9], 8224  }
  0x36   : > { %3380 = vsyncadd (%p3031_p9), [#allocation9], 4294959072 }
  0x37   : > { %3382 = dma.done.wait (%p3031_p9), [#allocation12], 32768  }
  0x38   : > { %3384 = vsyncadd (%p3031_p9), [#allocation12], 4294934528  ;;  %p487_p13 = scmp.lt.s32.totalorder %s3510_s21, 1  ;;  %v510_v0 = vlaneseq  ;;  %s3419_s14 = smov 16   ;;  %v710_v4 = vld [vmem:[#allocation8 + $0x1e0] sm:$0xff]  ;;  %v711_v5 = vld [vmem:[#allocation8 + $0x1e8] sm:$0xff] }
  0x39   : > { %s3420_s15 = smov 120   ;;  %s3421_s13 = smov 112   ;;  %v712_v6 = vld [vmem:[#allocation8 + $0x1f0] sm:$0xff]  ;;  %724 = vmatpush.msra.mxu0 %v710_v4  ;;  %747 = vmatpush.msra.mxu1 %v711_v5  ;;  %v713_v7 = vld [vmem:[#allocation8 + $0x1f8] sm:$0xff]  ;;  %v706_v8 = vld [vmem:[#allocation8 + $0x1c0] sm:$0xff]  ;;  %vm585_vm4 = vcmask 1041408  }
  0x3a   : > { %s488_s1 = scalar_select %p487_p13, %s3510_s21, 1  ;;  %v3601_v1 = vshrl.u32 %v510_v0, 7  ;;  %770 = vmatpush.msra.mxu2 %v712_v6  ;;  %793 = vmatpush.msra.mxu3 %v713_v7  ;;  %v707_v9 = vld [vmem:[#allocation8 + $0x1c8] sm:$0xff]  ;;  %v708_v10 = vld [vmem:[#allocation8 + $0x1d0] sm:$0xff]  ;;  %v709_v11 = vld [vmem:[#allocation8 + $0x1d8] sm:$0xff]  ;;  %v3620_v61 = vand.u32 127, %v510_v0 }
  0x3b   : > { %s3422_s2 = smov 8   ;;  %725 = vmatpush.msra.mxu0 %v706_v8  ;;  %748 = vmatpush.msra.mxu1 %v707_v9  ;;  %v702_v12 = vld [vmem:[#allocation8 + $0x1a0] sm:$0xff]  ;;  %v703_v13 = vld [vmem:[#allocation8 + $0x1a8] sm:$0xff]  ;;  %v704_v14 = vld [vmem:[#allocation8 + $0x1b0] sm:$0xff]  ;;  %vm599_vm5 = vcmask 1040384   ;;  %vm620_vm6 = vcmask 1046528  }
  0x3c   : > { %s2974_s29 = sshll.u32 %s488_s1, 4  ;;  %3096 = vset.pattern.permute.xlu2 %v3601_v1  ;;  %771 = vmatpush.msra.mxu2 %v708_v10  ;;  %v705_v15 = vld [vmem:[#allocation8 + $0x1b8] sm:$0xff]  ;;  %v698_v16 = vld [vmem:[#allocation8 + $0x180] sm:$0xff]  ;;  %v699_v17 = vld [vmem:[#allocation8 + $0x188] sm:$0xff]  ;;  %vm516_vm0 = vcmp.ge.s32.totalorder %v3620_v61, 16  ;;  %vm571_vm1 = vcmp.lt.s32.totalorder %v3620_v61, 112 }
  0x3d   : > { %s491_s12 = scalar_lea.vmem %s4522_s0, %s2974_s29  ;;  %794 = vmatpush.msra.mxu3 %v709_v11  ;;  %726 = vmatpush.msra.mxu0 %v702_v12  ;;  %v700_v18 = vld [vmem:[#allocation8 + $0x190] sm:$0xff]  ;;  %v701_v19 = vld [vmem:[#allocation8 + $0x198] sm:$0xff]  ;;  %v694_v20 = vld [vmem:[#allocation8 + $0x160] sm:$0xff]  ;;  %vm532_vm2 = vcmp.ge.s32.totalorder %v3620_v61, 8  ;;  %vm555_vm3 = vcmp.lt.s32.totalorder %v3620_v61, 120  ;;  %vm634_vm7 = vcmask 1045504  }
  0x3e   : > { %v3607_v2 = vld [vmem:[%s491_s12] sm:$0xff]  ;;  %v3612_v3 = vld [vmem:[%s491_s12 + $0x8] sm:$0xff]  ;;  %749 = vmatpush.msra.mxu1 %v703_v13  ;;  %772 = vmatpush.msra.mxu2 %v704_v14  ;;  %v690_v24 = vld [vmem:[#allocation8 + $0x140] sm:$0xff]  ;;  %s3423_s16 = smov 64   ;;  %s3424_s4 = smov 32   ;;  %vm885_vm8 = vcmask 1047556  }
  0x3f   : > { %512 = vrot.lane.b32.xlu0 %v3607_v2, %s3419_s14  ;;  %551 = vrot.lane.b32.xlu1 %v3607_v2, %s3420_s15  ;;  %v695_v21 = vld [vmem:[#allocation8 + $0x168] sm:$0xff]  ;;  %v696_v22 = vld [vmem:[#allocation8 + $0x170] sm:$0xff]  ;;  %v697_v23 = vld [vmem:[#allocation8 + $0x178] sm:$0xff]  ;;  %s3425_s19 = smov 96   ;;  %vm961_vm9 = vcmask 261120   ;;  %vm1004_vm10 = vcmask 15360  }
  0x40   : > { %567 = vrot.lane.b32.xlu2 %v3607_v2, %s3421_s13  ;;  %795 = vmatpush.msra.mxu3 %v705_v15  ;;  %v691_v25 = vld [vmem:[#allocation8 + $0x148] sm:$0xff]  ;;  %v692_v26 = vld [vmem:[#allocation8 + $0x150] sm:$0xff]  ;;  %v693_v27 = vld [vmem:[#allocation8 + $0x158] sm:$0xff]  ;;  %vm1027_vm11 = vcmask 254976   ;;  %s3781_s30 = sand.u32 1, %s3399_s18   ;;  %s2975_s25 = sshll.u32 %s3510_s21, 6 }
  0x41   : > { %727 = vmatpush.msra.mxu0 %v698_v16  ;;  %750 = vmatpush.msra.mxu1 %v699_v17  ;;  %v686_v28 = vld [vmem:[#allocation8 + $0x120] sm:$0xff]  ;;  %v687_v29 = vld [vmem:[#allocation8 + $0x128] sm:$0xff]  ;;  %v688_v30 = vld [vmem:[#allocation8 + $0x130] sm:$0xff]  ;;  %s2953_s12 = sshll.u32 %s3781_s30, 6  ;;  %s2763_s17 = scalar_lea.hbm %s4532_s10, %s2975_s25 }
  0x42   : > { %773 = vmatpush.msra.mxu2 %v700_v18  ;;  %796 = vmatpush.msra.mxu3 %v701_v19  ;;  %v689_v31 = vld [vmem:[#allocation8 + $0x138] sm:$0xff]  ;;  %v682_v32 = vld [vmem:[#allocation8 + $0x100] sm:$0xff]  ;;  %v683_v33 = vld [vmem:[#allocation8 + $0x108] sm:$0xff]  ;;  %s2766_s20 = sshll.u32 %s2763_s17, 4  ;;  %s2747_s23 = scalar_lea.sflag [#allocation4], %s3781_s30  ;;  %s2767_s20 = int_to_ptr.hbm [resolvable:$true] %s2766_s20 }
  0x43   : > { %728 = vmatpush.msra.mxu0 %v694_v20  ;;  %751 = vmatpush.msra.mxu1 %v695_v21  ;;  %v684_v34 = vld [vmem:[#allocation8 + $0x110] sm:$0xff]  ;;  %v685_v35 = vld [vmem:[#allocation8 + $0x118] sm:$0xff]  ;;  %v678_v36 = vld [vmem:[#allocation8 + $0xe0] sm:$0xff]  ;;  %v586_v20 = vrot.slane %v3607_v2, 6  ;;  %s3311_s28 = sshra.s32 %s2767_s20, 4  ;;  %s3312_s28 = int_to_ptr.hbm [resolvable:$true] %s3311_s28 }
  0x44   : > { %774 = vmatpush.msra.mxu2 %v696_v22  ;;  %797 = vmatpush.msra.mxu3 %v697_v23  ;;  %v679_v37 = vld [vmem:[#allocation8 + $0xe8] sm:$0xff]  ;;  %v680_v38 = vld [vmem:[#allocation8 + $0xf0] sm:$0xff]  ;;  %v681_v39 = vld [vmem:[#allocation8 + $0xf8] sm:$0xff]  ;;  %s3313_s1 = scalar_lea.hbm %s3312_s28, 64  ;;  %p3318_p3 = scmp.lt.s32.totalorder %s3312_s28, %s4532_s10 }
  0x45   : > { %729 = vmatpush.msra.mxu0 %v690_v24  ;;  %752 = vmatpush.msra.mxu1 %v691_v25  ;;  %v674_v40 = vld [vmem:[#allocation8 + $0xc0] sm:$0xff]  ;;  %v675_v41 = vld [vmem:[#allocation8 + $0xc8] sm:$0xff]  ;;  %v676_v42 = vld [vmem:[#allocation8 + $0xd0] sm:$0xff]  ;;  %v600_v25 = vrot.slane %v3607_v2, 7  ;;  %p3314_p0 = scmp.ne.s32.totalorder %s3312_s28, %s3313_s1 }
  0x46   : > { %775 = vmatpush.msra.mxu2 %v692_v26  ;;  %798 = vmatpush.msra.mxu3 %v693_v27  ;;  %v677_v43 = vld [vmem:[#allocation8 + $0xd8] sm:$0xff]  ;;  %v670_v44 = vld [vmem:[#allocation8 + $0xa0] sm:$0xff]  ;;  %v671_v45 = vld [vmem:[#allocation8 + $0xa8] sm:$0xff] }
  0x47   : > { %528 = vrot.lane.b32.xlu0 %v3607_v2, %s3422_s2  ;;  %514 = vrot.lane.b32.xlu1 %v3612_v3, %s3419_s14  ;;  %v672_v46 = vld [vmem:[#allocation8 + $0xb0] sm:$0xff]  ;;  %v673_v47 = vld [vmem:[#allocation8 + $0xb8] sm:$0xff]  ;;  %v666_v48 = vld [vmem:[#allocation8 + $0x80] sm:$0xff]  ;;  %s3802_s14 = scalar_lea.vmem [#allocation13], %s2953_s12  ;;  %p3315_p1 = pnand %p3314_p0, %p3527_p5 }
  0x48   : > { %530 = vrot.lane.b32.xlu2 %v3612_v3, %s3422_s2  ;;  %730 = vmatpush.msra.mxu0 %v686_v28  ;;  %v667_v49 = vld [vmem:[#allocation8 + $0x88] sm:$0xff]  ;;  %v668_v50 = vld [vmem:[#allocation8 + $0x90] sm:$0xff]  ;;  %v669_v51 = vld [vmem:[#allocation8 + $0x98] sm:$0xff]  ;;  %s2764_s2 = sshll.u32 %s3802_s14, 4  ;;  %s3317_s12 = scalar_lea.hbm %s4532_s10, 128  ;;  %s2765_s2 = int_to_ptr.vmem [resolvable:$true] %s2764_s2 }
  0x49   : > { %753 = vmatpush.msra.mxu1 %v687_v29  ;;  %776 = vmatpush.msra.mxu2 %v688_v30  ;;  %v662_v52 = vld [vmem:[#allocation8 + $0x60] sm:$0xff]  ;;  %v663_v53 = vld [vmem:[#allocation8 + $0x68] sm:$0xff]  ;;  %v664_v54 = vld [vmem:[#allocation8 + $0x70] sm:$0xff]  ;;  %p3316_p2 = pneg %p3315_p1  ;;  %p3319_p4 = scmp.lt.s32.totalorder %s3317_s12, %s3313_s1 }
  0x4a   : > { %799 = vmatpush.msra.mxu3 %v689_v31  ;;  %731 = vmatpush.msra.mxu0 %v682_v32  ;;  %v665_v55 = vld [vmem:[#allocation8 + $0x78] sm:$0xff]  ;;  %v658_v57 = vld [vmem:[#allocation8 + $0x40] sm:$0xff]  ;;  %v659_v58 = vld [vmem:[#allocation8 + $0x48] sm:$0xff] }
  0x4b   : > { %754 = vmatpush.msra.mxu1 %v683_v33  ;;  %777 = vmatpush.msra.mxu2 %v684_v34  ;;  %v660_v59 = vld [vmem:[#allocation8 + $0x50] sm:$0xff]  ;;  %v661_v60 = vld [vmem:[#allocation8 + $0x58] sm:$0xff]  ;;  %v654_v62 = vld [vmem:[#allocation8 + $0x20] sm:$0xff]  ;;  %p3320_p7 = por %p3319_p4, %p3318_p3 }
  0x4c   : > { %800 = vmatpush.msra.mxu3 %v685_v35  ;;  %732 = vmatpush.msra.mxu0 %v678_v36  ;;  %v655_v63 = vld [vmem:[#allocation8 + $0x28] sm:$0xff]  ;;  %v656_v4 = vld [vmem:[#allocation8 + $0x30] sm:$0xff]  ;;  %v657_v5 = vld [vmem:[#allocation8 + $0x38] sm:$0xff] }
  0x4d   : > { %755 = vmatpush.msra.mxu1 %v679_v37  ;;  %778 = vmatpush.msra.mxu2 %v680_v38  ;;  %v650_v6 = vld [vmem:[#allocation8] sm:$0xff]  ;;  %v651_v7 = vld [vmem:[#allocation8 + $0x8] sm:$0xff]  ;;  %v652_v8 = vld [vmem:[#allocation8 + $0x10] sm:$0xff]  ;;  %p3321_p8 = pnand %p3320_p7, %p3316_p2 }
  0x4e   : > { %801 = vmatpush.msra.mxu3 %v681_v39  ;;  %733 = vmatpush.msra.mxu0 %v674_v40  ;;  %v653_v9 = vld [vmem:[#allocation8 + $0x18] sm:$0xff]  ;;  %v3103_v12 = vld [vmem:[#allocation2] ss:$0 sm:$0xff]  ;;  %v3107_v15 = vld [vmem:[#allocation2 + $0x2] ss:$0 sm:$0xff]  ;;  %v591_v39 = vsel %vm585_vm4, 0.0, %v586_v20 }
  0x4f   : > { %553 = vrot.lane.b32.xlu0 %v3612_v3, %s3420_s15  ;;  %569 = vrot.lane.b32.xlu1 %v3612_v3, %s3421_s13  ;;  %v3102_v11 = vld [vmem:[#allocation7] ss:$0 sm:$0xff]  ;;  %v3106_v18 = vld [vmem:[#allocation2 + $0x1] ss:$0 sm:$0xff]  ;;  %v3105_v26 = vld [vmem:[#allocation2 + $0x4] ss:$0 sm:$0xff]  ;;  %v547_v28 = vmul.f32 %v3107_v15, %v3607_v2  ;;  %v548_v37 = vmul.f32 %v3107_v15, %v3612_v3 }
  0x50   : > { %756 = vmatpush.msra.mxu1 %v675_v41  ;;  %779 = vmatpush.msra.mxu2 %v676_v42  ;;  %v508_v16 = vadd.f32 %v3102_v11, %v3607_v2  ;;  %v509_v23 = vadd.f32 %v3102_v11, %v3612_v3  ;;  %v3104_v31 = vld [vmem:[#allocation2 + $0x3] ss:$0 sm:$0xff]  ;;  %v3108_v35 = vld [vmem:[#allocation5] ss:$0 sm:$0xff]  ;;  %v3109_v38 = vld [vmem:[#allocation5 + $0x1] ss:$0 sm:$0xff] }
  0x51   : > { %802 = vmatpush.msra.mxu3 %v677_v43  ;;  %734 = vmatpush.msra.mxu0 %v670_v44  ;;  %v587_v42 = vrot.slane %v3612_v3, 6  ;;  %v605_v43 = vsel %vm599_vm5, 0.0, %v600_v25  ;;  %v3112_v61 = vld [vmem:[#allocation5 + $0x4] ss:$0 sm:$0xff] }
  0x52   : > { %757 = vmatpush.msra.mxu1 %v671_v45  ;;  %780 = vmatpush.msra.mxu2 %v672_v46 }
  0x53   : > { %803 = vmatpush.msra.mxu3 %v673_v47  ;;  %735 = vmatpush.msra.mxu0 %v666_v48  ;;  %v595_v48 = vmul.f32 %v3108_v35, %v591_v39 }
  0x54   : > { %758 = vmatpush.msra.mxu1 %v667_v49  ;;  %781 = vmatpush.msra.mxu2 %v668_v50  ;;  %v601_v49 = vrot.slane %v3612_v3, 7  ;;  %v609_v50 = vmul.f32 %v3109_v38, %v605_v43 }
  0x55   : > { %804 = vmatpush.msra.mxu3 %v669_v51  ;;  %736 = vmatpush.msra.mxu0 %v662_v52  ;;  %v621_v51 = vrot.slane %v3607_v2, 1  ;;  %v622_v52 = vrot.slane %v3612_v3, 1 }
  0x56   : > { %759 = vmatpush.msra.mxu1 %v663_v53  ;;  %782 = vmatpush.msra.mxu2 %v664_v54 }
  0x57   : > { %805 = vmatpush.msra.mxu3 %v665_v55  ;;  %737 = vmatpush.msra.mxu0 %v658_v57 }
  0x58   : > { %760 = vmatpush.msra.mxu1 %v659_v58  ;;  %783 = vmatpush.msra.mxu2 %v660_v59  ;;  %v588_v58 = vsel %vm585_vm4, %v586_v20, %v587_v42 }
  0x59   : > { %806 = vmatpush.msra.mxu3 %v661_v60  ;;  %738 = vmatpush.msra.mxu0 %v654_v62  ;;  %v635_v62 = vrot.slane %v3607_v2, 2 }
  0x5a   : > { %761 = vmatpush.msra.mxu1 %v655_v63  ;;  %784 = vmatpush.msra.mxu2 %v656_v4  ;;  %v636_v63 = vrot.slane %v3612_v3, 2 }
  0x5b   : > { %807 = vmatpush.msra.mxu3 %v657_v5  ;;  %739 = vmatpush.msra.mxu0 %v650_v6 }
  0x5c   : > { %762 = vmatpush.msra.mxu1 %v651_v7  ;;  %785 = vmatpush.msra.mxu2 %v652_v8  ;;  %v3111_v7 = vld [vmem:[#allocation5 + $0x3] ss:$0 sm:$0xff]  ;;  %v602_v8 = vsel %vm599_vm5, %v600_v25, %v601_v49  ;;  %vm1801_vm5 = vcmask 1043456  }
  0x5d   : > { %808 = vmatpush.msra.mxu3 %v653_v9  ;;  %v623_v9 = vsel %vm620_vm6, %v621_v51, %v622_v52  ;;  %v610_v15 = vmul.f32 %v3109_v38, %v602_v8 }
  0x9a   : > { %v568_v56 = vpop.permute.xlu2 %567 }
  0x9b   : > { %v574_v21 = vsel %vm571_vm1, %v568_v56, 0.0  ;;  %v3110_v56 = vld [vmem:[#allocation5 + $0x2] ss:$0 sm:$0xff] }
  0x9c   : > { %v579_v44 = vmul.f32 %v3105_v26, %v574_v21 }
  0xa2   : > { %v531_v14 = vpop.permute.xlu2 %530 }
  0xa3   : > { %v536_v19 = vsel %vm532_vm2, %v531_v14, 0.0 }
  0xa4   : > { %v541_v34 = vmul.f32 %v3106_v18, %v536_v19  ;;  %v617_v19 = vmul.f32 %v3110_v56, %v3612_v3 }
  0xb1   : > { %v513_v0 = vpop.permute.xlu0 %512  ;;  %v552_v10 = vpop.permute.xlu1 %551 }
  0xb2   : > { %v519_v13 = vsel %vm516_vm0, %v513_v0, 0.0  ;;  %v558_v36 = vsel %vm555_vm3, %v552_v10, 0.0  ;;  %v596_v10 = vmul.f32 %v3108_v35, %v588_v58 }
  0xb3   : > { %v524_v17 = vmul.f32 %v3103_v12, %v519_v13  ;;  %v563_v45 = vmul.f32 %v3104_v31, %v558_v36  ;;  %v637_v13 = vsel %vm634_vm7, %v635_v62, %v636_v63 }
  0xb5   : > { %v526_v30 = vadd.f32 %v524_v17, %v508_v16  ;;  %v630_v17 = vmul.f32 %v3111_v7, %v623_v9 }
  0xb9   : > { %v529_v22 = vpop.permute.xlu0 %528  ;;  %v515_v24 = vpop.permute.xlu1 %514 }
  0xba   : > { %v535_v27 = vsel %vm532_vm2, %v529_v22, 0.0  ;;  %v520_v29 = vsel %vm516_vm0, %v515_v24, 0.0  ;;  %v644_v22 = vmul.f32 %v3112_v61, %v637_v13  ;;  %vm1117_vm0 = vcmask 523264  }
  0xbb   : > { %v540_v32 = vmul.f32 %v3106_v18, %v535_v27  ;;  %v525_v33 = vmul.f32 %v3103_v12, %v520_v29  ;;  %v616_v12 = vmul.f32 %v3110_v56, %v3607_v2  ;;  %v626_v18 = vsel %vm620_vm6, %v622_v52, 0.0 }
  0xbc   : > { %vm1799_vm2 = vcmask 1045508   ;;  %vm1806_vm6 = vcmask 1045506  }
  0xbd   : > { %v542_v40 = vadd.f32 %v540_v32, %v526_v30  ;;  %v527_v41 = vadd.f32 %v525_v33, %v509_v23  ;;  %v640_v23 = vsel %vm634_vm7, %v636_v63, 0.0 }
  0xbf   : > { %v549_v46 = vadd.f32 %v547_v28, %v542_v40  ;;  %v543_v47 = vadd.f32 %v541_v34, %v527_v41  ;;  %v645_v28 = vmul.f32 %v3112_v61, %v640_v23  ;;  %v714_v34 = vld [vmem:[%s4527_s5] sm:$0xf]  ;;  %v986_v23 = vadd.s32 16, %v3601_v1 }
  0xc0   : > { %v716_v35 = vperm.slane %v714_v34, 0  ;;  %v717_v36 = vperm.slane %v714_v34, 1 }
  0xc1   : > { %v565_v53 = vadd.f32 %v563_v45, %v549_v46  ;;  %v550_v54 = vadd.f32 %v548_v37, %v543_v47  ;;  %v554_v55 = vpop.permute.xlu0 %553  ;;  %v570_v57 = vpop.permute.xlu1 %569  ;;  %v718_v47 = vperm.slane %v714_v34, 2  ;;  %3098 = vset.pattern.permute.xlu1 %v986_v23 }
  0xc2   : > { %v559_v59 = vsel %vm555_vm3, %v554_v55, 0.0  ;;  %v575_v60 = vsel %vm571_vm1, %v570_v57, 0.0  ;;  %vm1119_vm1 = vcmask 785408   ;;  %vm1803_vm3 = vcmask 1043458  }
  0xc3   : > { %v581_v4 = vadd.f32 %v579_v44, %v565_v53  ;;  %v564_v5 = vmul.f32 %v3104_v31, %v559_v59  ;;  %v580_v6 = vmul.f32 %v3105_v26, %v575_v60  ;;  %v631_v26 = vmul.f32 %v3111_v7, %v626_v18 }
  0xc5   : > { %v566_v0 = vadd.f32 %v564_v5, %v550_v54  ;;  %v597_v11 = vadd.f32 %v595_v48, %v581_v4  ;;  %v719_v48 = vperm.slane %v714_v34, 3 }
  0xc7   : > { %v582_v14 = vadd.f32 %v580_v6, %v566_v0  ;;  %v611_v16 = vadd.f32 %v609_v50, %v597_v11 }
  0xc9   : > { %v598_v20 = vadd.f32 %v596_v10, %v582_v14  ;;  %v618_v21 = vadd.f32 %v616_v12, %v611_v16 }
  0xcb   : > { %v612_v24 = vadd.f32 %v610_v15, %v598_v20  ;;  %v632_v25 = vadd.f32 %v630_v17, %v618_v21 }
  0xcd   : > { %v619_v2 = vadd.f32 %v617_v19, %v612_v24  ;;  %v646_v27 = vadd.f32 %v644_v22, %v632_v25  ;;  %v980_v24 = vadd.s32 8, %v3601_v1 }
  0xcf   : > { %v648_v29 = vmax.f32 %v646_v27, 0.0  ;;  %v633_v30 = vadd.f32 %v631_v26, %v619_v2  ;;  %3097 = vset.pattern.permute.xlu0 %v980_v24  ;;  %v3426_v27 = vmov 1983009808  }
  0xd1   : > { %740 = vmatmul.f32.vlgmr.msra.gmra.mxu0 %v648_v29  ;;  %763 = vmatmul.f32.vlgmr.msra.gmra.mxu1 %v648_v29  ;;  %v647_v31 = vadd.f32 %v645_v28, %v633_v30  ;;  %v888_v28 = vunpack.c.l.s4 %v3426_v27 }
  0xd2   : > { %786 = vmatmul.f32.vlgmr.msra.gmra.mxu2 %v648_v29  ;;  %809 = vmatmul.f32.vlgmr.msra.gmra.mxu3 %v648_v29 }
  0xd3   : > { %v649_v32 = vmax.f32 %v647_v31, 0.0 }
  0xd9   : > { %743 = vmatmul.f32.gmra.mxu0 %v649_v32  ;;  %766 = vmatmul.f32.gmra.mxu1 %v649_v32 }
  0xda   : > { %789 = vmatmul.f32.gmra.mxu2 %v649_v32  ;;  %812 = vmatmul.f32.gmra.mxu3 %v649_v32 }
 0x14e   : > { %v741_v3 = vpop.f32.mrf.mxu0  ;;  %v764_v33 = vpop.f32.mrf.mxu1 }
 0x14f   : > { %v3663_v41 = vadd.f32 %v741_v3, %v716_v35  ;;  %v3665_v42 = vadd.f32 %v764_v33, %v717_v36  ;;  %v3706_v33 = vunpack.c.0.s8 %v888_v28 }
 0x155   : > { %v787_v37 = vpop.f32.mrf.mxu2  ;;  %v810_v38 = vpop.f32.mrf.mxu3 }
 0x156   : > { %v744_v39 = vpop.f32.mrf.mxu0  ;;  %v767_v40 = vpop.f32.mrf.mxu1  ;;  %v3675_v55 = vadd.f32 %v787_v37, %v718_v47  ;;  %v3677_v56 = vadd.f32 %v810_v38, %v719_v48 }
 0x157   : > { %v3667_v43 = vadd.f32 %v744_v39, %v716_v35  ;;  %v3669_v44 = vadd.f32 %v767_v40, %v717_v36 }
 0x159   : > { %v816_v45 = vadd.f32 %v3667_v43, %v3663_v41  ;;  %v823_v46 = vadd.f32 %v3669_v44, %v3665_v42 }
 0x15b   : > { %v817_v49 = vrot.slane %v816_v45, 4  ;;  %v824_v50 = vrot.slane %v823_v46, 4 }
 0x15d   : > { %v818_v51 = vadd.f32 %v817_v49, %v816_v45  ;;  %v825_v52 = vadd.f32 %v824_v50, %v823_v46  ;;  %v790_v53 = vpop.f32.mrf.mxu2  ;;  %v813_v54 = vpop.f32.mrf.mxu3  ;;  %v3427_v49 = vmov 1934713408  }
 0x15e   : > { %v3679_v57 = vadd.f32 %v790_v53, %v718_v47  ;;  %v3681_v58 = vadd.f32 %v813_v54, %v719_v48  ;;  %v912_v50 = vunpack.c.l.s4 %v3427_v49 }
 0x15f   : > { %v819_v59 = vrot.slane %v818_v51, 2  ;;  %v826_v60 = vrot.slane %v825_v52, 2 }
 0x160   : > { %v830_v62 = vadd.f32 %v3679_v57, %v3675_v55  ;;  %v837_v63 = vadd.f32 %v3681_v58, %v3677_v56 }
 0x161   : > { %v820_v4 = vadd.f32 %v819_v59, %v818_v51  ;;  %v827_v5 = vadd.f32 %v826_v60, %v825_v52 }
 0x162   : > { %v831_v6 = vrot.slane %v830_v62, 4  ;;  %v838_v7 = vrot.slane %v837_v63, 4 }
 0x163   : > { %v821_v8 = vrot.slane %v820_v4, 1  ;;  %v828_v9 = vrot.slane %v827_v5, 1 }
 0x164   : > { %v839_v0 = vadd.f32 %v838_v7, %v837_v63  ;;  %v832_v12 = vadd.f32 %v831_v6, %v830_v62  ;;  %v3719_v63 = vunpack.c.0.s8 %v912_v50 }
 0x165   : > { %v829_v10 = vadd.f32 %v828_v9, %v827_v5  ;;  %v822_v11 = vadd.f32 %v821_v8, %v820_v4 }
 0x166   : > { %v840_v61 = vrot.slane %v839_v0, 2  ;;  %v833_v14 = vrot.slane %v832_v12, 2 }
 0x167   : > { %858 = vrot.lane.b32.xlu0 %v829_v10, %s3423_s16  ;;  %861 = vrot.lane.b32.xlu2 %v829_v10, %s3424_s4 }
 0x168   : > { %v841_v13 = vadd.f32 %v840_v61, %v839_v0  ;;  %851 = vrot.lane.b32.xlu1 %v822_v11, %s3424_s4  ;;  %v834_v17 = vadd.f32 %v833_v14, %v832_v12 }
 0x16a   : > { %v842_v15 = vrot.slane %v841_v13, 1  ;;  %v835_v18 = vrot.slane %v834_v17, 1 }
 0x16c   : > { %v843_v16 = vadd.f32 %v842_v15, %v841_v13  ;;  %v3693_v19 = vadd.f32 %v835_v18, %v834_v17 }
 0x16f   : > { %881 = vrot.lane.b32.xlu0 %v843_v16, %s3424_s4  ;;  %855 = vrot.lane.b32.xlu2 %v829_v10, %s3425_s19 }
 0x170   : > { %845 = vrot.lane.b32.xlu1 %v822_v11, %s3425_s19 }
 0x177   : > { %878 = vrot.lane.b32.xlu0 %v843_v16, %s3423_s16  ;;  %875 = vrot.lane.b32.xlu2 %v843_v16, %s3425_s19 }
 0x178   : > { %871 = vrot.lane.b32.xlu1 %v3693_v19, %s3424_s4 }
 0x17f   : > { %865 = vrot.lane.b32.xlu0 %v3693_v19, %s3425_s19  ;;  %848 = vrot.lane.b32.xlu2 %v822_v11, %s3423_s16 }
 0x180   : > { %868 = vrot.lane.b32.xlu1 %v3693_v19, %s3423_s16 }
 0x1c1   : > { %v862_v20 = vpop.permute.xlu2 %861 }
 0x1c2   : > { %v903_v30 = vrot.slane %v862_v20, 4 }
 0x1c9   : > { %v856_v21 = vpop.permute.xlu2 %855 }
 0x1ca   : > { %v904_v35 = vsel %vm885_vm8, %v903_v30, %v856_v21 }
 0x1cb   : > { %v908_v45 = vperm.slane %v904_v35, %v3706_v33 }
 0x1cd   : > { %v915_v59 = vrot.slane %v908_v45, 4 }
 0x1d1   : > { %v876_v26 = vpop.permute.xlu2 %875 }
 0x1d9   : > { %v859_v22 = vpop.permute.xlu0 %858  ;;  %v849_v34 = vpop.permute.xlu2 %848 }
 0x1da   : > { %v852_v25 = vpop.permute.xlu1 %851  ;;  %v897_v31 = vrot.slane %v859_v22, 4  ;;  %v884_v38 = vrot.slane %v849_v34, 4  ;;  %v992_v34 = vadd.s32 24, %v3601_v1 }
 0x1db   : > { %v891_v32 = vrot.slane %v852_v25, 4 }
 0x1dc   : > { %v898_v37 = vsel %vm885_vm8, %v897_v31, %v829_v10  ;;  %v886_v54 = vsel %vm885_vm8, %v884_v38, %v822_v11  ;;  %v997_v38 = vld [vmem:[%s4528_s6 + $0x8] sm:$0xff] }
 0x1dd   : > { %v902_v51 = vperm.slane %v898_v37, %v3706_v33  ;;  %v890_v5 = vperm.slane %v886_v54, %v3706_v33  ;;  %v998_v37 = vld [vmem:[%s4528_s6 + $0x10] sm:$0xff] }
 0x1df   : > { %v916_v4 = vsel %vm885_vm8, %v915_v59, %v902_v51 }
 0x1e0   : > { %v920_v12 = vperm.slane %v916_v4, %v3719_v63 }
 0x1e1   : > { %v882_v2 = vpop.permute.xlu0 %881 }
 0x1e2   : > { %v846_v29 = vpop.permute.xlu1 %845  ;;  %v941_v3 = vrot.slane %v882_v2, 4  ;;  %v921_v20 = vrot.slane %v920_v12, 4 }
 0x1e3   : > { %v892_v36 = vsel %vm885_vm8, %v891_v32, %v846_v29 }
 0x1e4   : > { %v942_v39 = vsel %vm885_vm8, %v941_v3, %v876_v26  ;;  %v896_v46 = vperm.slane %v892_v36, %v3706_v33  ;;  %v996_v36 = vld [vmem:[%s4528_s6] sm:$0xff] }
 0x1e5   : > { %v946_v52 = vperm.slane %v942_v39, %v3706_v33 }
 0x1e6   : > { %v909_v60 = vrot.slane %v896_v46, 4 }
 0x1e7   : > { %v953_v6 = vrot.slane %v946_v52, 4 }
 0x1e8   : > { %v910_v9 = vsel %vm885_vm8, %v909_v60, %v890_v5 }
 0x1e9   : > { %v879_v40 = vpop.permute.xlu0 %878  ;;  %v914_v14 = vperm.slane %v910_v9, %v3719_v63 }
 0x1ea   : > { %v935_v47 = vrot.slane %v879_v40, 4  ;;  %v872_v48 = vpop.permute.xlu1 %871 }
 0x1eb   : > { %v929_v7 = vrot.slane %v872_v48, 4  ;;  %v922_v22 = vsel %vm885_vm8, %v921_v20, %v914_v14 }
 0x1ec   : > { %v936_v53 = vsel %vm885_vm8, %v935_v47, %v843_v16  ;;  %v962_v26 = vsel %vm961_vm9, %v922_v22, 0.0  ;;  %v1202_v22 = vld [vmem:[#allocation11 + $0x1e0] sm:$0xff] }
 0x1ed   : > { %v940_v62 = vperm.slane %v936_v53, %v3706_v33  ;;  %1408 = vmatpush.msrb.mxu0 %v1202_v22 }
 0x1ef   : > { %v954_v0 = vsel %vm885_vm8, %v953_v6, %v940_v62 }
 0x1f0   : > { %v958_v15 = vperm.slane %v954_v0, %v3719_v63  ;;  %v1025_v0 = vld [vmem:[#allocation10] sm:$0x3] }
 0x1f1   : > { %v866_v8 = vpop.permute.xlu0 %865 }
 0x1f2   : > { %v930_v10 = vsel %vm885_vm8, %v929_v7, %v866_v8  ;;  %v869_v11 = vpop.permute.xlu1 %868  ;;  %v959_v23 = vrot.slane %v958_v15, 4 }
 0x1f3   : > { %v934_v61 = vperm.slane %v930_v10, %v3706_v33  ;;  %v923_v13 = vrot.slane %v869_v11, 4 }
 0x1f5   : > { %v947_v16 = vrot.slane %v934_v61, 4  ;;  %v924_v17 = vsel %vm885_vm8, %v923_v13, %v3693_v19 }
 0x1f6   : > { %v928_v18 = vperm.slane %v924_v17, %v3706_v33 }
 0x1f8   : > { %v948_v21 = vsel %vm885_vm8, %v947_v16, %v928_v18 }
 0x1f9   : > { %v952_v24 = vperm.slane %v948_v21, %v3719_v63 }
 0x1fb   : > { %v960_v25 = vsel %vm885_vm8, %v959_v23, %v952_v24  ;;  %v1330_v23 = vld [vmem:[#allocation11 + $0x5e0] sm:$0xff] }
 0x1fc   : > { %v963_v2 = vsel %vm961_vm9, %v960_v25, 0.0  ;;  %v1198_v24 = vld [vmem:[#allocation11 + $0x1c0] sm:$0xff]  ;;  %1454 = vmatpush.msrb.mxu2 %v1330_v23 }
 0x1fd   : > { %v964_v27 = vadd.f32 %v963_v2, %v962_v26  ;;  %v1326_v25 = vld [vmem:[#allocation11 + $0x5c0] sm:$0xff]  ;;  %1409 = vmatpush.msrb.mxu0 %v1198_v24 }
 0x1fe   : > { %v1194_v26 = vld [vmem:[#allocation11 + $0x1a0] sm:$0xff]  ;;  %1455 = vmatpush.msrb.mxu2 %v1326_v25 }
 0x1ff   : > { %v965_v28 = vrot.slane %v964_v27, 4  ;;  %v1322_v2 = vld [vmem:[#allocation11 + $0x5a0] sm:$0xff]  ;;  %1410 = vmatpush.msrb.mxu0 %v1194_v26 }
 0x200   : > { %1456 = vmatpush.msrb.mxu2 %v1322_v2  ;;  %v1162_v26 = vld [vmem:[#allocation11 + $0xa0] sm:$0xff] }
 0x201   : > { %v966_v19 = vadd.f32 %v965_v28, %v964_v27  ;;  %v1266_v28 = vld [vmem:[#allocation11 + $0x3e0] sm:$0xff] }
 0x202   : > { %1431 = vmatpush.msrb.mxu1 %v1266_v28  ;;  %v1290_v2 = vld [vmem:[#allocation11 + $0x4a0] sm:$0xff] }
 0x203   : > { %v967_v29 = vrot.slane %v966_v19, 2  ;;  %v1230_v28 = vld [vmem:[#allocation11 + $0x2c0] sm:$0xff] }
 0x205   : > { %v968_v30 = vadd.f32 %v967_v29, %v966_v19  ;;  %v1394_v19 = vld [vmem:[#allocation11 + $0x7e0] sm:$0xff] }
 0x206   : > { %1477 = vmatpush.msrb.mxu3 %v1394_v19  ;;  %v1358_v19 = vld [vmem:[#allocation11 + $0x6c0] sm:$0xff] }
 0x207   : > { %v969_v31 = vrot.slane %v968_v30, 1 }
 0x209   : > { %v970_v32 = vadd.f32 %v969_v31, %v968_v30  ;;  %v1190_v30 = vld [vmem:[#allocation11 + $0x180] sm:$0xff] }
 0x20a   : > { %v1318_v31 = vld [vmem:[#allocation11 + $0x580] sm:$0xff]  ;;  %1411 = vmatpush.msrb.mxu0 %v1190_v30 }
 0x20b   : > { %v971_v3 = vmul.f32 0.00390625, %v970_v32  ;;  %v1262_v32 = vld [vmem:[#allocation11 + $0x3c0] sm:$0xff]  ;;  %1457 = vmatpush.msrb.mxu2 %v1318_v31 }
 0x20c   : > { %1432 = vmatpush.msrb.mxu1 %v1262_v32  ;;  %v1158_v31 = vld [vmem:[#allocation11 + $0x80] sm:$0xff] }
 0x20d   : > { %988 = vperm.xlu1 %3098, %v971_v3   ;;  %982 = vperm.xlu0 %3097, %v971_v3   ;;  %v1286_v32 = vld [vmem:[#allocation11 + $0x480] sm:$0xff] }
 0x20e   : > { %976 = vperm.xlu2 %3096, %v971_v3  }
 0x215   : > { %3100 = vset.pattern.permute.xlu1 %v3601_v1  ;;  %3101 = vset.pattern.permute.xlu0 %v3601_v1  ;;  %v999_v1 = vld [vmem:[%s4528_s6 + $0x18] sm:$0xff] }
 0x216   : > { %3099 = vset.pattern.permute.xlu2 %v992_v34  ;;  %v1390_v34 = vld [vmem:[#allocation11 + $0x7c0] sm:$0xff] }
 0x217   : > { %1478 = vmatpush.msrb.mxu3 %v1390_v34 }
 0x21e   : > { %994 = vperm.xlu2 %3099, %v971_v3   ;;  %v1186_v3 = vld [vmem:[#allocation11 + $0x160] sm:$0xff] }
 0x21f   : > { %1412 = vmatpush.msrb.mxu0 %v1186_v3  ;;  %v1226_v3 = vld [vmem:[#allocation11 + $0x2a0] sm:$0xff] }
 0x268   : > { %v977_v35 = vpop.permute.xlu2 %976 }
 0x269   : > { %v1000_v39 = vmul.f32 %v996_v36, %v977_v35  ;;  %v1314_v36 = vld [vmem:[#allocation11 + $0x560] sm:$0xff] }
 0x26a   : > { %1458 = vmatpush.msrb.mxu2 %v1314_v36  ;;  %v1154_v36 = vld [vmem:[#allocation11 + $0x60] sm:$0xff] }
 0x26b   : > { %v1005_v49 = vsel %vm1004_vm10, %v1000_v39, 0.0 }
 0x278   : > { %v995_v40 = vpop.permute.xlu2 %994 }
 0x279   : > { %v1003_v50 = vmul.f32 %v999_v1, %v995_v40  ;;  %v1254_v40 = vld [vmem:[#allocation11 + $0x380] sm:$0xff] }
 0x27b   : > { %v1010_v59 = vsel %vm1004_vm10, %v1003_v50, 0.0  ;;  %v1378_v50 = vld [vmem:[#allocation11 + $0x760] sm:$0xff] }
 0x27f   : > { %v989_v45 = vpop.permute.xlu1 %988  ;;  %v983_v46 = vpop.permute.xlu0 %982 }
 0x280   : > { %v1002_v47 = vmul.f32 %v998_v37, %v989_v45  ;;  %v1001_v48 = vmul.f32 %v997_v38, %v983_v46  ;;  %v1258_v37 = vld [vmem:[#allocation11 + $0x3a0] sm:$0xff] }
 0x281   : > { %v1386_v38 = vld [vmem:[#allocation11 + $0x7a0] sm:$0xff]  ;;  %1433 = vmatpush.msrb.mxu1 %v1258_v37 }
 0x282   : > { %v1006_v51 = vsel %vm1004_vm10, %v1001_v48, 0.0  ;;  %v1008_v53 = vsel %vm1004_vm10, %v1002_v47, 0.0  ;;  %v1182_v46 = vld [vmem:[#allocation11 + $0x140] sm:$0xff]  ;;  %1479 = vmatpush.msrb.mxu3 %v1386_v38  ;;  %vm1949_vm10 = vcmask 1041409  }
 0x283   : > { %v1007_v52 = vadd.f32 %v1006_v51, %v1005_v49  ;;  %v1310_v47 = vld [vmem:[#allocation11 + $0x540] sm:$0xff]  ;;  %1434 = vmatpush.msrb.mxu1 %v1254_v40  ;;  %1413 = vmatpush.msrb.mxu0 %v1182_v46 }
 0x284   : > { %v1382_v48 = vld [vmem:[#allocation11 + $0x780] sm:$0xff]  ;;  %1459 = vmatpush.msrb.mxu2 %v1310_v47 }
 0x285   : > { %v1009_v54 = vadd.f32 %v1008_v53, %v1007_v52  ;;  %v1250_v49 = vld [vmem:[#allocation11 + $0x360] sm:$0xff]  ;;  %1480 = vmatpush.msrb.mxu3 %v1382_v48 }
 0x286   : > { %v1178_v52 = vld [vmem:[#allocation11 + $0x120] sm:$0xff]  ;;  %1435 = vmatpush.msrb.mxu1 %v1250_v49 }
 0x287   : > { %v1011_v60 = vadd.f32 %v1010_v59, %v1009_v54  ;;  %v1306_v53 = vld [vmem:[#allocation11 + $0x520] sm:$0xff]  ;;  %1481 = vmatpush.msrb.mxu3 %v1378_v50  ;;  %1414 = vmatpush.msrb.mxu0 %v1178_v52 }
 0x288   : > { %v1246_v59 = vld [vmem:[#allocation11 + $0x340] sm:$0xff]  ;;  %1460 = vmatpush.msrb.mxu2 %v1306_v53 }
 0x289   : > { %v1012_v62 = vrot.slane %v1011_v60, 4  ;;  %1436 = vmatpush.msrb.mxu1 %v1246_v59  ;;  %v1354_v37 = vld [vmem:[#allocation11 + $0x6a0] sm:$0xff]  ;;  %v1331_v59 = vld [vmem:[#allocation11 + $0x5e8] sm:$0xff] }
 0x28a   : > { %v1150_v40 = vld [vmem:[#allocation11 + $0x40] sm:$0xff] }
 0x28b   : > { %v1013_v4 = vadd.f32 %v1012_v62, %v1011_v60  ;;  %v1374_v60 = vld [vmem:[#allocation11 + $0x740] sm:$0xff] }
 0x28c   : > { %1482 = vmatpush.msrb.mxu3 %v1374_v60  ;;  %v1146_v46 = vld [vmem:[#allocation11 + $0x20] sm:$0xff] }
 0x28d   : > { %v1014_v5 = vrot.slane %v1013_v4, 2  ;;  %v1274_v48 = vld [vmem:[#allocation11 + $0x420] sm:$0xff] }
 0x28e   : > { %v1142_v50 = vld [vmem:[#allocation11] sm:$0xff] }
 0x28f   : > { %v1015_v6 = vadd.f32 %v1014_v5, %v1013_v4  ;;  %v1174_v4 = vld [vmem:[#allocation11 + $0x100] sm:$0xff] }
 0x290   : > { %v1302_v5 = vld [vmem:[#allocation11 + $0x500] sm:$0xff]  ;;  %1415 = vmatpush.msrb.mxu0 %v1174_v4  ;;  %v1199_v4 = vld [vmem:[#allocation11 + $0x1c8] sm:$0xff] }
 0x291   : > { %v1016_v7 = vrot.slane %v1015_v6, 1  ;;  %1461 = vmatpush.msrb.mxu2 %v1302_v5  ;;  %v1270_v52 = vld [vmem:[#allocation11 + $0x400] sm:$0xff]  ;;  %v1327_v5 = vld [vmem:[#allocation11 + $0x5c8] sm:$0xff] }
 0x292   : > { %v1350_v53 = vld [vmem:[#allocation11 + $0x680] sm:$0xff] }
 0x293   : > { %v1017_v8 = vadd.f32 %v1016_v7, %v1015_v6  ;;  %v1242_v7 = vld [vmem:[#allocation11 + $0x320] sm:$0xff] }
 0x294   : > { %1437 = vmatpush.msrb.mxu1 %v1242_v7  ;;  %v1218_v60 = vld [vmem:[#allocation11 + $0x260] sm:$0xff] }
 0x295   : > { %v1018_v9 = vmax.f32 %v1017_v8, 0.0  ;;  %v1370_v8 = vld [vmem:[#allocation11 + $0x720] sm:$0xff] }
 0x296   : > { %1483 = vmatpush.msrb.mxu3 %v1370_v8  ;;  %v1342_v7 = vld [vmem:[#allocation11 + $0x640] sm:$0xff]  ;;  %v1195_v8 = vld [vmem:[#allocation11 + $0x1a8] sm:$0xff] }
 0x297   : > { %1023 = vperm.xlu1 %3100, %v1018_v9  }
 0x309   : > { %v1024_v10 = vpop.permute.xlu1 %1023 }
 0x30a   : > { %v1026_v11 = vmul.f32 %v1025_v0, %v1024_v10  ;;  %v1170_v10 = vld [vmem:[#allocation11 + $0xe0] sm:$0xff] }
 0x30b   : > { %1416 = vmatpush.msrb.mxu0 %v1170_v10  ;;  %v1338_v10 = vld [vmem:[#allocation11 + $0x620] sm:$0xff] }
 0x30c   : > { %v1028_v12 = vsel %vm1027_vm11, %v1026_v11, 0.0  ;;  %v1298_v11 = vld [vmem:[#allocation11 + $0x4e0] sm:$0xff]  ;;  %vm1951_vm11 = vcmask 1043459  }
 0x30d   : > { %v1029_v61 = vrot.slane %v1028_v12, 4  ;;  %1462 = vmatpush.msrb.mxu2 %v1298_v11  ;;  %v1191_v11 = vld [vmem:[#allocation11 + $0x188] sm:$0xff] }
 0x30f   : > { %v1030_v13 = vadd.f32 %v1029_v61, %v1028_v12  ;;  %v1238_v12 = vld [vmem:[#allocation11 + $0x300] sm:$0xff] }
 0x310   : > { %v1366_v61 = vld [vmem:[#allocation11 + $0x700] sm:$0xff]  ;;  %1438 = vmatpush.msrb.mxu1 %v1238_v12  ;;  %v1319_v12 = vld [vmem:[#allocation11 + $0x588] sm:$0xff] }
 0x311   : > { %v1031_v14 = vrot.slane %v1030_v13, 2  ;;  %1484 = vmatpush.msrb.mxu3 %v1366_v61  ;;  %v1206_v61 = vld [vmem:[#allocation11 + $0x200] sm:$0xff] }
 0x313   : > { %v1032_v15 = vadd.f32 %v1031_v14, %v1030_v13 }
 0x315   : > { %v1033_v16 = vrot.slane %v1032_v15, 1 }
 0x317   : > { %v1034_v17 = vadd.f32 %v1033_v16, %v1032_v15  ;;  %v1166_v16 = vld [vmem:[#allocation11 + $0xc0] sm:$0xff] }
 0x318   : > { %1417 = vmatpush.msrb.mxu0 %v1166_v16  ;;  %v1267_v16 = vld [vmem:[#allocation11 + $0x3e8] sm:$0xff] }
 0x319   : > { %v2957_v18 = vmul.f32 -1.442695, %v1034_v17  ;;  %v1294_v17 = vld [vmem:[#allocation11 + $0x4c0] sm:$0xff] }
 0x31a   : > { %1463 = vmatpush.msrb.mxu2 %v1294_v17  ;;  %1418 = vmatpush.msrb.mxu0 %v1162_v26  ;;  %v1315_v17 = vld [vmem:[#allocation11 + $0x568] sm:$0xff] }
 0x31b   : > { %3113 = vpow2.f32 %v2957_v18  ;;  %v1307_v26 = vld [vmem:[#allocation11 + $0x528] sm:$0xff] }
 0x31c   : > { %1464 = vmatpush.msrb.mxu2 %v1290_v2  ;;  %1419 = vmatpush.msrb.mxu0 %v1158_v31  ;;  %v1387_v2 = vld [vmem:[#allocation11 + $0x7a8] sm:$0xff] }
 0x31d   : > { %v1251_v31 = vld [vmem:[#allocation11 + $0x368] sm:$0xff] }
 0x31e   : > { %1465 = vmatpush.msrb.mxu2 %v1286_v32  ;;  %1420 = vmatpush.msrb.mxu0 %v1154_v36  ;;  %v1299_v32 = vld [vmem:[#allocation11 + $0x4e8] sm:$0xff] }
 0x31f   : > { %v1295_v36 = vld [vmem:[#allocation11 + $0x4c8] sm:$0xff] }
 0x320   : > { %1421 = vmatpush.msrb.mxu0 %v1150_v40  ;;  %v1291_v40 = vld [vmem:[#allocation11 + $0x4a8] sm:$0xff] }
 0x321   : > { %v3114_v20 = vpop.eup %3113 }
 0x322   : > { %v1038_v21 = vadd.f32 1.0, %v3114_v20  ;;  %v1234_v20 = vld [vmem:[#allocation11 + $0x2e0] sm:$0xff]  ;;  %1422 = vmatpush.msrb.mxu0 %v1146_v46  ;;  %v1239_v46 = vld [vmem:[#allocation11 + $0x308] sm:$0xff] }
 0x323   : > { %1439 = vmatpush.msrb.mxu1 %v1234_v20  ;;  %v1183_v20 = vld [vmem:[#allocation11 + $0x148] sm:$0xff] }
 0x324   : > { %3115 = vrcp.f32 %v1038_v21  ;;  %v1050_v39 = vand.u32 2147483648, %v1038_v21  ;;  %v1048_v45 = vand.u32 2147483647, %v1038_v21  ;;  %vm1044_vm13 = vweird.f32 %v1038_v21  ;;  %1423 = vmatpush.msrb.mxu0 %v1142_v50  ;;  %v1235_v50 = vld [vmem:[#allocation11 + $0x2e8] sm:$0xff] }
 0x325   : > { %1440 = vmatpush.msrb.mxu1 %v1230_v28  ;;  %v1255_v28 = vld [vmem:[#allocation11 + $0x388] sm:$0xff] }
 0x326   : > { %v1051_v54 = vor.u32 1.1754944e-38, %v1050_v39  ;;  %vm1049_vm15 = vcmp.eq.f32.partialorder %v1048_v45, 8.507059e+37  ;;  %v1282_v39 = vld [vmem:[#allocation11 + $0x460] sm:$0xff] }
 0x327   : > { %1441 = vmatpush.msrb.mxu1 %v1226_v3  ;;  %1466 = vmatpush.msrb.mxu2 %v1282_v39  ;;  %v1278_v45 = vld [vmem:[#allocation11 + $0x440] sm:$0xff]  ;;  %v1379_v3 = vld [vmem:[#allocation11 + $0x768] sm:$0xff] }
 0x328   : > { %v1243_v39 = vld [vmem:[#allocation11 + $0x328] sm:$0xff] }
 0x329   : > { %1467 = vmatpush.msrb.mxu2 %v1278_v45  ;;  %v1159_v45 = vld [vmem:[#allocation11 + $0x88] sm:$0xff] }
 0x32a   : > { %v3116_v27 = vpop.eup %3115 }
 0x32b   : > { %v1040_v29 = vmul.f32 %v3116_v27, %v1038_v21  ;;  %vm1045_vm12 = vweird.f32 %v3116_v27  ;;  %v1362_v21 = vld [vmem:[#allocation11 + $0x6e0] sm:$0xff]  ;;  %1468 = vmatpush.msrb.mxu2 %v1274_v48  ;;  %v1367_v48 = vld [vmem:[#allocation11 + $0x708] sm:$0xff] }
 0x32c   : > { %vm1046_vm14 = vmor %vm1044_vm13, %vm1045_vm12  ;;  %1485 = vmatpush.msrb.mxu3 %v1362_v21  ;;  %v1263_v21 = vld [vmem:[#allocation11 + $0x3c8] sm:$0xff]  ;;  %vm1953_vm12 = vcmask 1045509   ;;  %vm1955_vm13 = vcmask 1047559  }
 0x32d   : > { %v1041_v35 = vsub.f32 1.0, %v1040_v29  ;;  %1469 = vmatpush.msrb.mxu2 %v1270_v52  ;;  %v1363_v52 = vld [vmem:[#allocation11 + $0x6e8] sm:$0xff] }
 0x32e   : > { %1486 = vmatpush.msrb.mxu3 %v1358_v19  ;;  %v1303_v19 = vld [vmem:[#allocation11 + $0x508] sm:$0xff] }
 0x32f   : > { %v1042_v1 = vmul.f32 %v3116_v27, %v1041_v35  ;;  %1546 = vmatpush.msra.mxu2 %v1331_v59  ;;  %v1279_v59 = vld [vmem:[#allocation11 + $0x448] sm:$0xff] }
 0x330   : > { %1487 = vmatpush.msrb.mxu3 %v1354_v37  ;;  %v1375_v37 = vld [vmem:[#allocation11 + $0x748] sm:$0xff] }
 0x331   : > { %v1043_v51 = vadd.f32 %v3116_v27, %v1042_v1  ;;  %1547 = vmatpush.msra.mxu2 %v1327_v5  ;;  %v1275_v5 = vld [vmem:[#allocation11 + $0x428] sm:$0xff] }
 0x332   : > { %1488 = vmatpush.msrb.mxu3 %v1350_v53  ;;  %v1151_v53 = vld [vmem:[#allocation11 + $0x48] sm:$0xff] }
 0x333   : > { %v1047_v62 = vsel %vm1046_vm14, %v3116_v27, %v1043_v51  ;;  %v1222_v51 = vld [vmem:[#allocation11 + $0x280] sm:$0xff] }
 0x334   : > { %v1052_v6 = vsel %vm1049_vm15, %v1051_v54, %v1047_v62  ;;  %1442 = vmatpush.msrb.mxu1 %v1222_v51  ;;  %v1203_v54 = vld [vmem:[#allocation11 + $0x1e8] sm:$0xff]  ;;  %v1346_v62 = vld [vmem:[#allocation11 + $0x660] sm:$0xff] }
 0x335   : > { %v1059_v9 = vperm.slane %v1052_v6, %v3706_v33  ;;  %v1054_v0 = vrot.slane %v1052_v6, 4  ;;  %1500 = vmatpush.msra.mxu0 %v1203_v54  ;;  %v1214_v6 = vld [vmem:[#allocation11 + $0x240] sm:$0xff]  ;;  %1489 = vmatpush.msrb.mxu3 %v1346_v62  ;;  %v1283_v51 = vld [vmem:[#allocation11 + $0x468] sm:$0xff] }
 0x336   : > { %1443 = vmatpush.msrb.mxu1 %v1218_v60  ;;  %v1231_v54 = vld [vmem:[#allocation11 + $0x2c8] sm:$0xff] }
 0x337   : > { %v3757_v13 = vperm.slane %v1059_v9, %v3719_v63  ;;  %v1064_v14 = vrot.slane %v1059_v9, 4  ;;  %v1055_v15 = vsel %vm885_vm8, 0.0, %v1054_v0  ;;  %v1323_v9 = vld [vmem:[#allocation11 + $0x5a8] sm:$0xff]  ;;  %1501 = vmatpush.msra.mxu0 %v1199_v4  ;;  %v1210_v0 = vld [vmem:[#allocation11 + $0x220] sm:$0xff]  ;;  %1490 = vmatpush.msrb.mxu3 %v1342_v7 }
 0x338   : > { %v1063_v18 = vperm.slane %v1055_v15, %v3706_v33  ;;  %1444 = vmatpush.msrb.mxu1 %v1214_v6  ;;  %1548 = vmatpush.msra.mxu2 %v1323_v9  ;;  %v1187_v15 = vld [vmem:[#allocation11 + $0x168] sm:$0xff] }
 0x339   : > { %v1084_v22 = vrot.slane %v3757_v13, 4  ;;  %v1065_v23 = vsel %vm885_vm8, 0.0, %v1064_v14  ;;  %1502 = vmatpush.msra.mxu0 %v1195_v8  ;;  %1491 = vmatpush.msrb.mxu3 %v1338_v10  ;;  %v1334_v14 = vld [vmem:[#allocation11 + $0x600] sm:$0xff]  ;;  %v1359_v60 = vld [vmem:[#allocation11 + $0x6c8] sm:$0xff] }
 0x33a   : > { %v1073_v24 = vperm.slane %v1065_v23, %v3719_v63  ;;  %v1074_v25 = vrot.slane %v1063_v18, 4  ;;  %v3766_v33 = vperm.slane %v1063_v18, %v3719_v63  ;;  %1445 = vmatpush.msrb.mxu1 %v1210_v0  ;;  %1549 = vmatpush.msra.mxu2 %v1319_v12  ;;  %v1395_v18 = vld [vmem:[#allocation11 + $0x7e8] sm:$0xff] }
 0x33b   : > { %v1085_v27 = vsel %vm885_vm8, 0.0, %v1084_v22  ;;  %1503 = vmatpush.msra.mxu0 %v1191_v11  ;;  %1492 = vmatpush.msrb.mxu3 %v1334_v14  ;;  %v1311_v22 = vld [vmem:[#allocation11 + $0x548] sm:$0xff] }
 0x33c   : > { %1093 = vrot.lane.b32.xlu2 %v1085_v27, %s3424_s4  ;;  %1097 = vrot.lane.b32.xlu0 %v1073_v24, %s3423_s16  ;;  %v1086_v29 = vrot.slane %v1073_v24, 4  ;;  %v1075_v30 = vsel %vm885_vm8, 0.0, %v1074_v25  ;;  %v1088_v38 = vrot.slane %v3766_v33, 4  ;;  %v1391_v23 = vld [vmem:[#allocation11 + $0x7c8] sm:$0xff] }
 0x33d   : > { %v1083_v35 = vperm.slane %v1075_v30, %v3719_v63  ;;  %1446 = vmatpush.msrb.mxu1 %v1206_v61  ;;  %1504 = vmatpush.msra.mxu0 %v1187_v15  ;;  %v1179_v24 = vld [vmem:[#allocation11 + $0x128] sm:$0xff] }
 0x33e   : > { %v1087_v34 = vsel %vm885_vm8, 0.0, %v1086_v29  ;;  %v1089_v47 = vsel %vm885_vm8, 0.0, %v1088_v38  ;;  %1550 = vmatpush.msra.mxu2 %v1315_v17  ;;  %1569 = vmatpush.msra.mxu3 %v1395_v18  ;;  %v1259_v25 = vld [vmem:[#allocation11 + $0x3a8] sm:$0xff] }
 0x33f   : > { %1101 = vrot.lane.b32.xlu1 %v1087_v34, %s3425_s19  ;;  %v1090_v1 = vrot.slane %v1083_v35, 4  ;;  %1523 = vmatpush.msra.mxu1 %v1267_v16  ;;  %v1175_v27 = vld [vmem:[#allocation11 + $0x108] sm:$0xff] }
 0x340   : > { %1505 = vmatpush.msra.mxu0 %v1183_v20  ;;  %1551 = vmatpush.msra.mxu2 %v1311_v22  ;;  %v1383_v29 = vld [vmem:[#allocation11 + $0x788] sm:$0xff] }
 0x341   : > { %v1091_v49 = vsel %vm885_vm8, 0.0, %v1090_v1  ;;  %1524 = vmatpush.msra.mxu1 %v1263_v21  ;;  %1570 = vmatpush.msra.mxu3 %v1391_v23  ;;  %v1171_v30 = vld [vmem:[#allocation11 + $0xe8] sm:$0xff] }
 0x342   : > { %1506 = vmatpush.msra.mxu0 %v1179_v24  ;;  %1552 = vmatpush.msra.mxu2 %v1307_v26  ;;  %v1167_v34 = vld [vmem:[#allocation11 + $0xc8] sm:$0xff] }
 0x343   : > { %1525 = vmatpush.msra.mxu1 %v1259_v25  ;;  %1571 = vmatpush.msra.mxu3 %v1387_v2  ;;  %v1163_v38 = vld [vmem:[#allocation11 + $0xa8] sm:$0xff] }
 0x344   : > { %1105 = vrot.lane.b32.xlu2 %v1089_v47, %s3424_s4  ;;  %1109 = vrot.lane.b32.xlu0 %v1083_v35, %s3423_s16  ;;  %v1247_v35 = vld [vmem:[#allocation11 + $0x348] sm:$0xff] }
 0x345   : > { %1507 = vmatpush.msra.mxu0 %v1175_v27  ;;  %1526 = vmatpush.msra.mxu1 %v1255_v28  ;;  %v1371_v1 = vld [vmem:[#allocation11 + $0x728] sm:$0xff] }
 0x346   : > { %1553 = vmatpush.msra.mxu2 %v1303_v19  ;;  %1572 = vmatpush.msra.mxu3 %v1383_v29  ;;  %v1287_v47 = vld [vmem:[#allocation11 + $0x488] sm:$0xff]  ;;  %v1204_v19 = vld [vmem:[#allocation11 + $0x1f0] sm:$0xff] }
 0x347   : > { %1113 = vrot.lane.b32.xlu1 %v1091_v49, %s3425_s19  ;;  %1508 = vmatpush.msra.mxu0 %v1171_v30  ;;  %v1155_v49 = vld [vmem:[#allocation11 + $0x68] sm:$0xff]  ;;  %v1332_v29 = vld [vmem:[#allocation11 + $0x5f0] sm:$0xff] }
 0x348   : > { %1527 = vmatpush.msra.mxu1 %v1251_v31  ;;  %1554 = vmatpush.msra.mxu2 %v1299_v32  ;;  %v1147_v62 = vld [vmem:[#allocation11 + $0x28] sm:$0xff]  ;;  %v1200_v31 = vld [vmem:[#allocation11 + $0x1d0] sm:$0xff] }
 0x349   : > { %1573 = vmatpush.msra.mxu3 %v1379_v3  ;;  %1509 = vmatpush.msra.mxu0 %v1167_v34  ;;  %v1227_v4 = vld [vmem:[#allocation11 + $0x2a8] sm:$0xff]  ;;  %v1328_v32 = vld [vmem:[#allocation11 + $0x5d0] sm:$0xff] }
 0x34a   : > { %1528 = vmatpush.msra.mxu1 %v1247_v35  ;;  %1555 = vmatpush.msra.mxu2 %v1295_v36  ;;  %v1355_v6 = vld [vmem:[#allocation11 + $0x6a8] sm:$0xff]  ;;  %v1324_v3 = vld [vmem:[#allocation11 + $0x5b0] sm:$0xff] }
 0x34b   : > { %1574 = vmatpush.msra.mxu3 %v1375_v37  ;;  %1510 = vmatpush.msra.mxu0 %v1163_v38  ;;  %v1143_v7 = vld [vmem:[#allocation11 + $0x8] sm:$0xff]  ;;  %v1192_v36 = vld [vmem:[#allocation11 + $0x190] sm:$0xff] }
 0x34c   : > { %1529 = vmatpush.msra.mxu1 %v1243_v39  ;;  %1556 = vmatpush.msra.mxu2 %v1291_v40  ;;  %v1223_v8 = vld [vmem:[#allocation11 + $0x288] sm:$0xff] }
 0x34d   : > { %1575 = vmatpush.msra.mxu3 %v1371_v1  ;;  %1511 = vmatpush.msra.mxu0 %v1159_v45  ;;  %v1271_v9 = vld [vmem:[#allocation11 + $0x408] sm:$0xff]  ;;  %v1188_v1 = vld [vmem:[#allocation11 + $0x170] sm:$0xff] }
 0x34e   : > { %1530 = vmatpush.msra.mxu1 %v1239_v46  ;;  %1557 = vmatpush.msra.mxu2 %v1287_v47  ;;  %v1351_v0 = vld [vmem:[#allocation11 + $0x688] sm:$0xff]  ;;  %v1268_v45 = vld [vmem:[#allocation11 + $0x3f0] sm:$0xff] }
 0x34f   : > { %1576 = vmatpush.msra.mxu3 %v1367_v48  ;;  %1512 = vmatpush.msra.mxu0 %v1155_v49  ;;  %v1219_v10 = vld [vmem:[#allocation11 + $0x268] sm:$0xff]  ;;  %v1396_v46 = vld [vmem:[#allocation11 + $0x7f0] sm:$0xff] }
 0x350   : > { %1531 = vmatpush.msra.mxu1 %v1235_v50  ;;  %1558 = vmatpush.msra.mxu2 %v1283_v51  ;;  %v1347_v11 = vld [vmem:[#allocation11 + $0x668] sm:$0xff]  ;;  %v1392_v47 = vld [vmem:[#allocation11 + $0x7d0] sm:$0xff] }
 0x351   : > { %1577 = vmatpush.msra.mxu3 %v1363_v52  ;;  %1513 = vmatpush.msra.mxu0 %v1151_v53  ;;  %v1215_v12 = vld [vmem:[#allocation11 + $0x248] sm:$0xff]  ;;  %v1180_v48 = vld [vmem:[#allocation11 + $0x130] sm:$0xff] }
 0x352   : > { %1532 = vmatpush.msra.mxu1 %v1231_v54  ;;  %1559 = vmatpush.msra.mxu2 %v1279_v59  ;;  %v1343_v61 = vld [vmem:[#allocation11 + $0x648] sm:$0xff]  ;;  %v1260_v49 = vld [vmem:[#allocation11 + $0x3b0] sm:$0xff] }
 0x353   : > { %1578 = vmatpush.msra.mxu3 %v1359_v60  ;;  %1514 = vmatpush.msra.mxu0 %v1147_v62  ;;  %v1211_v14 = vld [vmem:[#allocation11 + $0x228] sm:$0xff]  ;;  %v1308_v50 = vld [vmem:[#allocation11 + $0x530] sm:$0xff] }
 0x354   : > { %1533 = vmatpush.msra.mxu1 %v1227_v4  ;;  %1560 = vmatpush.msra.mxu2 %v1275_v5  ;;  %v1339_v15 = vld [vmem:[#allocation11 + $0x628] sm:$0xff]  ;;  %v1388_v51 = vld [vmem:[#allocation11 + $0x7b0] sm:$0xff] }
 0x355   : > { %1579 = vmatpush.msra.mxu3 %v1355_v6  ;;  %1515 = vmatpush.msra.mxu0 %v1143_v7  ;;  %v1207_v16 = vld [vmem:[#allocation11 + $0x208] sm:$0xff]  ;;  %v1176_v52 = vld [vmem:[#allocation11 + $0x110] sm:$0xff] }
 0x356   : > { %1534 = vmatpush.msra.mxu1 %v1223_v8  ;;  %1561 = vmatpush.msra.mxu2 %v1271_v9  ;;  %v1335_v17 = vld [vmem:[#allocation11 + $0x608] sm:$0xff]  ;;  %v1256_v53 = vld [vmem:[#allocation11 + $0x390] sm:$0xff] }
 0x357   : > { %1580 = vmatpush.msra.mxu3 %v1351_v0  ;;  %v1304_v54 = vld [vmem:[#allocation11 + $0x510] sm:$0xff] }
 0x358   : > { %1535 = vmatpush.msra.mxu1 %v1219_v10  ;;  %v1384_v59 = vld [vmem:[#allocation11 + $0x790] sm:$0xff] }
 0x359   : > { %1581 = vmatpush.msra.mxu3 %v1347_v11  ;;  %v1172_v60 = vld [vmem:[#allocation11 + $0xf0] sm:$0xff] }
 0x35a   : > { %1536 = vmatpush.msra.mxu1 %v1215_v12  ;;  %v1252_v62 = vld [vmem:[#allocation11 + $0x370] sm:$0xff] }
 0x35b   : > { %1582 = vmatpush.msra.mxu3 %v1343_v61  ;;  %v1300_v4 = vld [vmem:[#allocation11 + $0x4f0] sm:$0xff] }
 0x35c   : > { %1537 = vmatpush.msra.mxu1 %v1211_v14  ;;  %v1380_v5 = vld [vmem:[#allocation11 + $0x770] sm:$0xff] }
 0x35d   : > { %1583 = vmatpush.msra.mxu3 %v1339_v15  ;;  %v1168_v6 = vld [vmem:[#allocation11 + $0xd0] sm:$0xff] }
 0x35e   : > { %1538 = vmatpush.msra.mxu1 %v1207_v16  ;;  %v1248_v7 = vld [vmem:[#allocation11 + $0x350] sm:$0xff] }
 0x35f   : > { %1584 = vmatpush.msra.mxu3 %v1335_v17  ;;  %v1296_v8 = vld [vmem:[#allocation11 + $0x4d0] sm:$0xff] }
 0x360   : > { %v1376_v9 = vld [vmem:[#allocation11 + $0x750] sm:$0xff] }
 0x361   : > { %v1164_v0 = vld [vmem:[#allocation11 + $0xb0] sm:$0xff] }
 0x362   : > { %v1244_v10 = vld [vmem:[#allocation11 + $0x330] sm:$0xff] }
 0x363   : > { %v1292_v11 = vld [vmem:[#allocation11 + $0x4b0] sm:$0xff] }
 0x364   : > { %v1372_v12 = vld [vmem:[#allocation11 + $0x730] sm:$0xff] }
 0x365   : > { %v1160_v61 = vld [vmem:[#allocation11 + $0x90] sm:$0xff] }
 0x366   : > { %v1240_v14 = vld [vmem:[#allocation11 + $0x310] sm:$0xff] }
 0x367   : > { %v1288_v15 = vld [vmem:[#allocation11 + $0x490] sm:$0xff] }
 0x368   : > { %v1368_v16 = vld [vmem:[#allocation11 + $0x710] sm:$0xff] }
 0x369   : > { %v1156_v17 = vld [vmem:[#allocation11 + $0x70] sm:$0xff] }
 0x396   : > { %v1094_v18 = vpop.permute.xlu2 %1093 }
 0x397   : > { %v1116_v21 = vsel %vm961_vm9, %v3757_v13, %v1094_v18  ;;  %v1236_v18 = vld [vmem:[#allocation11 + $0x2f0] sm:$0xff] }
 0x39e   : > { %v1106_v26 = vpop.permute.xlu2 %1105 }
 0x3ae   : > { %v1098_v20 = vpop.permute.xlu0 %1097 }
 0x3af   : > { %v1118_v22 = vsel %vm1117_vm0, %v1116_v21, %v1098_v20  ;;  %v1284_v20 = vld [vmem:[#allocation11 + $0x470] sm:$0xff] }
 0x3b0   : > { %v1364_v21 = vld [vmem:[#allocation11 + $0x6f0] sm:$0xff] }
 0x3b1   : > { %v1102_v23 = vpop.permute.xlu1 %1101 }
 0x3b2   : > { %v1120_v24 = vsel %vm1119_vm1, %v1118_v22, %v1102_v23  ;;  %v1152_v22 = vld [vmem:[#allocation11 + $0x50] sm:$0xff] }
 0x3b3   : > { %v1124_v25 = vperm.slane %v1120_v24, 0  ;;  %v1232_v23 = vld [vmem:[#allocation11 + $0x2d0] sm:$0xff] }
 0x3b4   : > { %v1280_v24 = vld [vmem:[#allocation11 + $0x450] sm:$0xff] }
 0x3b5   : > { %v3789_v2 = vmul.f32 %v1124_v25, %v3663_v41  ;;  %v3792_v27 = vmul.f32 %v1124_v25, %v3675_v55  ;;  %v3795_v28 = vmul.f32 %v1124_v25, %v3667_v43  ;;  %v3798_v13 = vmul.f32 %v1124_v25, %v3679_v57  ;;  %v1196_v57 = vld [vmem:[#allocation11 + $0x1b0] sm:$0xff] }
 0x3b6   : > { %v1110_v30 = vpop.permute.xlu0 %1109  ;;  %v1121_v41 = vsel %vm961_vm9, %v3766_v33, %v1106_v26  ;;  %v1320_v33 = vld [vmem:[#allocation11 + $0x590] sm:$0xff] }
 0x3b7   : > { %1424 = vmatmul.f32.vlgmr.msrb.gmra.mxu0 %v3789_v2  ;;  %1470 = vmatmul.f32.vlgmr.msrb.gmra.mxu2 %v3792_v27  ;;  %1134 = vst [vmem:[%s3802_s14] sm:$0xff] %v3789_v2  ;;  %v1122_v43 = vsel %vm1117_vm0, %v1121_v41, %v1110_v30  ;;  %v1360_v25 = vld [vmem:[#allocation11 + $0x6d0] sm:$0xff] }
 0x3b8   : > { %1592 = vmatpush.msrb.mxu0 %v1204_v19  ;;  %1638 = vmatpush.msrb.mxu2 %v1332_v29  ;;  %1136 = vst [vmem:[%s3802_s14 + $0x10] sm:$0xff] %v3792_v27  ;;  %v1148_v26 = vld [vmem:[#allocation11 + $0x30] sm:$0xff] }
 0x3b9   : > { %v1114_v55 = vpop.permute.xlu1 %1113  ;;  %1138 = vst [vmem:[%s3802_s14 + $0x20] sm:$0xff] %v3795_v28  ;;  %v1228_v19 = vld [vmem:[#allocation11 + $0x2b0] sm:$0xff] }
 0x3ba   : > { %1593 = vmatpush.msrb.mxu0 %v1200_v31  ;;  %1639 = vmatpush.msrb.mxu2 %v1328_v32  ;;  %v1123_v34 = vsel %vm1119_vm1, %v1122_v43, %v1114_v55  ;;  %1140 = vst [vmem:[%s3802_s14 + $0x30] sm:$0xff] %v3798_v13  ;;  %v1276_v29 = vld [vmem:[#allocation11 + $0x430] sm:$0xff]  ;;  %v1205_v55 = vld [vmem:[#allocation11 + $0x1f8] sm:$0xff] }
 0x3bb   : > { %v1125_v35 = vperm.slane %v1123_v34, 0  ;;  %v1356_v30 = vld [vmem:[#allocation11 + $0x6b0] sm:$0xff] }
 0x3bc   : > { %1594 = vmatpush.msrb.mxu0 %v1196_v57  ;;  %1640 = vmatpush.msrb.mxu2 %v1324_v3  ;;  %v1144_v31 = vld [vmem:[#allocation11 + $0x10] sm:$0xff]  ;;  %v1333_v57 = vld [vmem:[#allocation11 + $0x5f8] sm:$0xff] }
 0x3bd   : > { %v3817_v37 = vmul.f32 %v1125_v35, %v3665_v42  ;;  %v3820_v38 = vmul.f32 %v1125_v35, %v3677_v56  ;;  %v3823_v39 = vmul.f32 %v1125_v35, %v3669_v44  ;;  %v3826_v40 = vmul.f32 %v1125_v35, %v3681_v58  ;;  %v1316_v42 = vld [vmem:[#allocation11 + $0x570] sm:$0xff]  ;;  %v1201_v35 = vld [vmem:[#allocation11 + $0x1d8] sm:$0xff] }
 0x3be   : > { %1595 = vmatpush.msrb.mxu0 %v1192_v36  ;;  %1641 = vmatpush.msrb.mxu2 %v1320_v33  ;;  %v1184_v44 = vld [vmem:[#allocation11 + $0x150] sm:$0xff]  ;;  %v1329_v36 = vld [vmem:[#allocation11 + $0x5d8] sm:$0xff] }
 0x3bf   : > { %1427 = vmatmul.f32.gmra.mxu0 %v3795_v28  ;;  %1447 = vmatmul.f32.vlgmr.msrb.gmra.mxu1 %v3817_v37  ;;  %1137 = vst [vmem:[%s3802_s14 + $0x18] sm:$0xff] %v3820_v38  ;;  %v1264_v56 = vld [vmem:[#allocation11 + $0x3d0] sm:$0xff] }
 0x3c0   : > { %1473 = vmatmul.f32.gmra.mxu2 %v3798_v13  ;;  %1493 = vmatmul.f32.vlgmr.msrb.gmra.mxu3 %v3820_v38  ;;  %1139 = vst [vmem:[%s3802_s14 + $0x28] sm:$0xff] %v3823_v39  ;;  %v1312_v58 = vld [vmem:[#allocation11 + $0x550] sm:$0xff] }
 0x3c1   : > { %1596 = vmatpush.msrb.mxu0 %v1188_v1  ;;  %1615 = vmatpush.msrb.mxu1 %v1268_v45  ;;  %1141 = vst [vmem:[%s3802_s14 + $0x38] sm:$0xff] %v3826_v40  ;;  %v1224_v32 = vld [vmem:[#allocation11 + $0x290] sm:$0xff]  ;;  %v1197_v45 = vld [vmem:[#allocation11 + $0x1b8] sm:$0xff] }
 0x3c2   : > { %1642 = vmatpush.msrb.mxu2 %v1316_v42  ;;  %1661 = vmatpush.msrb.mxu3 %v1396_v46  ;;  %1135 = vst [vmem:[%s3802_s14 + $0x8] sm:$0xff] %v3817_v37  ;;  %v1272_v41 = vld [vmem:[#allocation11 + $0x410] sm:$0xff]  ;;  %v1325_v42 = vld [vmem:[#allocation11 + $0x5b8] sm:$0xff] }
 0x3c3   : > { %1597 = vmatpush.msrb.mxu0 %v1184_v44  ;;  %1616 = vmatpush.msrb.mxu1 %v1264_v56  ;;  %v1352_v43 = vld [vmem:[#allocation11 + $0x690] sm:$0xff]  ;;  %v1193_v56 = vld [vmem:[#allocation11 + $0x198] sm:$0xff] }
 0x3c4   : > { %1643 = vmatpush.msrb.mxu2 %v1312_v58  ;;  %1662 = vmatpush.msrb.mxu3 %v1392_v47  ;;  %v1220_v3 = vld [vmem:[#allocation11 + $0x270] sm:$0xff]  ;;  %v1321_v58 = vld [vmem:[#allocation11 + $0x598] sm:$0xff] }
 0x3c5   : > { %1598 = vmatpush.msrb.mxu0 %v1180_v48  ;;  %1617 = vmatpush.msrb.mxu1 %v1260_v49  ;;  %v1348_v34 = vld [vmem:[#allocation11 + $0x670] sm:$0xff]  ;;  %v1189_v49 = vld [vmem:[#allocation11 + $0x178] sm:$0xff] }
 0x3c6   : > { %1644 = vmatpush.msrb.mxu2 %v1308_v50  ;;  %1663 = vmatpush.msrb.mxu3 %v1388_v51  ;;  %v1216_v33 = vld [vmem:[#allocation11 + $0x250] sm:$0xff]  ;;  %v1269_v50 = vld [vmem:[#allocation11 + $0x3f8] sm:$0xff] }
 0x3c7   : > { %1599 = vmatpush.msrb.mxu0 %v1176_v52  ;;  %1618 = vmatpush.msrb.mxu1 %v1256_v53  ;;  %v1344_v1 = vld [vmem:[#allocation11 + $0x650] sm:$0xff]  ;;  %v1317_v51 = vld [vmem:[#allocation11 + $0x578] sm:$0xff] }
 0x3c8   : > { %1645 = vmatpush.msrb.mxu2 %v1304_v54  ;;  %1664 = vmatpush.msrb.mxu3 %v1384_v59  ;;  %v1212_v46 = vld [vmem:[#allocation11 + $0x230] sm:$0xff]  ;;  %v1397_v52 = vld [vmem:[#allocation11 + $0x7f8] sm:$0xff] }
 0x3c9   : > { %1450 = vmatmul.f32.gmra.mxu1 %v3823_v39  ;;  %1496 = vmatmul.f32.gmra.mxu3 %v3826_v40  ;;  %v1340_v44 = vld [vmem:[#allocation11 + $0x630] sm:$0xff]  ;;  %v1185_v53 = vld [vmem:[#allocation11 + $0x158] sm:$0xff] }
 0x3ca   : > { %1516 = vmatmul.f32.vlgmr.msra.gmra.mxu0 %v3789_v2  ;;  %1562 = vmatmul.f32.vlgmr.msra.gmra.mxu2 %v3792_v27  ;;  %v1208_v47 = vld [vmem:[#allocation11 + $0x210] sm:$0xff]  ;;  %v1265_v54 = vld [vmem:[#allocation11 + $0x3d8] sm:$0xff] }
 0x3cb   : > { %1600 = vmatpush.msrb.mxu0 %v1172_v60  ;;  %1619 = vmatpush.msrb.mxu1 %v1252_v62  ;;  %v1336_v48 = vld [vmem:[#allocation11 + $0x610] sm:$0xff]  ;;  %v1313_v59 = vld [vmem:[#allocation11 + $0x558] sm:$0xff] }
 0x3cc   : > { %1646 = vmatpush.msrb.mxu2 %v1300_v4  ;;  %1665 = vmatpush.msrb.mxu3 %v1380_v5  ;;  %v1393_v60 = vld [vmem:[#allocation11 + $0x7d8] sm:$0xff] }
 0x3cd   : > { %1601 = vmatpush.msrb.mxu0 %v1168_v6  ;;  %1620 = vmatpush.msrb.mxu1 %v1248_v7  ;;  %v1181_v62 = vld [vmem:[#allocation11 + $0x138] sm:$0xff] }
 0x3ce   : > { %1647 = vmatpush.msrb.mxu2 %v1296_v8  ;;  %1666 = vmatpush.msrb.mxu3 %v1376_v9  ;;  %v1261_v4 = vld [vmem:[#allocation11 + $0x3b8] sm:$0xff] }
 0x3cf   : > { %1602 = vmatpush.msrb.mxu0 %v1164_v0  ;;  %1621 = vmatpush.msrb.mxu1 %v1244_v10  ;;  %v1309_v5 = vld [vmem:[#allocation11 + $0x538] sm:$0xff] }
 0x3d0   : > { %1648 = vmatpush.msrb.mxu2 %v1292_v11  ;;  %1667 = vmatpush.msrb.mxu3 %v1372_v12  ;;  %v1389_v6 = vld [vmem:[#allocation11 + $0x7b8] sm:$0xff] }
 0x3d1   : > { %1603 = vmatpush.msrb.mxu0 %v1160_v61  ;;  %1622 = vmatpush.msrb.mxu1 %v1240_v14  ;;  %v1177_v7 = vld [vmem:[#allocation11 + $0x118] sm:$0xff] }
 0x3d2   : > { %1649 = vmatpush.msrb.mxu2 %v1288_v15  ;;  %1668 = vmatpush.msrb.mxu3 %v1368_v16  ;;  %v1257_v8 = vld [vmem:[#allocation11 + $0x398] sm:$0xff] }
 0x3d3   : > { %1519 = vmatmul.f32.gmra.mxu0 %v3795_v28  ;;  %1539 = vmatmul.f32.vlgmr.msra.gmra.mxu1 %v3817_v37  ;;  %v1305_v9 = vld [vmem:[#allocation11 + $0x518] sm:$0xff] }
 0x3d4   : > { %1565 = vmatmul.f32.gmra.mxu2 %v3798_v13  ;;  %1585 = vmatmul.f32.vlgmr.msra.gmra.mxu3 %v3820_v38  ;;  %v1385_v0 = vld [vmem:[#allocation11 + $0x798] sm:$0xff] }
 0x3d5   : > { %1604 = vmatpush.msrb.mxu0 %v1156_v17  ;;  %1623 = vmatpush.msrb.mxu1 %v1236_v18  ;;  %v1173_v10 = vld [vmem:[#allocation11 + $0xf8] sm:$0xff] }
 0x3d6   : > { %1650 = vmatpush.msrb.mxu2 %v1284_v20  ;;  %1669 = vmatpush.msrb.mxu3 %v1364_v21  ;;  %v1253_v11 = vld [vmem:[#allocation11 + $0x378] sm:$0xff] }
 0x3d7   : > { %1605 = vmatpush.msrb.mxu0 %v1152_v22  ;;  %1624 = vmatpush.msrb.mxu1 %v1232_v23  ;;  %v1301_v12 = vld [vmem:[#allocation11 + $0x4f8] sm:$0xff] }
 0x3d8   : > { %1651 = vmatpush.msrb.mxu2 %v1280_v24  ;;  %1670 = vmatpush.msrb.mxu3 %v1360_v25  ;;  %v1381_v61 = vld [vmem:[#allocation11 + $0x778] sm:$0xff] }
 0x3d9   : > { %1606 = vmatpush.msrb.mxu0 %v1148_v26  ;;  %1625 = vmatpush.msrb.mxu1 %v1228_v19  ;;  %v1169_v14 = vld [vmem:[#allocation11 + $0xd8] sm:$0xff] }
 0x3da   : > { %1652 = vmatpush.msrb.mxu2 %v1276_v29  ;;  %1671 = vmatpush.msrb.mxu3 %v1356_v30  ;;  %v1249_v15 = vld [vmem:[#allocation11 + $0x358] sm:$0xff] }
 0x3db   : > { %1607 = vmatpush.msrb.mxu0 %v1144_v31  ;;  %1626 = vmatpush.msrb.mxu1 %v1224_v32  ;;  %v1297_v16 = vld [vmem:[#allocation11 + $0x4d8] sm:$0xff] }
 0x3dc   : > { %1653 = vmatpush.msrb.mxu2 %v1272_v41  ;;  %1672 = vmatpush.msrb.mxu3 %v1352_v43  ;;  %v1377_v17 = vld [vmem:[#allocation11 + $0x758] sm:$0xff] }
 0x3dd   : > { %1684 = vmatpush.msra.mxu0 %v1205_v55  ;;  %1542 = vmatmul.f32.gmra.mxu1 %v3823_v39  ;;  %v1165_v18 = vld [vmem:[#allocation11 + $0xb8] sm:$0xff] }
 0x3de   : > { %1730 = vmatpush.msra.mxu2 %v1333_v57  ;;  %1588 = vmatmul.f32.gmra.mxu3 %v3826_v40  ;;  %v1245_v20 = vld [vmem:[#allocation11 + $0x338] sm:$0xff] }
 0x3df   : > { %1608 = vmatmul.f32.vlgmr.msrb.gmra.mxu0 %v3789_v2  ;;  %1627 = vmatpush.msrb.mxu1 %v1220_v3  ;;  %v1293_v21 = vld [vmem:[#allocation11 + $0x4b8] sm:$0xff] }
 0x3e0   : > { %1654 = vmatmul.f32.vlgmr.msrb.gmra.mxu2 %v3792_v27  ;;  %1673 = vmatpush.msrb.mxu3 %v1348_v34  ;;  %v1373_v22 = vld [vmem:[#allocation11 + $0x738] sm:$0xff] }
 0x3e1   : > { %1685 = vmatpush.msra.mxu0 %v1201_v35  ;;  %1731 = vmatpush.msra.mxu2 %v1329_v36  ;;  %v1161_v23 = vld [vmem:[#allocation11 + $0x98] sm:$0xff] }
 0x3e2   : > { %1628 = vmatpush.msrb.mxu1 %v1216_v33  ;;  %1674 = vmatpush.msrb.mxu3 %v1344_v1  ;;  %v1241_v24 = vld [vmem:[#allocation11 + $0x318] sm:$0xff] }
 0x3e3   : > { %1686 = vmatpush.msra.mxu0 %v1197_v45  ;;  %1732 = vmatpush.msra.mxu2 %v1325_v42  ;;  %v1289_v25 = vld [vmem:[#allocation11 + $0x498] sm:$0xff] }
 0x3e4   : > { %1629 = vmatpush.msrb.mxu1 %v1212_v46  ;;  %1675 = vmatpush.msrb.mxu3 %v1340_v44  ;;  %v1369_v26 = vld [vmem:[#allocation11 + $0x718] sm:$0xff] }
 0x3e5   : > { %1687 = vmatpush.msra.mxu0 %v1193_v56  ;;  %1733 = vmatpush.msra.mxu2 %v1321_v58  ;;  %v1157_v19 = vld [vmem:[#allocation11 + $0x78] sm:$0xff] }
 0x3e6   : > { %1630 = vmatpush.msrb.mxu1 %v1208_v47  ;;  %1676 = vmatpush.msrb.mxu3 %v1336_v48  ;;  %v1237_v29 = vld [vmem:[#allocation11 + $0x2f8] sm:$0xff] }
 0x3e7   : > { %1688 = vmatpush.msra.mxu0 %v1189_v49  ;;  %1734 = vmatpush.msra.mxu2 %v1317_v51  ;;  %v1285_v30 = vld [vmem:[#allocation11 + $0x478] sm:$0xff] }
 0x3e8   : > { %1707 = vmatpush.msra.mxu1 %v1269_v50  ;;  %1753 = vmatpush.msra.mxu3 %v1397_v52  ;;  %v1365_v31 = vld [vmem:[#allocation11 + $0x6f8] sm:$0xff] }
 0x3e9   : > { %1611 = vmatmul.f32.gmra.mxu0 %v3795_v28  ;;  %1631 = vmatmul.f32.vlgmr.msrb.gmra.mxu1 %v3817_v37  ;;  %v1153_v32 = vld [vmem:[#allocation11 + $0x58] sm:$0xff] }
 0x3ea   : > { %1657 = vmatmul.f32.gmra.mxu2 %v3798_v13  ;;  %1677 = vmatmul.f32.vlgmr.msrb.gmra.mxu3 %v3820_v38  ;;  %v1233_v41 = vld [vmem:[#allocation11 + $0x2d8] sm:$0xff] }
 0x3eb   : > { %1689 = vmatpush.msra.mxu0 %v1185_v53  ;;  %1708 = vmatpush.msra.mxu1 %v1265_v54  ;;  %v1281_v43 = vld [vmem:[#allocation11 + $0x458] sm:$0xff] }
 0x3ec   : > { %1735 = vmatpush.msra.mxu2 %v1313_v59  ;;  %1754 = vmatpush.msra.mxu3 %v1393_v60  ;;  %v1361_v55 = vld [vmem:[#allocation11 + $0x6d8] sm:$0xff] }
 0x3ed   : > { %1690 = vmatpush.msra.mxu0 %v1181_v62  ;;  %1709 = vmatpush.msra.mxu1 %v1261_v4  ;;  %v1149_v57 = vld [vmem:[#allocation11 + $0x38] sm:$0xff] }
 0x3ee   : > { %1736 = vmatpush.msra.mxu2 %v1309_v5  ;;  %1755 = vmatpush.msra.mxu3 %v1389_v6  ;;  %v1229_v3 = vld [vmem:[#allocation11 + $0x2b8] sm:$0xff] }
 0x3ef   : > { %1691 = vmatpush.msra.mxu0 %v1177_v7  ;;  %1710 = vmatpush.msra.mxu1 %v1257_v8  ;;  %v1277_v34 = vld [vmem:[#allocation11 + $0x438] sm:$0xff] }
 0x3f0   : > { %1737 = vmatpush.msra.mxu2 %v1305_v9  ;;  %1756 = vmatpush.msra.mxu3 %v1385_v0  ;;  %v1357_v35 = vld [vmem:[#allocation11 + $0x6b8] sm:$0xff] }
 0x3f1   : > { %1692 = vmatpush.msra.mxu0 %v1173_v10  ;;  %1711 = vmatpush.msra.mxu1 %v1253_v11  ;;  %v1145_v36 = vld [vmem:[#allocation11 + $0x18] sm:$0xff] }
 0x3f2   : > { %1738 = vmatpush.msra.mxu2 %v1301_v12  ;;  %1757 = vmatpush.msra.mxu3 %v1381_v61  ;;  %v1225_v33 = vld [vmem:[#allocation11 + $0x298] sm:$0xff] }
 0x3f3   : > { %1634 = vmatmul.f32.gmra.mxu1 %v3823_v39  ;;  %1680 = vmatmul.f32.gmra.mxu3 %v3826_v40  ;;  %v1273_v1 = vld [vmem:[#allocation11 + $0x418] sm:$0xff] }
 0x3f4   : > { %1693 = vmatpush.msra.mxu0 %v1169_v14  ;;  %1712 = vmatpush.msra.mxu1 %v1249_v15  ;;  %v1353_v45 = vld [vmem:[#allocation11 + $0x698] sm:$0xff] }
 0x3f5   : > { %1739 = vmatpush.msra.mxu2 %v1297_v16  ;;  %1758 = vmatpush.msra.mxu3 %v1377_v17  ;;  %v1221_v42 = vld [vmem:[#allocation11 + $0x278] sm:$0xff] }
 0x3f6   : > { %1694 = vmatpush.msra.mxu0 %v1165_v18  ;;  %1713 = vmatpush.msra.mxu1 %v1245_v20  ;;  %v1349_v46 = vld [vmem:[#allocation11 + $0x678] sm:$0xff] }
 0x3f7   : > { %1740 = vmatpush.msra.mxu2 %v1293_v21  ;;  %1759 = vmatpush.msra.mxu3 %v1373_v22  ;;  %v1217_v44 = vld [vmem:[#allocation11 + $0x258] sm:$0xff] }
 0x3f8   : > { %1695 = vmatpush.msra.mxu0 %v1161_v23  ;;  %1714 = vmatpush.msra.mxu1 %v1241_v24  ;;  %v1345_v56 = vld [vmem:[#allocation11 + $0x658] sm:$0xff] }
 0x3f9   : > { %1741 = vmatpush.msra.mxu2 %v1289_v25  ;;  %1760 = vmatpush.msra.mxu3 %v1369_v26  ;;  %v1213_v58 = vld [vmem:[#allocation11 + $0x238] sm:$0xff] }
 0x3fa   : > { %1696 = vmatpush.msra.mxu0 %v1157_v19  ;;  %1715 = vmatpush.msra.mxu1 %v1237_v29  ;;  %v1341_v47 = vld [vmem:[#allocation11 + $0x638] sm:$0xff] }
 0x3fb   : > { %1742 = vmatpush.msra.mxu2 %v1285_v30  ;;  %1761 = vmatpush.msra.mxu3 %v1365_v31  ;;  %v1209_v48 = vld [vmem:[#allocation11 + $0x218] sm:$0xff] }
 0x3fc   : > { %1697 = vmatpush.msra.mxu0 %v1153_v32  ;;  %1716 = vmatpush.msra.mxu1 %v1233_v41  ;;  %v1337_v49 = vld [vmem:[#allocation11 + $0x618] sm:$0xff] }
 0x3fd   : > { %1743 = vmatpush.msra.mxu2 %v1281_v43  ;;  %1762 = vmatpush.msra.mxu3 %v1361_v55 }
 0x3fe   : > { %1698 = vmatpush.msra.mxu0 %v1149_v57  ;;  %1717 = vmatpush.msra.mxu1 %v1229_v3 }
 0x3ff   : > { %1744 = vmatpush.msra.mxu2 %v1277_v34  ;;  %1763 = vmatpush.msra.mxu3 %v1357_v35 }
 0x400   : > { %1699 = vmatpush.msra.mxu0 %v1145_v36  ;;  %1718 = vmatpush.msra.mxu1 %v1225_v33 }
 0x401   : > { %1745 = vmatpush.msra.mxu2 %v1273_v1  ;;  %1764 = vmatpush.msra.mxu3 %v1353_v45 }
 0x402   : > { %1700 = vmatmul.f32.vlgmr.msra.gmra.mxu0 %v3789_v2  ;;  %1746 = vmatmul.f32.vlgmr.msra.gmra.mxu2 %v3792_v27 }
 0x403   : > { %1719 = vmatpush.msra.mxu1 %v1221_v42  ;;  %1765 = vmatpush.msra.mxu3 %v1349_v46 }
 0x405   : > { %1720 = vmatpush.msra.mxu1 %v1217_v44  ;;  %1766 = vmatpush.msra.mxu3 %v1345_v56 }
 0x407   : > { %1721 = vmatpush.msra.mxu1 %v1213_v58  ;;  %1767 = vmatpush.msra.mxu3 %v1341_v47 }
 0x409   : > { %1722 = vmatpush.msra.mxu1 %v1209_v48  ;;  %1768 = vmatpush.msra.mxu3 %v1337_v49 }
 0x40a   : > { %1703 = vmatmul.f32.gmra.mxu0 %v3795_v28  ;;  %1723 = vmatmul.f32.vlgmr.msra.gmra.mxu1 %v3817_v37 }
 0x40b   : > { %1749 = vmatmul.f32.gmra.mxu2 %v3798_v13  ;;  %1769 = vmatmul.f32.vlgmr.msra.gmra.mxu3 %v3820_v38 }
 0x412   : > { %1726 = vmatmul.f32.gmra.mxu1 %v3823_v39 }
 0x413   : > { %1772 = vmatmul.f32.gmra.mxu3 %v3826_v40  ;;  %v1398_v40 = vld [vmem:[%s4531_s9] sm:$0xf] }
 0x414   : > { %v1401_v9 = vperm.slane %v1398_v40, 1  ;;  %v1402_v11 = vperm.slane %v1398_v40, 2  ;;  %v1400_v61 = vperm.slane %v1398_v40, 0  ;;  %v1403_v21 = vperm.slane %v1398_v40, 3 }
 0x434   : > { %v1425_v2 = vpop.f32.mrf.mxu0 }
 0x435   : > { %v1426_v22 = vadd.f32 %v1425_v2, %v1400_v61 }
 0x43a   : > { %v1471_v50 = vpop.f32.mrf.mxu2 }
 0x43c   : > { %v1448_v27 = vpop.f32.mrf.mxu1  ;;  %v1428_v51 = vpop.f32.mrf.mxu0 }
 0x43d   : > { %v1429_v25 = vadd.f32 %v1428_v51, %v1400_v61  ;;  %v1449_v26 = vadd.f32 %v1448_v27, %v1426_v22 }
 0x43f   : > { %v1472_v35 = vadd.f32 %v1471_v50, %v1449_v26 }
 0x443   : > { %v1494_v52 = vpop.f32.mrf.mxu3  ;;  %v1474_v54 = vpop.f32.mrf.mxu2 }
 0x444   : > { %v1495_v42 = vadd.f32 %v1494_v52, %v1472_v35 }
 0x446   : > { %v1451_v53 = vpop.f32.mrf.mxu1 }
 0x447   : > { %v1517_v59 = vpop.f32.mrf.mxu0  ;;  %v1452_v41 = vadd.f32 %v1451_v53, %v1429_v25 }
 0x448   : > { %v1518_v10 = vadd.f32 %v1517_v59, %v1401_v9  ;;  %v1776_v59 = vmax.f32 %v1495_v42, 0.0 }
 0x449   : > { %v1475_v46 = vadd.f32 %v1474_v54, %v1452_v41 }
 0x44c   : > { %v1497_v60 = vpop.f32.mrf.mxu3 }
 0x44d   : > { %v1563_v62 = vpop.f32.mrf.mxu2  ;;  %v1498_v58 = vadd.f32 %v1497_v60, %v1475_v46 }
 0x450   : > { %v1540_v28 = vpop.f32.mrf.mxu1  ;;  %v1520_v37 = vpop.f32.mrf.mxu0 }
 0x451   : > { %v1521_v14 = vadd.f32 %v1520_v37, %v1401_v9  ;;  %v1541_v15 = vadd.f32 %v1540_v28, %v1518_v10 }
 0x453   : > { %v1564_v23 = vadd.f32 %v1563_v62, %v1541_v15 }
 0x457   : > { %v1586_v4 = vpop.f32.mrf.mxu3  ;;  %v1566_v5 = vpop.f32.mrf.mxu2 }
 0x458   : > { %v1587_v19 = vadd.f32 %v1586_v4, %v1564_v23  ;;  %v1780_v4 = vmax.f32 %v1498_v58, 0.0 }
 0x45a   : > { %v1543_v13 = vpop.f32.mrf.mxu1  ;;  %v1777_v36 = vmax.f32 %v1587_v19, 0.0 }
 0x45b   : > { %v1544_v18 = vadd.f32 %v1543_v13, %v1521_v14 }
 0x45c   : > { %v1609_v38 = vpop.f32.mrf.mxu0  ;;  %v1792_v47 = vrot.slane %v1777_v36, 6 }
 0x45d   : > { %v1610_v20 = vadd.f32 %v1609_v38, %v1402_v11  ;;  %v1567_v29 = vadd.f32 %v1566_v5, %v1544_v18 }
 0x45e   : > { %v1798_v52 = vsel %vm585_vm4, %v1776_v59, %v1792_v47  ;;  %v1804_v54 = vsel %vm1803_vm3, %v1776_v59, %v1792_v47  ;;  %v1809_v60 = vsel %vm1799_vm2, %v1776_v59, %v1792_v47 }
 0x461   : > { %v1589_v6 = vpop.f32.mrf.mxu3 }
 0x462   : > { %v1590_v43 = vadd.f32 %v1589_v6, %v1567_v29  ;;  %v1813_v6 = vsel %vm634_vm7, %v1792_v47, %v1776_v59 }
 0x463   : > { %v1655_v7 = vpop.f32.mrf.mxu2 }
 0x464   : > { %v1781_v44 = vmax.f32 %v1590_v43, 0.0 }
 0x466   : > { %v1632_v39 = vpop.f32.mrf.mxu1  ;;  %v1612_v8 = vpop.f32.mrf.mxu0  ;;  %v1795_v50 = vrot.slane %v1781_v44, 6 }
 0x467   : > { %v1633_v24 = vadd.f32 %v1632_v39, %v1610_v20  ;;  %v1613_v55 = vadd.f32 %v1612_v8, %v1402_v11 }
 0x468   : > { %v1817_v39 = vsel %vm585_vm4, %v1780_v4, %v1795_v50  ;;  %v1824_v22 = vsel %vm1799_vm2, %v1780_v4, %v1795_v50  ;;  %v1828_v23 = vsel %vm634_vm7, %v1795_v50, %v1780_v4 }
 0x469   : > { %v1656_v57 = vadd.f32 %v1655_v7, %v1633_v24 }
 0x46d   : > { %v1678_v0 = vpop.f32.mrf.mxu3  ;;  %v1658_v16 = vpop.f32.mrf.mxu2 }
 0x46e   : > { %v1679_v1 = vadd.f32 %v1678_v0, %v1656_v57 }
 0x470   : > { %v1635_v12 = vpop.f32.mrf.mxu1  ;;  %v1778_v27 = vmax.f32 %v1679_v1, 0.0 }
 0x471   : > { %v1636_v33 = vadd.f32 %v1635_v12, %v1613_v55 }
 0x472   : > { %v1793_v13 = vrot.slane %v1778_v27, 4 }
 0x473   : > { %v1659_v48 = vadd.f32 %v1658_v16, %v1636_v33 }
 0x476   : > { %v1681_v30 = vpop.f32.mrf.mxu3 }
 0x477   : > { %v1682_v28 = vadd.f32 %v1681_v30, %v1659_v48 }
 0x479   : > { %v1782_v7 = vmax.f32 %v1682_v28, 0.0 }
 0x47b   : > { %v1796_v30 = vrot.slane %v1782_v7, 4 }
 0x47f   : > { %v1701_v17 = vpop.f32.mrf.mxu0 }
 0x480   : > { %v1702_v31 = vadd.f32 %v1701_v17, %v1403_v21 }
 0x485   : > { %v1747_v3 = vpop.f32.mrf.mxu2 }
 0x487   : > { %v1724_v32 = vpop.f32.mrf.mxu1  ;;  %v1704_v45 = vpop.f32.mrf.mxu0 }
 0x488   : > { %v1725_v34 = vadd.f32 %v1724_v32, %v1702_v31  ;;  %v1705_v49 = vadd.f32 %v1704_v45, %v1403_v21  ;;  %v1820_v21 = vsel %vm1803_vm3, %v1780_v4, %v1795_v50 }
 0x48a   : > { %v1748_v56 = vadd.f32 %v1747_v3, %v1725_v34 }
 0x48e   : > { %v1770_v2 = vpop.f32.mrf.mxu3  ;;  %v1750_v5 = vpop.f32.mrf.mxu2 }
 0x48f   : > { %v1771_v51 = vadd.f32 %v1770_v2, %v1748_v56  ;;  %v1727_v53 = vpop.f32.mrf.mxu1 }
 0x490   : > { %v1728_v62 = vadd.f32 %v1727_v53, %v1705_v49 }
 0x491   : > { %v1779_v37 = vmax.f32 %v1771_v51, 0.0 }
 0x492   : > { %v1751_v40 = vadd.f32 %v1750_v5, %v1728_v62 }
 0x493   : > { %v1794_v38 = vrot.slane %v1779_v37, 2 }
 0x495   : > { %v1800_v8 = vsel %vm1799_vm2, %v1793_v13, %v1794_v38  ;;  %v1805_v9 = vsel %vm634_vm7, %v1794_v38, %v1793_v13  ;;  %v1810_v0 = vsel %vm585_vm4, %v1793_v13, %v1794_v38  ;;  %v1814_v10 = vsel %vm1803_vm3, %v1793_v13, %v1794_v38 }
 0x496   : > { %v1802_v11 = vsel %vm1801_vm5, %v1798_v52, %v1800_v8  ;;  %v1807_v12 = vsel %vm1806_vm6, %v1804_v54, %v1805_v9  ;;  %v1811_v61 = vsel %vm1801_vm5, %v1810_v0, %v1809_v60  ;;  %v1815_v14 = vsel %vm1806_vm6, %v1814_v10, %v1813_v6  ;;  %v1773_v15 = vpop.f32.mrf.mxu3 }
 0x497   : > { %v1808_v16 = vrot.slane %v1807_v12, 2  ;;  %v1812_v17 = vrot.slane %v1811_v61, 4  ;;  %v1816_v18 = vrot.slane %v1815_v14, 6  ;;  %v2958_v20 = vrot.slane %v1802_v11, 9 }
 0x498   : > { %v1774_v24 = vadd.f32 %v1773_v15, %v1751_v40 }
 0x499   : > { %v3885_v25 = vmax.f32 %v1802_v11, %v2958_v20  ;;  %v2959_v26 = vrot.slane %v1808_v16, 9  ;;  %v2961_v19 = vrot.slane %v1816_v18, 9  ;;  %v2960_v29 = vrot.slane %v1812_v17, 9 }
 0x49a   : > { %v1783_v31 = vmax.f32 %v1774_v24, 0.0 }
 0x49b   : > { %1888 = vrot.lane.b32.xlu0 %v3885_v25, %s3423_s16  ;;  %v3889_v32 = vmax.f32 %v1808_v16, %v2959_v26  ;;  %v3891_v41 = vmax.f32 %v1816_v18, %v2961_v19  ;;  %v3893_v43 = vmax.f32 %v1812_v17, %v2960_v29  ;;  %v1880_v57 = vrot.slane %v3885_v25, 2 }
 0x49c   : > { %v1797_v55 = vrot.slane %v1783_v31, 2  ;;  %v1912_v3 = vrot.slane %v3885_v25, 4  ;;  %v1928_v16 = vrot.slane %v3885_v25, 6 }
 0x49d   : > { %1890 = vrot.lane.b32.xlu2 %v3889_v32, %s3423_s16  ;;  %v1948_v34 = vrot.slane %v3889_v32, 7  ;;  %v1959_v35 = vrot.slane %v3891_v41, 7  ;;  %v1882_v36 = vrot.slane %v3893_v43, 2  ;;  %v1883_v33 = vrot.slane %v3891_v41, 2 }
 0x49e   : > { %v1818_v1 = vsel %vm1799_vm2, %v1796_v30, %v1797_v55  ;;  %v1821_v45 = vsel %vm634_vm7, %v1797_v55, %v1796_v30  ;;  %v1825_v42 = vsel %vm585_vm4, %v1796_v30, %v1797_v55  ;;  %v1829_v46 = vsel %vm1803_vm3, %v1796_v30, %v1797_v55 }
 0x49f   : > { %v1819_v44 = vsel %vm1801_vm5, %v1817_v39, %v1818_v1  ;;  %v1822_v56 = vsel %vm1806_vm6, %v1820_v21, %v1821_v45  ;;  %v1826_v58 = vsel %vm1801_vm5, %v1825_v42, %v1824_v22  ;;  %v1830_v47 = vsel %vm1806_vm6, %v1829_v46, %v1828_v23 }
 0x4a0   : > { %v1823_v48 = vrot.slane %v1822_v56, 2  ;;  %v1827_v49 = vrot.slane %v1826_v58, 4  ;;  %v1831_v2 = vrot.slane %v1830_v47, 6  ;;  %v2962_v27 = vrot.slane %v1819_v44, 9 }
 0x4a1   : > { %v1950_v51 = vsel %vm1949_vm10, %v1948_v34, %v3885_v25  ;;  %v1960_v53 = vsel %vm1949_vm10, %v1959_v35, %v3893_v43  ;;  %v2015_v59 = vrot.slane %v1883_v33, 7  ;;  %v1881_v50 = vrot.slane %v3889_v32, 2 }
 0x4a2   : > { %v2963_v28 = vrot.slane %v1823_v48, 9  ;;  %v2965_v62 = vrot.slane %v1831_v2, 9  ;;  %v2964_v37 = vrot.slane %v1827_v49, 9  ;;  %v3916_v4 = vmax.f32 %v1819_v44, %v2962_v27 }
 0x4a3   : > { %1894 = vrot.lane.b32.xlu0 %v3891_v41, %s3423_s16  ;;  %v1952_v52 = vsel %vm1951_vm11, %v1948_v34, %v1950_v51  ;;  %v1961_v54 = vsel %vm1951_vm11, %v1959_v35, %v1960_v53  ;;  %v2016_v60 = vsel %vm1949_vm10, %v2015_v59, %v1882_v36  ;;  %v2008_v13 = vrot.slane %v1881_v50, 7 }
 0x4a4   : > { %v3923_v5 = vmax.f32 %v1823_v48, %v2963_v28  ;;  %v3925_v38 = vmax.f32 %v1831_v2, %v2965_v62  ;;  %v3927_v6 = vmax.f32 %v1827_v49, %v2964_v37  ;;  %v1954_v39 = vsel %vm1953_vm12, %v1948_v34, %v1952_v52 }
 0x4a5   : > { %v3931_v7 = vsel %vm1955_vm13, %v1948_v34, %v1954_v39  ;;  %v1962_v40 = vsel %vm1953_vm12, %v1959_v35, %v1961_v54  ;;  %v2017_v8 = vsel %vm1951_vm11, %v2015_v59, %v2016_v60  ;;  %v2009_v9 = vsel %vm1949_vm10, %v2008_v13, %v1880_v57 }
 0x4a6   : > { %1898 = vrot.lane.b32.xlu1 %v3923_v5, %s3423_s16  ;;  %1902 = vrot.lane.b32.xlu2 %v3925_v38, %s3423_s16  ;;  %v3941_v0 = vsel %vm1955_vm13, %v1959_v35, %v1962_v40  ;;  %v2018_v10 = vsel %vm1953_vm12, %v2015_v59, %v2017_v8  ;;  %v2010_v11 = vsel %vm1951_vm11, %v2008_v13, %v2009_v9  ;;  %v1973_v12 = vrot.slane %v3925_v38, 7 }
 0x4a7   : > { %v3947_v61 = vsel %vm1955_vm13, %v2015_v59, %v2018_v10  ;;  %v2011_v14 = vsel %vm1953_vm12, %v2008_v13, %v2010_v11  ;;  %v1966_v15 = vrot.slane %v3923_v5, 7  ;;  %v1885_v20 = vrot.slane %v3923_v5, 2 }
 0x4a8   : > { %v3953_v17 = vsel %vm1955_vm13, %v2008_v13, %v2011_v14  ;;  %v1974_v18 = vsel %vm1949_vm10, %v1973_v12, %v3927_v6  ;;  %v1913_v21 = vrot.slane %v3889_v32, 4  ;;  %v1884_v24 = vrot.slane %v3916_v4, 2 }
 0x4a9   : > { %v1975_v22 = vsel %vm1951_vm11, %v1973_v12, %v1974_v18  ;;  %v1967_v23 = vsel %vm1949_vm10, %v1966_v15, %v3916_v4  ;;  %v1887_v26 = vrot.slane %v3925_v38, 2  ;;  %v2022_v30 = vrot.slane %v1885_v20, 7 }
 0x4aa   : > { %v1976_v19 = vsel %vm1953_vm12, %v1973_v12, %v1975_v22  ;;  %v1968_v29 = vsel %vm1951_vm11, %v1966_v15, %v1967_v23  ;;  %v2064_v31 = vrot.slane %v1913_v21, 7  ;;  %v1886_v34 = vrot.slane %v3927_v6, 2 }
 0x4ab   : > { %1900 = vrot.lane.b32.xlu0 %v3927_v6, %s3423_s16  ;;  %v3969_v55 = vsel %vm1955_vm13, %v1973_v12, %v1976_v19  ;;  %v1969_v57 = vsel %vm1953_vm12, %v1966_v15, %v1968_v29  ;;  %v2029_v35 = vrot.slane %v1887_v26, 7  ;;  %v2023_v33 = vsel %vm1949_vm10, %v2022_v30, %v1884_v24 }
 0x4ac   : > { %v3974_v36 = vsel %vm1955_vm13, %v1966_v15, %v1969_v57  ;;  %v2065_v1 = vsel %vm1949_vm10, %v2064_v31, %v1912_v3  ;;  %v1915_v45 = vrot.slane %v3891_v41, 4  ;;  %v2024_v42 = vsel %vm1951_vm11, %v2022_v30, %v2023_v33 }
 0x4ad   : > { %v2066_v46 = vsel %vm1951_vm11, %v2064_v31, %v2065_v1  ;;  %v2030_v44 = vsel %vm1949_vm10, %v2029_v35, %v1886_v34  ;;  %v1914_v56 = vrot.slane %v3893_v43, 4  ;;  %v2025_v58 = vsel %vm1953_vm12, %v2022_v30, %v2024_v42 }
 0x4ae   : > { %1892 = vrot.lane.b32.xlu1 %v3893_v43, %s3423_s16  ;;  %1896 = vrot.lane.b32.xlu2 %v3916_v4, %s3423_s16  ;;  %v2067_v3 = vsel %vm1953_vm12, %v2064_v31, %v2066_v46  ;;  %v2031_v47 = vsel %vm1951_vm11, %v2029_v35, %v2030_v44  ;;  %v2071_v48 = vrot.slane %v1915_v45, 7  ;;  %v3993_v49 = vsel %vm1955_vm13, %v2022_v30, %v2025_v58 }
 0x4af   : > { %v3996_v2 = vsel %vm1955_vm13, %v2064_v31, %v2067_v3  ;;  %v2032_v27 = vsel %vm1953_vm12, %v2029_v35, %v2031_v47  ;;  %v1917_v51 = vrot.slane %v3923_v5, 4  ;;  %v1916_v50 = vrot.slane %v3916_v4, 4 }
 0x4b0   : > { %v4001_v53 = vsel %vm1955_vm13, %v2029_v35, %v2032_v27  ;;  %v2072_v59 = vsel %vm1949_vm10, %v2071_v48, %v1914_v56  ;;  %v1919_v28 = vrot.slane %v3925_v38, 4  ;;  %v1918_v52 = vrot.slane %v3927_v6, 4 }
 0x4b1   : > { %v2073_v62 = vsel %vm1951_vm11, %v2071_v48, %v2072_v59  ;;  %v2078_v37 = vrot.slane %v1917_v51, 7  ;;  %v1931_v54 = vrot.slane %v3891_v41, 6  ;;  %v1930_v39 = vrot.slane %v3893_v43, 6 }
 0x4b2   : > { %v2074_v60 = vsel %vm1953_vm12, %v2071_v48, %v2073_v62  ;;  %v2085_v13 = vrot.slane %v1919_v28, 7  ;;  %v1929_v40 = vrot.slane %v3889_v32, 6  ;;  %v1933_v11 = vrot.slane %v3923_v5, 6 }
 0x4b3   : > { %v4013_v8 = vsel %vm1955_vm13, %v2071_v48, %v2074_v60  ;;  %v2079_v9 = vsel %vm1949_vm10, %v2078_v37, %v1916_v50  ;;  %v2127_v10 = vrot.slane %v1931_v54, 7  ;;  %v1932_v15 = vrot.slane %v3916_v4, 6 }
 0x4b4   : > { %v2080_v12 = vsel %vm1951_vm11, %v2078_v37, %v2079_v9  ;;  %v2086_v14 = vsel %vm1949_vm10, %v2085_v13, %v1918_v52  ;;  %v2120_v41 = vrot.slane %v1929_v40, 7  ;;  %v2134_v20 = vrot.slane %v1933_v11, 7 }
 0x4b5   : > { %v2081_v18 = vsel %vm1953_vm12, %v2078_v37, %v2080_v12  ;;  %v2087_v43 = vsel %vm1951_vm11, %v2085_v13, %v2086_v14  ;;  %v2128_v32 = vsel %vm1949_vm10, %v2127_v10, %v1930_v39  ;;  %v1935_v25 = vrot.slane %v3925_v38, 6 }
 0x4b6   : > { %v4024_v21 = vsel %vm1955_vm13, %v2078_v37, %v2081_v18  ;;  %v2088_v22 = vsel %vm1953_vm12, %v2085_v13, %v2087_v43  ;;  %v2129_v5 = vsel %vm1951_vm11, %v2127_v10, %v2128_v32  ;;  %v2121_v23 = vsel %vm1949_vm10, %v2120_v41, %v1928_v16 }
 0x4b7   : > { %v4032_v4 = vsel %vm1955_vm13, %v2085_v13, %v2088_v22  ;;  %v2130_v24 = vsel %vm1953_vm12, %v2127_v10, %v2129_v5  ;;  %v2122_v26 = vsel %vm1951_vm11, %v2120_v41, %v2121_v23  ;;  %v2135_v19 = vsel %vm1949_vm10, %v2134_v20, %v1932_v15 }
 0x4b8   : > { %v4038_v29 = vsel %vm1955_vm13, %v2127_v10, %v2130_v24  ;;  %v2123_v30 = vsel %vm1953_vm12, %v2120_v41, %v2122_v26  ;;  %v2136_v31 = vsel %vm1951_vm11, %v2134_v20, %v2135_v19  ;;  %v1934_v35 = vrot.slane %v3927_v6, 6 }
 0x4b9   : > { %v2124_v16 = vsel %vm1955_vm13, %v2120_v41, %v2123_v30  ;;  %v2137_v57 = vsel %vm1953_vm12, %v2134_v20, %v2136_v31  ;;  %v2141_v33 = vrot.slane %v1935_v25, 7 }
 0x4ba   : > { %v4046_v34 = vsel %vm1955_vm13, %v2134_v20, %v2137_v57 }
 0x4bb   : > { %v2142_v1 = vsel %vm1949_vm10, %v2141_v33, %v1934_v35 }
 0x4bc   : > { %v2143_v45 = vsel %vm1951_vm11, %v2141_v33, %v2142_v1 }
 0x4bd   : > { %v2144_v42 = vsel %vm1953_vm12, %v2141_v33, %v2143_v45 }
 0x4be   : > { %v4053_v46 = vsel %vm1955_vm13, %v2141_v33, %v2144_v42 }
 0x4f7   : > { %v1891_v38 = vpop.permute.xlu2 %1890 }
 0x4f8   : > { %v1937_v44 = vrot.slane %v1891_v38, 6  ;;  %v1980_v56 = vrot.slane %v1891_v38, 7  ;;  %v1905_v28 = vrot.slane %v1891_v38, 2  ;;  %v1921_v5 = vrot.slane %v1891_v38, 4 }
 0x4fa   : > { %v2148_v3 = vrot.slane %v1937_v44, 7  ;;  %v2036_v10 = vrot.slane %v1905_v28, 7  ;;  %v2092_v45 = vrot.slane %v1921_v5, 7 }
 0x500   : > { %v4065_v39 = vpop.permute.xlu2 %1902 }
 0x501   : > { %v2001_v23 = vrot.slane %v4065_v39, 7 }
 0x508   : > { %v4090_v20 = vpop.permute.xlu2 %1896 }
 0x50d   : > { %v1889_v58 = vpop.permute.xlu0 %1888 }
 0x50e   : > { %v1936_v47 = vrot.slane %v1889_v58, 6  ;;  %v1981_v48 = vsel %vm1949_vm10, %v1980_v56, %v1889_v58  ;;  %v1904_v54 = vrot.slane %v1889_v58, 2  ;;  %v1920_v35 = vrot.slane %v1889_v58, 4 }
 0x50f   : > { %v1982_v6 = vsel %vm1951_vm11, %v1980_v56, %v1981_v48  ;;  %v1940_v58 = vrot.slane %v4090_v20, 6 }
 0x510   : > { %v1983_v27 = vsel %vm1953_vm12, %v1980_v56, %v1982_v6  ;;  %v2149_v51 = vsel %vm1949_vm10, %v2148_v3, %v1936_v47  ;;  %v2037_v14 = vsel %vm1949_vm10, %v2036_v10, %v1904_v54 }
 0x511   : > { %v2150_v59 = vsel %vm1951_vm11, %v2148_v3, %v2149_v51  ;;  %v1984_v50 = vsel %vm1955_vm13, %v1980_v56, %v1983_v27  ;;  %v2038_v15 = vsel %vm1951_vm11, %v2036_v10, %v2037_v14 }
 0x512   : > { %v2151_v62 = vsel %vm1953_vm12, %v2148_v3, %v2150_v59  ;;  %v2206_v37 = vrot.slane %v1984_v50, 4  ;;  %v2039_v43 = vsel %vm1953_vm12, %v2036_v10, %v2038_v15  ;;  %v2093_v59 = vsel %vm1949_vm10, %v2092_v45, %v1920_v35 }
 0x513   : > { %v2152_v52 = vsel %vm1955_vm13, %v2148_v3, %v2151_v62  ;;  %v2040_v31 = vsel %vm1955_vm13, %v2036_v10, %v2039_v43  ;;  %v2094_v14 = vsel %vm1951_vm11, %v2092_v45, %v2093_v59 }
 0x514   : > { %v2207_v60 = vsel %vm885_vm8, %v2206_v37, %v3931_v7  ;;  %v2230_v13 = vrot.slane %v2152_v52, 4  ;;  %v2214_v44 = vrot.slane %v2040_v31, 4 }
 0x515   : > { %v4067_v40 = vpop.permute.xlu0 %1894  ;;  %v4070_v9 = vperm.slane %v2207_v60, %v3719_v63 }
 0x516   : > { %v4076_v12 = vsel %vm885_vm8, %v2230_v13, %v2124_v16  ;;  %v1907_v32 = vrot.slane %v4067_v40, 2  ;;  %v1987_v19 = vrot.slane %v4067_v40, 7  ;;  %v2215_v54 = vsel %vm885_vm8, %v2214_v44, %v3953_v17 }
 0x517   : > { %2366 = vrot.lane.b32.xlu2 %v4070_v9, %s3425_s19  ;;  %v2212_v11 = vrot.slane %v4070_v9, 4  ;;  %v4138_v5 = vperm.slane %v2215_v54, %v3719_v63 }
 0x518   : > { %v4079_v7 = vpop.permute.xlu1 %1898  ;;  %v2043_v25 = vrot.slane %v1907_v32, 7 }
 0x519   : > { %v4082_v41 = vsel %vm885_vm8, 0.0, %v2212_v11  ;;  %v1994_v18 = vrot.slane %v4079_v7, 7  ;;  %v1941_v30 = vrot.slane %v4079_v7, 6  ;;  %v1909_v50 = vrot.slane %v4079_v7, 2 }
 0x51a   : > { %2374 = vrot.lane.b32.xlu1 %v4082_v41, %s3425_s19  ;;  %v1911_v11 = vrot.slane %v4065_v39, 2 }
 0x51b   : > { %v1995_v24 = vsel %vm1949_vm10, %v1994_v18, %v4090_v20  ;;  %v2162_v56 = vrot.slane %v1941_v30, 7  ;;  %v2050_v32 = vrot.slane %v1909_v50, 7 }
 0x51c   : > { %v1996_v33 = vsel %vm1951_vm11, %v1994_v18, %v1995_v24 }
 0x51d   : > { %v4092_v22 = vpop.permute.xlu0 %1900  ;;  %v1997_v51 = vsel %vm1953_vm12, %v1994_v18, %v1996_v33  ;;  %v2163_v60 = vsel %vm1949_vm10, %v2162_v56, %v1940_v58 }
 0x51e   : > { %v2002_v16 = vsel %vm1949_vm10, %v2001_v23, %v4092_v22  ;;  %v1998_v10 = vsel %vm1955_vm13, %v1994_v18, %v1997_v51  ;;  %v2164_v18 = vsel %vm1951_vm11, %v2162_v56, %v2163_v60  ;;  %v1910_v24 = vrot.slane %v4092_v22, 2 }
 0x51f   : > { %v2003_v3 = vsel %vm1951_vm11, %v2001_v23, %v2002_v16  ;;  %v2270_v30 = vrot.slane %v1998_v10, 4  ;;  %v2095_v16 = vsel %vm1953_vm12, %v2092_v45, %v2094_v14  ;;  %v2165_v33 = vsel %vm1953_vm12, %v2162_v56, %v2164_v18 }
 0x520   : > { %v4097_v26 = vpop.permute.xlu1 %1892  ;;  %v2004_v37 = vsel %vm1953_vm12, %v2001_v23, %v2003_v3  ;;  %v2096_v3 = vsel %vm1955_vm13, %v2092_v45, %v2095_v16 }
 0x521   : > { %v1906_v57 = vrot.slane %v4097_v26, 2  ;;  %v1988_v1 = vsel %vm1949_vm10, %v1987_v19, %v4097_v26  ;;  %v2271_v44 = vsel %vm885_vm8, %v2270_v30, %v3974_v36  ;;  %v1922_v45 = vrot.slane %v4097_v26, 4 }
 0x522   : > { %v1989_v42 = vsel %vm1951_vm11, %v1987_v19, %v1988_v1  ;;  %v4176_v59 = vperm.slane %v2271_v44, %v3719_v63 }
 0x523   : > { %v2044_v38 = vsel %vm1949_vm10, %v2043_v25, %v1906_v57  ;;  %v1990_v47 = vsel %vm1953_vm12, %v1987_v19, %v1989_v42  ;;  %v2220_v42 = vrot.slane %v4138_v5, 4 }
 0x524   : > { %v2045_v48 = vsel %vm1951_vm11, %v2043_v25, %v2044_v38  ;;  %v1991_v27 = vsel %vm1955_vm13, %v1987_v19, %v1990_v47  ;;  %v1923_v47 = vrot.slane %v4067_v40, 4 }
 0x525   : > { %v2046_v6 = vsel %vm1953_vm12, %v2043_v25, %v2045_v48  ;;  %v2238_v28 = vrot.slane %v1991_v27, 4  ;;  %v4173_v51 = vsel %vm885_vm8, 0.0, %v2220_v42 }
 0x526   : > { %v2047_v62 = vsel %vm1955_vm13, %v2043_v25, %v2046_v6  ;;  %v2057_v25 = vrot.slane %v1911_v11, 7  ;;  %v2166_v6 = vsel %vm1955_vm13, %v2162_v56, %v2165_v33 }
 0x527   : > { %v2246_v52 = vrot.slane %v2047_v62, 4  ;;  %v2239_v13 = vsel %vm885_vm8, %v2238_v28, %v3941_v0  ;;  %v2005_v0 = vsel %vm1955_vm13, %v2001_v23, %v2004_v37  ;;  %v2294_v36 = vrot.slane %v2166_v6, 4 }
 0x528   : > { %v4130_v15 = vperm.slane %v2239_v13, %v3719_v63  ;;  %v2302_v23 = vrot.slane %v2005_v0, 4  ;;  %v2058_v38 = vsel %vm1949_vm10, %v2057_v25, %v1910_v24  ;;  %v2099_v28 = vrot.slane %v1923_v47, 7 }
 0x529   : > { %v2247_v43 = vsel %vm885_vm8, %v2246_v52, %v3947_v61  ;;  %v1908_v61 = vrot.slane %v4090_v20, 2  ;;  %v2059_v27 = vsel %vm1951_vm11, %v2057_v25, %v2058_v38  ;;  %v4187_v56 = vsel %vm885_vm8, %v2294_v36, %v4046_v34 }
 0x52a   : > { %v4135_v17 = vperm.slane %v2247_v43, %v3719_v63  ;;  %2382 = vrot.lane.b32.xlu0 %v4130_v15, %s3425_s19  ;;  %v2244_v19 = vrot.slane %v4130_v15, 4  ;;  %v2303_v48 = vsel %vm885_vm8, %v2302_v23, %v3969_v55  ;;  %v2060_v62 = vsel %vm1953_vm12, %v2057_v25, %v2059_v27 }
 0x52b   : > { %v2051_v35 = vsel %vm1949_vm10, %v2050_v32, %v1908_v61  ;;  %v4182_v55 = vperm.slane %v2303_v48, %v3719_v63  ;;  %v2222_v37 = vrot.slane %v2096_v3, 4  ;;  %v2276_v52 = vrot.slane %v4176_v59, 4 }
 0x52c   : > { %v2252_v31 = vrot.slane %v4135_v17, 4  ;;  %v4150_v57 = vsel %vm885_vm8, 0.0, %v2244_v19  ;;  %v2052_v58 = vsel %vm1951_vm11, %v2050_v32, %v2051_v35  ;;  %v2100_v54 = vsel %vm1949_vm10, %v2099_v28, %v1922_v45 }
 0x52d   : > { %2390 = vrot.lane.b32.xlu2 %v4150_v57, %s3425_s19  ;;  %v2053_v50 = vsel %vm1953_vm12, %v2050_v32, %v2052_v58  ;;  %v2061_v13 = vsel %vm1955_vm13, %v2057_v25, %v2060_v62  ;;  %v1925_v34 = vrot.slane %v4079_v7, 4  ;;  %v2223_v10 = vsel %vm885_vm8, %v2222_v37, %v3996_v2 }
 0x52e   : > { %v4157_v1 = vsel %vm885_vm8, 0.0, %v2252_v31  ;;  %v2054_v60 = vsel %vm1955_vm13, %v2050_v32, %v2053_v50  ;;  %v2101_v11 = vsel %vm1951_vm11, %v2099_v28, %v2100_v54  ;;  %v4203_v14 = vsel %vm885_vm8, 0.0, %v2276_v52 }
 0x52f   : > { %2392 = vrot.lane.b32.xlu1 %v4157_v1, %s3425_s19  ;;  %v2308_v43 = vrot.slane %v4182_v55, 4  ;;  %v2278_v0 = vrot.slane %v2054_v60, 4  ;;  %v2310_v18 = vrot.slane %v2061_v13, 4  ;;  %v1927_v32 = vrot.slane %v4065_v39, 4 }
 0x530   : > { %v2106_v24 = vrot.slane %v1925_v34, 7  ;;  %v2102_v7 = vsel %vm1953_vm12, %v2099_v28, %v2101_v11  ;;  %v4211_v19 = vperm.slane %v2223_v10, %v3719_v63  ;;  %v1926_v2 = vrot.slane %v4092_v22, 4 }
 0x531   : > { %v4217_v30 = vsel %vm885_vm8, 0.0, %v2308_v43  ;;  %v2279_v61 = vsel %vm885_vm8, %v2278_v0, %v3993_v49  ;;  %v1924_v31 = vrot.slane %v4090_v20, 4  ;;  %v2311_v25 = vsel %vm885_vm8, %v2310_v18, %v4001_v53 }
 0x532   : > { %2376 = vrot.lane.b32.xlu0 %v4173_v51, %s3425_s19  ;;  %v2113_v16 = vrot.slane %v1927_v32, 7  ;;  %v2103_v23 = vsel %vm1955_vm13, %v2099_v28, %v2102_v7  ;;  %v4229_v33 = vperm.slane %v2279_v61, %v3719_v63  ;;  %v2228_v42 = vrot.slane %v4211_v19, 4 }
 0x533   : > { %v2107_v35 = vsel %vm1949_vm10, %v2106_v24, %v1924_v31  ;;  %v4234_v20 = vperm.slane %v2311_v25, %v3719_v63  ;;  %v2254_v38 = vrot.slane %v2103_v23, 4  ;;  %v1939_v53 = vrot.slane %v4067_v40, 6 }
 0x534   : > { %v2114_v49 = vsel %vm1949_vm10, %v2113_v16, %v1926_v2  ;;  %v2108_v44 = vsel %vm1951_vm11, %v2106_v24, %v2107_v35  ;;  %v4242_v47 = vsel %vm885_vm8, 0.0, %v2228_v42  ;;  %v1938_v48 = vrot.slane %v4097_v26, 6 }
 0x535   : > { %2414 = vrot.lane.b32.xlu2 %v4182_v55, %s3425_s19  ;;  %v2115_v3 = vsel %vm1951_vm11, %v2113_v16, %v2114_v49  ;;  %v2316_v58 = vrot.slane %v4234_v20, 4  ;;  %v2255_v40 = vsel %vm885_vm8, %v2254_v38, %v4013_v8  ;;  %v2109_v6 = vsel %vm1953_vm12, %v2106_v24, %v2108_v44 }
 0x536   : > { %v2155_v27 = vrot.slane %v1939_v53, 7  ;;  %v2116_v36 = vsel %vm1953_vm12, %v2113_v16, %v2115_v3  ;;  %v2284_v45 = vrot.slane %v4229_v33, 4  ;;  %v4260_v28 = vperm.slane %v2255_v40, %v3719_v63 }
 0x537   : > { %2398 = vrot.lane.b32.xlu1 %v4176_v59, %s3425_s19  ;;  %v4257_v50 = vsel %vm885_vm8, 0.0, %v2316_v58  ;;  %v2110_v62 = vsel %vm1955_vm13, %v2106_v24, %v2109_v6  ;;  %v2117_v8 = vsel %vm1955_vm13, %v2113_v16, %v2116_v36  ;;  %v1943_v37 = vrot.slane %v4065_v39, 6 }
 0x538   : > { %v2156_v26 = vsel %vm1949_vm10, %v2155_v27, %v1938_v48  ;;  %v4269_v54 = vsel %vm885_vm8, 0.0, %v2284_v45  ;;  %v2286_v60 = vrot.slane %v2110_v62, 4  ;;  %v2260_v13 = vrot.slane %v4260_v28, 4 }
 0x539   : > { %v2157_v52 = vsel %vm1951_vm11, %v2155_v27, %v2156_v26  ;;  %v2318_v34 = vrot.slane %v2117_v8, 4  ;;  %v1942_v10 = vrot.slane %v4092_v22, 6  ;;  %v2169_v39 = vrot.slane %v1943_v37, 7 }
 0x53a   : > { %2406 = vrot.lane.b32.xlu0 %v4203_v14, %s3425_s19  ;;  %v2158_v11 = vsel %vm1953_vm12, %v2155_v27, %v2157_v52  ;;  %v2287_v43 = vsel %vm885_vm8, %v2286_v60, %v4024_v21  ;;  %v4281_v0 = vsel %vm885_vm8, 0.0, %v2260_v13  ;;  %v4329_v44 = vperm.slane %v4187_v56, %v3719_v63 }
 0x53b   : > { %v2319_v18 = vsel %vm885_vm8, %v2318_v34, %v4032_v4  ;;  %v2170_v32 = vsel %vm1949_vm10, %v2169_v39, %v1942_v10  ;;  %v2159_v22 = vsel %vm1955_vm13, %v2155_v27, %v2158_v11  ;;  %v4290_v24 = vperm.slane %v2287_v43, %v3719_v63 }
 0x53c   : > { %v4293_v7 = vperm.slane %v2319_v18, %v3719_v63  ;;  %v2171_v21 = vsel %vm1951_vm11, %v2169_v39, %v2170_v32  ;;  %v2262_v2 = vrot.slane %v2159_v22, 4  ;;  %v2300_v58 = vrot.slane %v4329_v44, 4 }
 0x53d   : > { %2384 = vrot.lane.b32.xlu2 %v4135_v17, %s3425_s19  ;;  %v2172_v4 = vsel %vm1953_vm12, %v2169_v39, %v2171_v21  ;;  %v2292_v31 = vrot.slane %v4290_v24, 4 }
 0x53e   : > { %v2324_v61 = vrot.slane %v4293_v7, 4  ;;  %v2263_v25 = vsel %vm885_vm8, %v2262_v2, %v4038_v29  ;;  %v2173_v16 = vsel %vm1955_vm13, %v2169_v39, %v2172_v4  ;;  %v4321_v29 = vperm.slane %v4076_v12, %v3719_v63 }
 0x53f   : > { %2422 = vrot.lane.b32.xlu1 %v4217_v30, %s3425_s19  ;;  %v4312_v35 = vperm.slane %v2263_v25, %v3719_v63  ;;  %v4317_v42 = vsel %vm885_vm8, 0.0, %v2292_v31  ;;  %v2326_v49 = vrot.slane %v2173_v16, 4  ;;  %v4350_v40 = vsel %vm885_vm8, 0.0, %v2300_v58 }
 0x540   : > { %v4309_v23 = vsel %vm885_vm8, 0.0, %v2324_v61  ;;  %v2236_v53 = vrot.slane %v4321_v29, 4 }
 0x541   : > { %v2268_v38 = vrot.slane %v4312_v35, 4  ;;  %v2327_v3 = vsel %vm885_vm8, %v2326_v49, %v4053_v46 }
 0x542   : > { %2400 = vrot.lane.b32.xlu0 %v4229_v33, %s3425_s19  ;;  %v4341_v48 = vsel %vm885_vm8, 0.0, %v2236_v53  ;;  %v4345_v56 = vperm.slane %v2327_v3, %v3719_v63 }
 0x543   : > { %v4336_v12 = vsel %vm885_vm8, 0.0, %v2268_v38 }
 0x544   : > { %v2332_v46 = vrot.slane %v4345_v56, 4 }
 0x545   : > { %2378 = vrot.lane.b32.xlu2 %v4242_v47, %s3425_s19 }
 0x546   : > { %v4358_v6 = vsel %vm885_vm8, 0.0, %v2332_v46 }
 0x547   : > { %2368 = vrot.lane.b32.xlu1 %v4138_v5, %s3425_s19 }
 0x54a   : > { %2424 = vrot.lane.b32.xlu0 %v4257_v50, %s3425_s19 }
 0x54d   : > { %2408 = vrot.lane.b32.xlu2 %v4269_v54, %s3425_s19 }
 0x54f   : > { %2416 = vrot.lane.b32.xlu1 %v4234_v20, %s3425_s19 }
 0x552   : > { %2394 = vrot.lane.b32.xlu0 %v4281_v0, %s3425_s19 }
 0x555   : > { %2402 = vrot.lane.b32.xlu2 %v4290_v24, %s3425_s19 }
 0x557   : > { %2386 = vrot.lane.b32.xlu1 %v4260_v28, %s3425_s19 }
 0x55a   : > { %2370 = vrot.lane.b32.xlu0 %v4211_v19, %s3425_s19 }
 0x55d   : > { %2426 = vrot.lane.b32.xlu2 %v4309_v23, %s3425_s19 }
 0x55f   : > { %2410 = vrot.lane.b32.xlu1 %v4317_v42, %s3425_s19 }
 0x562   : > { %2418 = vrot.lane.b32.xlu0 %v4293_v7, %s3425_s19 }
 0x565   : > { %2396 = vrot.lane.b32.xlu2 %v4336_v12, %s3425_s19 }
 0x567   : > { %2380 = vrot.lane.b32.xlu1 %v4341_v48, %s3425_s19 }
 0x56a   : > { %2412 = vrot.lane.b32.xlu0 %v4350_v40, %s3425_s19 }
 0x56d   : > { %2372 = vrot.lane.b32.xlu2 %v4321_v29, %s3425_s19 }
 0x56f   : > { %2428 = vrot.lane.b32.xlu1 %v4358_v6, %s3425_s19 }
 0x571   : > { %v2367_v27 = vpop.permute.xlu2 %2366 }
 0x572   : > { %2388 = vrot.lane.b32.xlu0 %v4312_v35, %s3425_s19  ;;  %v2462_v26 = vmax.f32 %v4070_v9, %v2367_v27 }
 0x575   : > { %2420 = vrot.lane.b32.xlu2 %v4345_v56, %s3425_s19 }
 0x577   : > { %2404 = vrot.lane.b32.xlu1 %v4329_v44, %s3425_s19 }
 0x587   : > { %v2391_v52 = vpop.permute.xlu2 %2390 }
 0x588   : > { %v2474_v60 = vmax.f32 %v4150_v57, %v2391_v52 }
 0x58a   : > { %v2502_v34 = vrot.slane %v2474_v60, 4 }
 0x58c   : > { %v2375_v36 = vpop.permute.xlu1 %2374 }
 0x58d   : > { %v2466_v45 = vmax.f32 %v4082_v41, %v2375_v36 }
 0x58f   : > { %v2494_v62 = vrot.slane %v2466_v45, 4  ;;  %v2415_v11 = vpop.permute.xlu2 %2414 }
 0x590   : > { %v2486_v16 = vmax.f32 %v4182_v55, %v2415_v11 }
 0x591   : > { %v2495_v8 = vsel %vm885_vm8, %v2494_v62, %v2462_v26 }
 0x592   : > { %v2499_v37 = vperm.slane %v2495_v8, %v3719_v63 }
 0x594   : > { %2626 = vst [vmem:[#allocation1] ss:$4 sm:$0xff] %v2499_v37  ;;  %v2500_v58 = vrot.slane %v2499_v37, 4 }
 0x596   : > { %v2501_v62 = vsel %vm885_vm8, 0.0, %v2500_v58 }
 0x597   : > { %v2385_v18 = vpop.permute.xlu2 %2384 }
 0x59c   : > { %v2383_v13 = vpop.permute.xlu0 %2382 }
 0x59d   : > { %v2470_v10 = vmax.f32 %v4130_v15, %v2383_v13 }
 0x59f   : > { %v2503_v39 = vsel %vm885_vm8, %v2502_v34, %v2470_v10  ;;  %v4380_v31 = vpop.permute.xlu2 %2378 }
 0x5a0   : > { %v2507_v41 = vperm.slane %v2503_v39, %v3719_v63 }
 0x5a1   : > { %v2393_v43 = vpop.permute.xlu1 %2392 }
 0x5a2   : > { %2628 = vst [vmem:[#allocation1 + $0x1] ss:$4 sm:$0xff] %v2507_v41  ;;  %v2475_v45 = vmax.f32 %v4157_v1, %v2393_v43 }
 0x5a4   : > { %v2377_v9 = vpop.permute.xlu0 %2376  ;;  %v2534_v34 = vrot.slane %v2475_v45, 4 }
 0x5a5   : > { %v2467_v37 = vmax.f32 %v4173_v51, %v2377_v9 }
 0x5a7   : > { %v2409_v46 = vpop.permute.xlu2 %2408 }
 0x5a8   : > { %v2483_v8 = vmax.f32 %v4269_v54, %v2409_v46 }
 0x5a9   : > { %v2399_v32 = vpop.permute.xlu1 %2398 }
 0x5aa   : > { %v2478_v2 = vmax.f32 %v4176_v59, %v2399_v32  ;;  %v2542_v11 = vrot.slane %v2483_v8, 4  ;;  %v2526_v32 = vrot.slane %v2467_v37, 4 }
 0x5ac   : > { %v2407_v22 = vpop.permute.xlu0 %2406 }
 0x5ad   : > { %v2482_v21 = vmax.f32 %v4203_v14, %v2407_v22 }
 0x5af   : > { %v2510_v57 = vrot.slane %v2482_v21, 4  ;;  %v2403_v22 = vpop.permute.xlu2 %2402 }
 0x5b1   : > { %v2423_v4 = vpop.permute.xlu1 %2422  ;;  %v2511_v61 = vsel %vm885_vm8, %v2510_v57, %v2478_v2 }
 0x5b2   : > { %v2490_v15 = vmax.f32 %v4217_v30, %v2423_v4  ;;  %v2515_v25 = vperm.slane %v2511_v61, %v3719_v63  ;;  %v2508_v30 = vrot.slane %v2507_v41, 4  ;;  %v2471_v41 = vmax.f32 %v4135_v17, %v2385_v18 }
 0x5b4   : > { %v2518_v49 = vrot.slane %v2490_v15, 4  ;;  %2630 = vst [vmem:[#allocation1 + $0x2] ss:$4 sm:$0xff] %v2515_v25  ;;  %v2401_v38 = vpop.permute.xlu0 %2400  ;;  %v2516_v36 = vrot.slane %v2515_v25, 4  ;;  %v2509_v60 = vsel %vm885_vm8, 0.0, %v2508_v30  ;;  %v2535_v9 = vsel %vm885_vm8, %v2534_v34, %v2471_v41 }
 0x5b5   : > { %v2479_v1 = vmax.f32 %v4229_v33, %v2401_v38 }
 0x5b6   : > { %v2519_v53 = vsel %vm885_vm8, %v2518_v49, %v2486_v16  ;;  %v2517_v13 = vsel %vm885_vm8, 0.0, %v2516_v36 }
 0x5b7   : > { %v2523_v14 = vperm.slane %v2519_v53, %v3719_v63  ;;  %v2543_v51 = vsel %vm885_vm8, %v2542_v11, %v2479_v1  ;;  %v2427_v61 = vpop.permute.xlu2 %2426 }
 0x5b8   : > { %v2492_v36 = vmax.f32 %v4309_v23, %v2427_v61 }
 0x5b9   : > { %2632 = vst [vmem:[#allocation1 + $0x3] ss:$4 sm:$0xff] %v2523_v14  ;;  %v2369_v59 = vpop.permute.xlu1 %2368  ;;  %v2524_v3 = vrot.slane %v2523_v14, 4 }
 0x5ba   : > { %v2463_v39 = vmax.f32 %v4138_v5, %v2369_v59  ;;  %v2539_v5 = vperm.slane %v2535_v9, %v3719_v63  ;;  %v2582_v37 = vrot.slane %v2492_v36, 4 }
 0x5bb   : > { %v2525_v26 = vsel %vm885_vm8, 0.0, %v2524_v3 }
 0x5bc   : > { %v2425_v27 = vpop.permute.xlu0 %2424  ;;  %v2527_v33 = vsel %vm885_vm8, %v2526_v32, %v2463_v39  ;;  %v2540_v49 = vrot.slane %v2539_v5, 4 }
 0x5bd   : > { %v2491_v10 = vmax.f32 %v4257_v50, %v2425_v27  ;;  %v2547_v50 = vperm.slane %v2543_v51, %v3719_v63  ;;  %v2531_v17 = vperm.slane %v2527_v33, %v3719_v63  ;;  %v2468_v27 = vmax.f32 %v4242_v47, %v4380_v31 }
 0x5be   : > { %v2541_v30 = vsel %vm885_vm8, 0.0, %v2540_v49 }
 0x5bf   : > { %v2550_v21 = vrot.slane %v2491_v10, 4  ;;  %v2532_v16 = vrot.slane %v2531_v17, 4  ;;  %v2548_v38 = vrot.slane %v2547_v50, 4  ;;  %v2397_v47 = vpop.permute.xlu2 %2396 }
 0x5c0   : > { %v4388_v55 = vld.sshfl [vmem:[#allocation1] sm:$0xff pattern:$0x73625140] }
 0x5c1   : > { %2645 = vst [vmem:[#allocation1 + $0x3] ss:$4 sm:$0xff] %v2525_v26  ;;  %v2417_v52 = vpop.permute.xlu1 %2416  ;;  %v2533_v3 = vsel %vm885_vm8, 0.0, %v2532_v16 }
 0x5c2   : > { %2639 = vst [vmem:[#allocation1] ss:$4 sm:$0xff] %v2501_v62  ;;  %v2487_v43 = vmax.f32 %v4234_v20, %v2417_v52  ;;  %v2480_v52 = vmax.f32 %v4290_v24, %v2403_v22 }
 0x5c3   : > { %2641 = vst [vmem:[#allocation1 + $0x1] ss:$4 sm:$0xff] %v2509_v60  ;;  %v2558_v60 = vrot.slane %v2468_v27, 4 }
 0x5c4   : > { %2643 = vst [vmem:[#allocation1 + $0x2] ss:$4 sm:$0xff] %v2517_v13  ;;  %v2395_v54 = vpop.permute.xlu0 %2394  ;;  %v2551_v57 = vsel %vm885_vm8, %v2550_v21, %v2487_v43  ;;  %v2477_v21 = vmax.f32 %v4336_v12, %v2397_v47 }
 0x5c5   : > { %v2555_v20 = vperm.slane %v2551_v57, %v3719_v63  ;;  %v2476_v58 = vmax.f32 %v4281_v0, %v2395_v54 }
 0x5c7   : > { %v2556_v25 = vrot.slane %v2555_v20, 4  ;;  %v2566_v31 = vrot.slane %v2476_v58, 4  ;;  %v2373_v54 = vpop.permute.xlu2 %2372 }
 0x5c9   : > { %v2387_v2 = vpop.permute.xlu1 %2386  ;;  %v2557_v14 = vsel %vm885_vm8, 0.0, %v2556_v25  ;;  %v2465_v25 = vmax.f32 %v4321_v29, %v2373_v54 }
 0x5ca   : > { %v2472_v45 = vmax.f32 %v4260_v28, %v2387_v2 }
 0x5cb   : > { %v2646_v4 = vld.sshfl [vmem:[#allocation1] sm:$0xff pattern:$0x73625140] }
 0x5cc   : > { %2658 = vst [vmem:[#allocation1 + $0x2] ss:$4 sm:$0xff] %v2547_v50  ;;  %2647 = vrot.lane.b32.xlu0 %v2646_v4, %s3424_s4  ;;  %v2371_v18 = vpop.permute.xlu0 %2370  ;;  %v2567_v23 = vsel %vm885_vm8, %v2566_v31, %v2472_v45 }
 0x5cd   : > { %2656 = vst [vmem:[#allocation1 + $0x1] ss:$4 sm:$0xff] %v2539_v5  ;;  %v2464_v0 = vmax.f32 %v4211_v19, %v2371_v18  ;;  %v2571_v34 = vperm.slane %v2567_v23, %v3719_v63 }
 0x5ce   : > { %2654 = vst [vmem:[#allocation1] ss:$4 sm:$0xff] %v2531_v17 }
 0x5cf   : > { %2660 = vst [vmem:[#allocation1 + $0x3] ss:$4 sm:$0xff] %v2555_v20  ;;  %v2559_v1 = vsel %vm885_vm8, %v2558_v60, %v2464_v0  ;;  %v2572_v32 = vrot.slane %v2571_v34, 4  ;;  %v2421_v20 = vpop.permute.xlu2 %2420 }
 0x5d0   : > { %v2563_v24 = vperm.slane %v2559_v1, %v3719_v63  ;;  %v2489_v16 = vmax.f32 %v4345_v56, %v2421_v20 }
 0x5d1   : > { %v2411_v15 = vpop.permute.xlu1 %2410  ;;  %v2573_v17 = vsel %vm885_vm8, 0.0, %v2572_v32 }
 0x5d2   : > { %v2484_v53 = vmax.f32 %v4317_v42, %v2411_v15  ;;  %v2549_v42 = vsel %vm885_vm8, 0.0, %v2548_v38  ;;  %v2564_v43 = vrot.slane %v2563_v24, 4 }
 0x5d4   : > { %v2419_v46 = vpop.permute.xlu0 %2418  ;;  %v2574_v26 = vrot.slane %v2484_v53, 4  ;;  %v2565_v5 = vsel %vm885_vm8, 0.0, %v2564_v43 }
 0x5d5   : > { %v2488_v8 = vmax.f32 %v4293_v7, %v2419_v46 }
 0x5d6   : > { %v2661_v59 = vld.sshfl [vmem:[#allocation1] sm:$0xff pattern:$0x73625140]  ;;  %v2575_v13 = vsel %vm885_vm8, %v2574_v26, %v2480_v52 }
 0x5d7   : > { %2675 = vst [vmem:[#allocation1 + $0x3] ss:$4 sm:$0xff] %v2557_v14  ;;  %2662 = vrot.lane.b32.xlu2 %v2661_v59, %s3423_s16  ;;  %v2583_v28 = vsel %vm885_vm8, %v2582_v37, %v2488_v8  ;;  %v2579_v19 = vperm.slane %v2575_v13, %v3719_v63 }
 0x5d8   : > { %2669 = vst [vmem:[#allocation1] ss:$4 sm:$0xff] %v2533_v3  ;;  %v2587_v7 = vperm.slane %v2583_v28, %v3719_v63 }
 0x5d9   : > { %2671 = vst [vmem:[#allocation1 + $0x1] ss:$4 sm:$0xff] %v2541_v30  ;;  %v2381_v62 = vpop.permute.xlu1 %2380  ;;  %v2580_v22 = vrot.slane %v2579_v19, 4 }
 0x5da   : > { %2673 = vst [vmem:[#allocation1 + $0x2] ss:$4 sm:$0xff] %v2549_v42  ;;  %v2588_v41 = vrot.slane %v2587_v7, 4  ;;  %v2469_v51 = vmax.f32 %v4341_v48, %v2381_v62 }
 0x5db   : > { %v2581_v12 = vsel %vm885_vm8, 0.0, %v2580_v22 }
 0x5dc   : > { %v2413_v11 = vpop.permute.xlu0 %2412  ;;  %v2589_v33 = vsel %vm885_vm8, 0.0, %v2588_v41  ;;  %v2590_v18 = vrot.slane %v2469_v51, 4 }
 0x5dd   : > { %v2485_v4 = vmax.f32 %v4350_v40, %v2413_v11 }
 0x5df   : > { %v2606_v40 = vrot.slane %v2485_v4, 4 }
 0x5e1   : > { %v4429_v10 = vld.sshfl [vmem:[#allocation1] sm:$0xff pattern:$0x73625140]  ;;  %v2429_v39 = vpop.permute.xlu1 %2428 }
 0x5e2   : > { %2686 = vst [vmem:[#allocation1 + $0x1] ss:$4 sm:$0xff] %v2571_v34  ;;  %v2493_v50 = vmax.f32 %v4358_v6, %v2429_v39  ;;  %v2598_v6 = vrot.slane %v2477_v21, 4 }
 0x5e3   : > { %2684 = vst [vmem:[#allocation1] ss:$4 sm:$0xff] %v2563_v24 }
 0x5e4   : > { %2688 = vst [vmem:[#allocation1 + $0x2] ss:$4 sm:$0xff] %v2579_v19  ;;  %v2389_v9 = vpop.permute.xlu0 %2388  ;;  %v2614_v15 = vrot.slane %v2493_v50, 4 }
 0x5e5   : > { %2690 = vst [vmem:[#allocation1 + $0x3] ss:$4 sm:$0xff] %v2587_v7  ;;  %v2473_v48 = vmax.f32 %v4312_v35, %v2389_v9  ;;  %v2591_v35 = vsel %vm885_vm8, %v2590_v18, %v2465_v25 }
 0x5e6   : > { %v2615_v53 = vsel %vm885_vm8, %v2614_v15, %v2489_v16 }
 0x5e7   : > { %v2599_v49 = vsel %vm885_vm8, %v2598_v6, %v2473_v48  ;;  %v2619_v59 = vperm.slane %v2615_v53, %v3719_v63 }
 0x5e8   : > { %v2603_v14 = vperm.slane %v2599_v49, %v3719_v63 }
 0x5e9   : > { %v2405_v57 = vpop.permute.xlu1 %2404 }
 0x5ea   : > { %v2481_v61 = vmax.f32 %v4329_v44, %v2405_v57  ;;  %v2595_v44 = vperm.slane %v2591_v35, %v3719_v63 }
 0x5ec   : > { %v4436_v2 = vld.sshfl [vmem:[#allocation1] sm:$0xff pattern:$0x73625140]  ;;  %v2607_v38 = vsel %vm885_vm8, %v2606_v40, %v2481_v61 }
 0x5ed   : > { %2703 = vst [vmem:[#allocation1 + $0x3] ss:$4 sm:$0xff] %v2589_v33  ;;  %v2611_v29 = vperm.slane %v2607_v38, %v3719_v63 }
 0x5ee   : > { %2697 = vst [vmem:[#allocation1] ss:$4 sm:$0xff] %v2565_v5 }
 0x5ef   : > { %2699 = vst [vmem:[#allocation1 + $0x1] ss:$4 sm:$0xff] %v2573_v17 }
 0x5f0   : > { %2701 = vst [vmem:[#allocation1 + $0x2] ss:$4 sm:$0xff] %v2581_v12 }
 0x5f7   : > { %v2704_v3 = vld.sshfl [vmem:[#allocation1] sm:$0xff pattern:$0x73625140] }
 0x5f8   : > { %2705 = vrot.lane.b32.xlu1 %v2704_v3, %s3424_s4  ;;  %2712 = vst [vmem:[#allocation1] ss:$4 sm:$0xff] %v2595_v44 }
 0x5f9   : > { %2714 = vst [vmem:[#allocation1 + $0x1] ss:$4 sm:$0xff] %v2603_v14 }
 0x5fa   : > { %2716 = vst [vmem:[#allocation1 + $0x2] ss:$4 sm:$0xff] %v2611_v29 }
 0x5fb   : > { %2718 = vst [vmem:[#allocation1 + $0x3] ss:$4 sm:$0xff] %v2619_v59 }
 0x5fc   : > { %3324 = shalt.err (!%p3321_p8)
}
 0x5fd   : > { %s3428_s13 = smov 512   ;;  %v2596_v63 = vrot.slane %v2595_v44, 4  ;;  %v2604_v56 = vrot.slane %v2603_v14, 4  ;;  %v2612_v58 = vrot.slane %v2611_v29, 4  ;;  %v2620_v46 = vrot.slane %v2619_v59, 4  ;;  %s3345_s29 = scalar_lea.hbm %s4533_s11, 32 }
 0x5fe   : > { %3001 = dma.vmem_to_hbm [thread:$0]  (%p3527_p5), %s2765_s2, 1024, %s2767_s20, %s2747_s23, %s3428_s13, %s3428_s13, %s3424_s4  }
 0x5ff   : > { %v2597_v27 = vsel %vm885_vm8, 0.0, %v2596_v63  ;;  %v2605_v36 = vsel %vm885_vm8, 0.0, %v2604_v56  ;;  %v2613_v42 = vsel %vm885_vm8, 0.0, %v2612_v58  ;;  %v2621_v45 = vsel %vm885_vm8, 0.0, %v2620_v46  ;;  %s2976_s4 = sshll.u32 %s3510_s21, 4  ;;  %s2954_s2 = sshll.u32 %s3781_s30, 4 }
 0x600   : > { %2677 = vrot.lane.b32.xlu1 %v4429_v10, %s3425_s19  ;;  %s2780_s26 = scalar_lea.hbm %s4533_s11, %s2976_s4  ;;  %s486_s24 = scalar_lea.vmem [#allocation14], %s2954_s2 }
 0x601   : > { %s2782_s17 = sshll.u32 %s486_s24, 4  ;;  %s2752_s21 = scalar_lea.sflag [#allocation15], %s3781_s30  ;;  %s2783_s17 = int_to_ptr.vmem [resolvable:$true] %s2782_s17 }
 0x602   : > { %v2719_v30 = vld.sshfl [vmem:[#allocation1] sm:$0xff pattern:$0x73625140] }
 0x603   : > { %2720 = vrot.lane.b32.xlu0 %v2719_v30, %s3423_s16  ;;  %2727 = vst [vmem:[#allocation1] ss:$4 sm:$0xff] %v2597_v27 }
 0x604   : > { %2729 = vst [vmem:[#allocation1 + $0x1] ss:$4 sm:$0xff] %v2605_v36 }
 0x605   : > { %2731 = vst [vmem:[#allocation1 + $0x2] ss:$4 sm:$0xff] %v2613_v42 }
 0x606   : > { %2733 = vst [vmem:[#allocation1 + $0x3] ss:$4 sm:$0xff] %v2621_v45 }
 0x60d   : > { %v2734_v26 = vld.sshfl [vmem:[#allocation1] sm:$0xff pattern:$0x73625140] }
 0x60e   : > { %2735 = vrot.lane.b32.xlu2 %v2734_v26, %s3425_s19  ;;  %s2784_s19 = sshll.u32 %s2780_s26, 4  ;;  %s2785_s19 = int_to_ptr.hbm [resolvable:$true] %s2784_s19 }
 0x60f   : > { %s3339_s20 = sshra.s32 %s2785_s19, 4  ;;  %s3340_s20 = int_to_ptr.hbm [resolvable:$true] %s3339_s20 }
 0x610   : > { %s3341_s23 = scalar_lea.hbm %s3340_s20, 16  ;;  %p3346_p12 = scmp.lt.s32.totalorder %s3340_s20, %s4533_s11 }
 0x611   : > { %p3342_p9 = scmp.ne.s32.totalorder %s3340_s20, %s3341_s23  ;;  %p3347_p13 = scmp.lt.s32.totalorder %s3345_s29, %s3341_s23 }
 0x613   : > { %p3343_p10 = pnand %p3342_p9, %p3527_p5  ;;  %p3348_p0 = por %p3347_p13, %p3346_p12 }
 0x615   : > { %p3344_p11 = pneg %p3343_p10 }
 0x617   : > { %p3349_p1 = pnand %p3348_p0, %p3344_p11 }
 0x631   : > { %v2663_v8 = vpop.permute.xlu2 %2662 }
 0x63e   : > { %v2648_v0 = vpop.permute.xlu0 %2647 }
 0x63f   : > { %v2738_v52 = vsel %vm961_vm9, %v4388_v55, %v2648_v0 }
 0x640   : > { %v2739_v31 = vsel %vm1117_vm0, %v2738_v52, %v2663_v8 }
 0x668   : > { %v2736_v55 = vpop.permute.xlu2 %2735 }
 0x66a   : > { %v2706_v62 = vpop.permute.xlu1 %2705 }
 0x66b   : > { %v2741_v37 = vsel %vm961_vm9, %v4436_v2, %v2706_v62 }
 0x672   : > { %v2678_v47 = vpop.permute.xlu1 %2677 }
 0x673   : > { %v2740_v60 = vsel %vm1119_vm1, %v2739_v31, %v2678_v47 }
 0x674   : > { %2744 = vst [vmem:[%s486_s24] sm:$0xff] %v2740_v60 }
 0x675   : > { %v2721_v23 = vpop.permute.xlu0 %2720 }
 0x676   : > { %v2742_v13 = vsel %vm1117_vm0, %v2741_v37, %v2721_v23 }
 0x677   : > { %v2743_v1 = vsel %vm1119_vm1, %v2742_v13, %v2736_v55 }
 0x678   : > { %2745 = vst [vmem:[%s486_s24 + $0x8] sm:$0xff] %v2743_v1 }
 0x679   : > { %3352 = shalt.err (!%p3349_p1)
}
 0x67a   : > { %3002 = dma.vmem_to_hbm [thread:$0]  (%p3527_p5), %s2783_s17, 256, %s2785_s19, %s2752_s21  }
 0x67b PF: > { %s4556_s30 = sld [smem:[#allocation24_spill]] }
 0x67c   : > { %s4557_s14 = sld [smem:[#allocation22_spill]] }
 0x681   : > { %p3043_p2 = scmp.ge.s32.totalorder %s4556_s30, 2 }
 0x682   : > { %s2796_s13 = sand.u32 1, %s4557_s14  }
 0x683   : > { %p3025_p3 = pnand %p3043_p2, %p3531_p6  ;;  %s2797_s4 = scalar_lea.sflag [#allocation4], %s2796_s13 }
 0x685   : > { %p3026_p4 = pneg %p3025_p3 }
 0x687   : > { %3386 = dma.done.wait (%p3026_p4), %s2797_s4, 1024  }
 0x688   : > { %3388 = vsyncadd (%p3026_p4), %s2797_s4, 4294966272  ;;  %s2807_s2 = scalar_lea.sflag [#allocation15], %s2796_s13 }
 0x689   : > { %3390 = dma.done.wait (%p3026_p4), %s2807_s2, 256  }
 0x68a   : > { %3392 = vsyncadd (%p3026_p4), %s2807_s2, 4294967040  ;;  %s4559_s20 = sld [smem:[#allocation25_spill]]  ;;  %s4562_s17 = smov %s3399_s18 }
 0x68b   : > { %s4560_s16 = sld [smem:[#allocation23_spill]] }
 0x68c   : > { %s4561_s19 = sld [smem:[#allocation26_spill]] }
 0x690   : > { %p29_p5 = scmp.ge.s32.totalorder %s4559_s20, 4  }
 0x691   : > { %s4563_s18 = smov %s4560_s16 }
 0x692   :  { %31 = sbr.rel (!%p29_p5) target bundleno = 13 (0xd), region = 161 }
 0x697   :  { %2813 = vsyncpa [#allocation3], 1 }
 0x698   :  { %2815 = vsyncpa [#allocation3 + $0x1], 1 }
 0x699   :  { %2816 = vsyncpa [#allocation6], 1 }
 0x69a   :  { %2817 = vsyncpa [#allocation9], 1 }
 0x69b   :  { %2818 = vsyncpa [#allocation12], 1 }
 0x69c   :  { %2819 = vsyncpa [#allocation4], 1 }
 0x69d   :  { %2821 = vsyncpa [#allocation4 + $0x1], 1 }
 0x69e   :  { %2822 = vsyncpa [#allocation15], 1 }
 0x69f   :  { %2824 = vsyncpa [#allocation15 + $0x1], 1 }

</bundles_post_ra>
